<compile_context>
chip_gen: v7x
topology: tpu7x:2x2x1
jax: 0.10.0
libtpu: 0.0.40
codegen_flags: <defaults>
</compile_context>

<pallas_src>
import math
import functools

import jax
import jax.numpy as jnp
from jax import lax
from jax.experimental import pallas as pl
from jax.experimental.pallas import tpu as pltpu


def _layer_norm_f32(v, g, b, eps=1e-5):
    mu = jnp.mean(v, axis=-1, keepdims=True)
    var = jnp.mean((v - mu) ** 2, axis=-1, keepdims=True)
    return (v - mu) * jax.lax.rsqrt(var + eps) * g + b


def encoder_cell_kernel(x_ref,
                        ln1g_ref, ln1b_ref,
                        wq_ref, bq_ref,
                        wkv_ref, bkv_ref,
                        wo_ref, bo_ref,
                        ln2g_ref, ln2b_ref,
                        w1_ref, b1_ref, w2_ref, b2_ref,
                        out_ref,
                        kv_scr,
                        *, num_heads, dim_attention, block_s, num_s_tiles,
                        kv_chunk):
    f32 = jnp.float32
    bf16 = jnp.bfloat16
    H, Dh = num_heads, dim_attention
    D = H * Dh
    S = x_ref.shape[0]
    s_idx = pl.program_id(1)

    # ---- once per batch element: chunked LN1 + fused K/V projection ----
    # Lane-dense layout: kv_scr[:, :D] = K, kv_scr[:, D:] = V  (both (S, D) bf16).
    @pl.when(s_idx == 0)
    def _():
        def project(row0):
            xc = x_ref[pl.ds(row0, kv_chunk), :].astype(f32)
            x1 = _layer_norm_f32(xc, ln1g_ref[...], ln1b_ref[...])
            kv = jnp.dot(x1.astype(bf16), wkv_ref[...],
                         preferred_element_type=f32) + bkv_ref[...]
            kv_scr[pl.ds(row0, kv_chunk), :] = kv.astype(bf16)

        n_chunks = S // kv_chunk
        if n_chunks == 1:
            project(0)
        else:
            @pl.loop(0, n_chunks)
            def _(c):
                project(pl.multiple_of(c * kv_chunk, kv_chunk))

    # ---- per q-tile ----
    if num_s_tiles == 1:
        x_t = x_ref[...].astype(f32)                                    # (Ts, D)
    else:
        row0 = pl.multiple_of(s_idx * block_s, block_s)
        x_t = x_ref[pl.ds(row0, block_s), :].astype(f32)

    x1_t = _layer_norm_f32(x_t, ln1g_ref[...], ln1b_ref[...])
    # wq/bq already carry the 1/sqrt(Dh) softmax scale (folded on the host).
    q = (jnp.dot(x1_t.astype(bf16), wq_ref[...],
                 preferred_element_type=f32) + bq_ref[...]).astype(bf16)  # (Ts, D)

    # residual-1 accumulator, seeded with x + w_o bias; heads accumulate into it.
    attn = x_t + bo_ref[...]                                            # (Ts, D) f32
    # TODO(synk): optional boolean tgt_mask (masked_fill -1e6) is not wired in;
    # the module's default tgt_mask=None path is what is reproduced here.
    for h in range(H):
        lo = h * Dh
        q_h = q[:, lo:lo + Dh]                                          # (Ts, Dh) bf16
        k_h = kv_scr[:, lo:lo + Dh]                                     # (S,  Dh) bf16
        v_h = kv_scr[:, D + lo:D + lo + Dh]                             # (S,  Dh) bf16

        s_h = lax.dot_general(q_h, k_h, (((1,), (1,)), ((), ())),
                              preferred_element_type=f32)               # (Ts, S)
        s_h = s_h - jnp.max(s_h, axis=-1, keepdims=True)
        p_h = jnp.exp(s_h)
        denom = jnp.sum(p_h, axis=-1, keepdims=True)
        ctx = jnp.dot(p_h.astype(bf16), v_h,
                      preferred_element_type=f32)                       # (Ts, Dh)
        ctx = ctx * pl.reciprocal(denom, approx=True)                   # normalize the small tensor
        attn = attn + jnp.dot(ctx.astype(bf16), wo_ref[lo:lo + Dh, :],
                              preferred_element_type=f32)
    res = attn                                                          # residual 1 (f32)

    y = _layer_norm_f32(res, ln2g_ref[...], ln2b_ref[...])
    hdn = jnp.dot(y.astype(bf16), w1_ref[...], preferred_element_type=f32)
    hdn = jnp.maximum(hdn.astype(bf16) + b1_ref[...], 0)                # bf16 bias+ReLU
    ffn = jnp.dot(hdn, w2_ref[...], preferred_element_type=f32) + b2_ref[...]

    out_ref[...] = (res + ffn).astype(out_ref.dtype)                    # residual 2


def _pick_block_s(S, max_block=256):
    """Largest divisor of S <= max_block, preferring multiples of 128/16/8."""
    if S <= max_block:
        return S
    best = 1
    best_by_align = {128: None, 16: None, 8: None}
    for d in range(1, max_block + 1):
        if S % d == 0:
            best = d
            for a in (128, 16, 8):
                if d % a == 0:
                    best_by_align[a] = d
    for a in (128, 16, 8):
        if best_by_align[a] is not None:
            return best_by_align[a]
    return best


def _default_vmem_limit():
    cap = 128 * 1024 * 1024
    try:
        info = pltpu.get_tpu_info()
        cap = int(getattr(info, "vmem_capacity_bytes", cap))
    except Exception:  # noqa: BLE001 - fall back to a conservative default
        pass
    # leave ~25% headroom for compiler-internal scratch / spill buffers
    return max(32 * 1024 * 1024, min((cap * 3) // 4, 100 * 1024 * 1024))


def transformer_encoder_cell(x, params, *, num_heads, dim_attention,
                             single_buffer_weights=True, block_s=None,
                             max_block=256, vmem_limit_bytes=None):
    """x: [B, S, D] float32.  params: dict of f32 weights (see init_params)."""
    B, S, D = x.shape
    assert D == num_heads * dim_attention
    bf16, f32 = jnp.bfloat16, jnp.float32

    if block_s is None:
        block_s = _pick_block_s(S, max_block)
    assert S % block_s == 0
    if block_s != S and block_s % 8 != 0:
        block_s = S                       # keep the out_spec (8,128)-legal
    n_s = S // block_s
    kv_chunk = _pick_block_s(S, max_block)

    if vmem_limit_bytes is None:
        vmem_limit_bytes = _default_vmem_limit()

    inv_scale = 1.0 / math.sqrt(dim_attention)
    # Fold the softmax 1/sqrt(Dh) into the Q projection; fuse K/V weights.
    wq = (params['wq'] * inv_scale).astype(bf16)
    bq = (params['bq'] * inv_scale).astype(f32)
    wkv = jnp.concatenate([params['wk'], params['wv']], axis=1).astype(bf16)
    bkv = jnp.concatenate([params['bk'], params['bv']], axis=1).astype(f32)
    weights = [
        params['ln1_g'].astype(f32), params['ln1_b'].astype(f32),
        wq, bq, wkv, bkv,
        params['wo'].astype(bf16), params['bo'].astype(f32),
        params['ln2_g'].astype(f32), params['ln2_b'].astype(f32),
        params['w1'].astype(bf16), params['b1'].astype(bf16),
        params['w2'].astype(bf16), params['b2'].astype(f32),
    ]

    def weight_spec(w):
        kwargs = {}
        if single_buffer_weights:
            # constant index map -> double-buffering weights is pure VMEM waste
            kwargs['pipeline_mode'] = pl.Buffered(1)
        return pl.BlockSpec(w.shape, lambda b, s: (0, 0), **kwargs)

    in_specs = [pl.BlockSpec((None, S, D), lambda b, s: (b, 0, 0))]   # full x slab
    in_specs += [weight_spec(w) for w in weights]
    out_spec = pl.BlockSpec((None, block_s, D), lambda b, s: (b, s, 0))

    kernel = functools.partial(encoder_cell_kernel,
                               num_heads=num_heads,
                               dim_attention=dim_attention,
                               block_s=block_s,
                               num_s_tiles=n_s,
                               kv_chunk=kv_chunk)

    scratch_shapes = [
        pltpu.VMEM((S, 2 * D), bf16),      # [K | V], lane-dense
    ]

    return pl.pallas_call(
        kernel,
        out_shape=jax.ShapeDtypeStruct((B, S, D), x.dtype),
        grid=(B, n_s),
        in_specs=in_specs,
        out_specs=out_spec,
        scratch_shapes=scratch_shapes,
        compiler_params=pltpu.CompilerParams(
            dimension_semantics=("parallel", "arbitrary"),
            vmem_limit_bytes=vmem_limit_bytes),
    )(x, *weights)


def init_params(key, dim_input, num_heads, dim_attention):
    assert dim_input == num_heads * dim_attention
    D = dim_input
    ks = jax.random.split(key, 8)
    scale = 0.05

    def lin(k, din, dout):
        kw, kb = jax.random.split(k)
        # stored as [in, out] so the kernel does x @ W + b
        w = scale * jax.random.normal(kw, (din, dout), jnp.float32)
        b = scale * jax.random.normal(kb, (1, dout), jnp.float32)
        return w, b

    wq, bq = lin(ks[0], D, D)
    wk, bk = lin(ks[1], D, D)
    wv, bv = lin(ks[2], D, D)
    wo, bo = lin(ks[3], D, D)
    w1, b1 = lin(ks[4], D, 4 * D)
    w2, b2 = lin(ks[5], 4 * D, D)
    ln1_g = jnp.ones((1, D), jnp.float32)
    ln1_b = jnp.zeros((1, D), jnp.float32)
    ln2_g = jnp.ones((1, D), jnp.float32)
    ln2_b = jnp.zeros((1, D), jnp.float32)
    return dict(ln1_g=ln1_g, ln1_b=ln1_b,
                wq=wq, bq=bq, wk=wk, bk=bk, wv=wv, bv=bv, wo=wo, bo=bo,
                ln2_g=ln2_g, ln2_b=ln2_b,
                w1=w1, b1=b1, w2=w2, b2=b2)


def reference_forward(x, p, *, num_heads, dim_attention):
    """Pure-JAX f32 reference mirroring the PyTorch forward (tgt_mask=None)."""
    B, S, D = x.shape

    def ln(v, g, b):
        mu = jnp.mean(v, -1, keepdims=True)
        var = jnp.mean((v - mu) ** 2, -1, keepdims=True)
        return (v - mu) / jnp.sqrt(var + 1e-5) * g + b

    x1 = ln(x, p["ln1_g"], p["ln1_b"])
    q = x1 @ p["wq"] + p["bq"]
    k = x1 @ p["wk"] + p["bk"]
    v = x1 @ p["wv"] + p["bv"]

    def split_heads(t):
        return t.reshape(B, S, num_heads, dim_attention).transpose(0, 2, 1, 3)

    qh, kh, vh = split_heads(q), split_heads(k), split_heads(v)
    scores = (qh @ kh.transpose(0, 1, 3, 2)) / math.sqrt(dim_attention)
    scores = jax.nn.softmax(scores, axis=-1)
    a = (scores @ vh).transpose(0, 2, 1, 3).reshape(B, S, D)
    attn_out = a @ p["wo"] + p["bo"]
    res = x + attn_out
    y = ln(res, p["ln2_g"], p["ln2_b"])
    ffn = jnp.maximum(y @ p["w1"] + p["b1"], 0.0) @ p["w2"] + p["b2"]
    return res + ffn


if __name__ == "__main__":
    B, S = 2, 8
    num_heads, dim_attention = 4, 8
    dim_input = num_heads * dim_attention  # 32

    key = jax.random.PRNGKey(0)
    kx, kp = jax.random.split(key)
    x = jax.random.normal(kx, (B, S, dim_input), jnp.float32)
    params = init_params(kp, dim_input, num_heads, dim_attention)

    ref = reference_forward(x, params,
                            num_heads=num_heads, dim_attention=dim_attention)

    out, last_err = None, None
    # Try single-buffered weights first (VMEM discipline on v7x); fall back to
    # the default double-buffered pipeline if this build rejects pl.Buffered(1).
    for single_buffer in (True, False):
        try:
            cand = transformer_encoder_cell(
                x, params,
                num_heads=num_heads, dim_attention=dim_attention,
                single_buffer_weights=single_buffer)
            cand = jax.block_until_ready(cand)
            assert cand.shape == (B, S, dim_input)
            # bf16 MXU operands with f32 accumulation -> looser tolerance than pure f32
            assert jnp.allclose(cand, ref, atol=2e-2, rtol=2e-2), "mismatch vs reference"
            out = cand
            break
        except Exception as e:  # noqa: BLE001
            last_err = e
    if out is None:
        raise last_err

    print("KERNEL_OK")
</pallas_src>

<mosaic_0001>
module attributes {stable_mosaic.version = 11 : i64} {
  func.func @encoder_cell_kernel(%arg0: i32, %arg1: i32, %arg2: memref<1x8x32xf32, #tpu.memory_space<vmem>>, %arg3: memref<1x32xf32, #tpu.memory_space<vmem>>, %arg4: memref<1x32xf32, #tpu.memory_space<vmem>>, %arg5: memref<32x32xbf16, #tpu.memory_space<vmem>>, %arg6: memref<1x32xf32, #tpu.memory_space<vmem>>, %arg7: memref<32x64xbf16, #tpu.memory_space<vmem>>, %arg8: memref<1x64xf32, #tpu.memory_space<vmem>>, %arg9: memref<32x32xbf16, #tpu.memory_space<vmem>>, %arg10: memref<1x32xf32, #tpu.memory_space<vmem>>, %arg11: memref<1x32xf32, #tpu.memory_space<vmem>>, %arg12: memref<1x32xf32, #tpu.memory_space<vmem>>, %arg13: memref<32x128xbf16, #tpu.memory_space<vmem>>, %arg14: memref<1x128xbf16, #tpu.memory_space<vmem>>, %arg15: memref<128x32xbf16, #tpu.memory_space<vmem>>, %arg16: memref<1x32xf32, #tpu.memory_space<vmem>>, %arg17: memref<1x8x32xf32, #tpu.memory_space<vmem>>, %arg18: memref<8x64xbf16, #tpu.memory_space<vmem>>) attributes {dimension_semantics = [#tpu.dimension_semantics<parallel>, #tpu.dimension_semantics<arbitrary>], iteration_bounds = array<i64: 2, 1>, scalar_prefetch = 0 : i64, scratch_operands = 1 : i64, tpu.core_type = #tpu.core_type<tc>, window_params = [{transform_indices = @transform_0, window_bounds = array<i64: 1, 8, 32>}, {pipeline_mode = #tpu.pipeline_mode<synchronous>, transform_indices = @transform_1, window_bounds = array<i64: 1, 32>}, {pipeline_mode = #tpu.pipeline_mode<synchronous>, transform_indices = @transform_2, window_bounds = array<i64: 1, 32>}, {pipeline_mode = #tpu.pipeline_mode<synchronous>, transform_indices = @transform_3, window_bounds = array<i64: 32, 32>}, {pipeline_mode = #tpu.pipeline_mode<synchronous>, transform_indices = @transform_4, window_bounds = array<i64: 1, 32>}, {pipeline_mode = #tpu.pipeline_mode<synchronous>, transform_indices = @transform_5, window_bounds = array<i64: 32, 64>}, {pipeline_mode = #tpu.pipeline_mode<synchronous>, transform_indices = @transform_6, window_bounds = array<i64: 1, 64>}, {pipeline_mode = #tpu.pipeline_mode<synchronous>, transform_indices = @transform_7, window_bounds = array<i64: 32, 32>}, {pipeline_mode = #tpu.pipeline_mode<synchronous>, transform_indices = @transform_8, window_bounds = array<i64: 1, 32>}, {pipeline_mode = #tpu.pipeline_mode<synchronous>, transform_indices = @transform_9, window_bounds = array<i64: 1, 32>}, {pipeline_mode = #tpu.pipeline_mode<synchronous>, transform_indices = @transform_10, window_bounds = array<i64: 1, 32>}, {pipeline_mode = #tpu.pipeline_mode<synchronous>, transform_indices = @transform_11, window_bounds = array<i64: 32, 128>}, {pipeline_mode = #tpu.pipeline_mode<synchronous>, transform_indices = @transform_12, window_bounds = array<i64: 1, 128>}, {pipeline_mode = #tpu.pipeline_mode<synchronous>, transform_indices = @transform_13, window_bounds = array<i64: 128, 32>}, {pipeline_mode = #tpu.pipeline_mode<synchronous>, transform_indices = @transform_14, window_bounds = array<i64: 1, 32>}, {transform_indices = @transform_15, window_bounds = array<i64: 1, 8, 32>}]} {
    %c0_i32 = arith.constant 0 : i32
    %0 = arith.cmpi eq, %arg1, %c0_i32 : i32
    %1 = arith.extui %0 : i1 to i32
    %c0_i32_0 = arith.constant 0 : i32
    %2 = arith.cmpi ne, %1, %c0_i32_0 : i32
    scf.if %2 {
      %c0_78 = arith.constant 0 : index
      %c0_79 = arith.constant 0 : index
      %c0_80 = arith.constant 0 : index
      %161 = vector.load %arg2[%c0_78, %c0_79, %c0_80] : memref<1x8x32xf32, #tpu.memory_space<vmem>>, vector<1x8x32xf32>
      %162 = vector.shape_cast %161 : vector<1x8x32xf32> to vector<8x32xf32>
      %c0_81 = arith.constant 0 : index
      %c0_82 = arith.constant 0 : index
      %163 = vector.load %arg3[%c0_81, %c0_82] : memref<1x32xf32, #tpu.memory_space<vmem>>, vector<1x32xf32>
      %c0_83 = arith.constant 0 : index
      %c0_84 = arith.constant 0 : index
      %164 = vector.load %arg4[%c0_83, %c0_84] : memref<1x32xf32, #tpu.memory_space<vmem>>, vector<1x32xf32>
      %cst_85 = arith.constant dense<0.000000e+00> : vector<8xf32>
      %165 = vector.multi_reduction <add>, %162, %cst_85 [1] : vector<8x32xf32> to vector<8xf32>
      %166 = vector.shape_cast %165 : vector<8xf32> to vector<8x1xf32>
      %cst_86 = arith.constant 3.200000e+01 : f32
      %167 = vector.broadcast %cst_86 : f32 to vector<8x1xf32>
      %168 = arith.divf %166, %167 : vector<8x1xf32>
      %169 = vector.broadcast %168 : vector<8x1xf32> to vector<8x32xf32>
      %170 = arith.subf %162, %169 : vector<8x32xf32>
      %171 = arith.mulf %170, %170 : vector<8x32xf32>
      %cst_87 = arith.constant dense<0.000000e+00> : vector<8xf32>
      %172 = vector.multi_reduction <add>, %171, %cst_87 [1] : vector<8x32xf32> to vector<8xf32>
      %173 = vector.shape_cast %172 : vector<8xf32> to vector<8x1xf32>
      %cst_88 = arith.constant 3.200000e+01 : f32
      %174 = vector.broadcast %cst_88 : f32 to vector<8x1xf32>
      %175 = arith.divf %173, %174 : vector<8x1xf32>
      %176 = vector.broadcast %168 : vector<8x1xf32> to vector<8x32xf32>
      %177 = arith.subf %162, %176 : vector<8x32xf32>
      %cst_89 = arith.constant 9.99999974E-6 : f32
      %178 = vector.broadcast %cst_89 : f32 to vector<8x1xf32>
      %179 = arith.addf %175, %178 : vector<8x1xf32>
      %180 = math.rsqrt %179 : vector<8x1xf32>
      %181 = vector.broadcast %180 : vector<8x1xf32> to vector<8x32xf32>
      %182 = arith.mulf %177, %181 : vector<8x32xf32>
      %183 = vector.broadcast %163 : vector<1x32xf32> to vector<8x32xf32>
      %184 = arith.mulf %182, %183 : vector<8x32xf32>
      %185 = vector.broadcast %164 : vector<1x32xf32> to vector<8x32xf32>
      %186 = arith.addf %184, %185 : vector<8x32xf32>
      %187 = arith.truncf %186 : vector<8x32xf32> to vector<8x32xbf16>
      %c0_90 = arith.constant 0 : index
      %c0_91 = arith.constant 0 : index
      %188 = vector.load %arg7[%c0_90, %c0_91] : memref<32x64xbf16, #tpu.memory_space<vmem>>, vector<32x64xbf16>
      %cst_92 = arith.constant dense<0.000000e+00> : vector<8x64xf32>
      %189 = tpu.matmul %187, %188, %cst_92 {dimension_numbers = #tpu.dot_dimension_numbers<[1], [0], [0], [1], [0, 0, 1, 1], [], []>} : vector<8x32xbf16>, vector<32x64xbf16>, vector<8x64xf32> -> vector<8x64xf32>
      %c0_93 = arith.constant 0 : index
      %c0_94 = arith.constant 0 : index
      %190 = vector.load %arg8[%c0_93, %c0_94] : memref<1x64xf32, #tpu.memory_space<vmem>>, vector<1x64xf32>
      %191 = vector.broadcast %190 : vector<1x64xf32> to vector<8x64xf32>
      %192 = arith.addf %189, %191 : vector<8x64xf32>
      %193 = arith.truncf %192 : vector<8x64xf32> to vector<8x64xbf16>
      %c0_95 = arith.constant 0 : index
      %c0_96 = arith.constant 0 : index
      %194 = vector.load %arg18[%c0_95, %c0_96] : memref<8x64xbf16, #tpu.memory_space<vmem>>, vector<8x64xbf16>
      tpu.vector_store %arg18[%c0_95, %c0_96], %193 {strides = array<i32>} : memref<8x64xbf16, #tpu.memory_space<vmem>>, vector<8x64xbf16>,
    } else {
    }
    %c0 = arith.constant 0 : index
    %c0_1 = arith.constant 0 : index
    %c0_2 = arith.constant 0 : index
    %3 = vector.load %arg2[%c0, %c0_1, %c0_2] : memref<1x8x32xf32, #tpu.memory_space<vmem>>, vector<1x8x32xf32>
    %4 = vector.shape_cast %3 : vector<1x8x32xf32> to vector<8x32xf32>
    %c0_3 = arith.constant 0 : index
    %c0_4 = arith.constant 0 : index
    %5 = vector.load %arg3[%c0_3, %c0_4] : memref<1x32xf32, #tpu.memory_space<vmem>>, vector<1x32xf32>
    %c0_5 = arith.constant 0 : index
    %c0_6 = arith.constant 0 : index
    %6 = vector.load %arg4[%c0_5, %c0_6] : memref<1x32xf32, #tpu.memory_space<vmem>>, vector<1x32xf32>
    %cst = arith.constant dense<0.000000e+00> : vector<8xf32>
    %7 = vector.multi_reduction <add>, %4, %cst [1] : vector<8x32xf32> to vector<8xf32>
    %8 = vector.shape_cast %7 : vector<8xf32> to vector<8x1xf32>
    %cst_7 = arith.constant 3.200000e+01 : f32
    %9 = vector.broadcast %cst_7 : f32 to vector<8x1xf32>
    %10 = arith.divf %8, %9 : vector<8x1xf32>
    %11 = vector.broadcast %10 : vector<8x1xf32> to vector<8x32xf32>
    %12 = arith.subf %4, %11 : vector<8x32xf32>
    %13 = arith.mulf %12, %12 : vector<8x32xf32>
    %cst_8 = arith.constant dense<0.000000e+00> : vector<8xf32>
    %14 = vector.multi_reduction <add>, %13, %cst_8 [1] : vector<8x32xf32> to vector<8xf32>
    %15 = vector.shape_cast %14 : vector<8xf32> to vector<8x1xf32>
    %cst_9 = arith.constant 3.200000e+01 : f32
    %16 = vector.broadcast %cst_9 : f32 to vector<8x1xf32>
    %17 = arith.divf %15, %16 : vector<8x1xf32>
    %18 = vector.broadcast %10 : vector<8x1xf32> to vector<8x32xf32>
    %19 = arith.subf %4, %18 : vector<8x32xf32>
    %cst_10 = arith.constant 9.99999974E-6 : f32
    %20 = vector.broadcast %cst_10 : f32 to vector<8x1xf32>
    %21 = arith.addf %17, %20 : vector<8x1xf32>
    %22 = math.rsqrt %21 : vector<8x1xf32>
    %23 = vector.broadcast %22 : vector<8x1xf32> to vector<8x32xf32>
    %24 = arith.mulf %19, %23 : vector<8x32xf32>
    %25 = vector.broadcast %5 : vector<1x32xf32> to vector<8x32xf32>
    %26 = arith.mulf %24, %25 : vector<8x32xf32>
    %27 = vector.broadcast %6 : vector<1x32xf32> to vector<8x32xf32>
    %28 = arith.addf %26, %27 : vector<8x32xf32>
    %29 = arith.truncf %28 : vector<8x32xf32> to vector<8x32xbf16>
    %c0_11 = arith.constant 0 : index
    %c0_12 = arith.constant 0 : index
    %30 = vector.load %arg5[%c0_11, %c0_12] : memref<32x32xbf16, #tpu.memory_space<vmem>>, vector<32x32xbf16>
    %cst_13 = arith.constant dense<0.000000e+00> : vector<8x32xf32>
    %31 = tpu.matmul %29, %30, %cst_13 {dimension_numbers = #tpu.dot_dimension_numbers<[1], [0], [0], [1], [0, 0, 1, 1], [], []>} : vector<8x32xbf16>, vector<32x32xbf16>, vector<8x32xf32> -> vector<8x32xf32>
    %c0_14 = arith.constant 0 : index
    %c0_15 = arith.constant 0 : index
    %32 = vector.load %arg6[%c0_14, %c0_15] : memref<1x32xf32, #tpu.memory_space<vmem>>, vector<1x32xf32>
    %33 = vector.broadcast %32 : vector<1x32xf32> to vector<8x32xf32>
    %34 = arith.addf %31, %33 : vector<8x32xf32>
    %35 = arith.truncf %34 : vector<8x32xf32> to vector<8x32xbf16>
    %c0_16 = arith.constant 0 : index
    %c0_17 = arith.constant 0 : index
    %36 = vector.load %arg10[%c0_16, %c0_17] : memref<1x32xf32, #tpu.memory_space<vmem>>, vector<1x32xf32>
    %37 = vector.broadcast %36 : vector<1x32xf32> to vector<8x32xf32>
    %38 = arith.addf %4, %37 : vector<8x32xf32>
    %39 = vector.extract_strided_slice %35 {offsets = [0, 0], sizes = [8, 8], strides = [1, 1]} : vector<8x32xbf16> to vector<8x8xbf16>
    %c0_18 = arith.constant 0 : index
    %c0_19 = arith.constant 0 : index
    %40 = vector.load %arg18[%c0_18, %c0_19] : memref<8x64xbf16, #tpu.memory_space<vmem>>, vector<8x8xbf16>
    %c0_20 = arith.constant 0 : index
    %c32 = arith.constant 32 : index
    %41 = vector.load %arg18[%c0_20, %c32] : memref<8x64xbf16, #tpu.memory_space<vmem>>, vector<8x8xbf16>
    %cst_21 = arith.constant dense<0.000000e+00> : vector<8x8xf32>
    %42 = tpu.matmul %39, %40, %cst_21 {dimension_numbers = #tpu.dot_dimension_numbers<[1], [1], [0], [0], [0, 0, 1, 0], [], []>} : vector<8x8xbf16>, vector<8x8xbf16>, vector<8x8xf32> -> vector<8x8xf32>
    %cst_22 = arith.constant dense<0xFF800000> : vector<8xf32>
    %43 = vector.multi_reduction <maximumf>, %42, %cst_22 [1] : vector<8x8xf32> to vector<8xf32>
    %44 = vector.shape_cast %43 : vector<8xf32> to vector<8x1xf32>
    %45 = vector.broadcast %44 : vector<8x1xf32> to vector<8x8xf32>
    %46 = arith.subf %42, %45 : vector<8x8xf32>
    %47 = math.exp %46 : vector<8x8xf32>
    %cst_23 = arith.constant dense<0.000000e+00> : vector<8xf32>
    %48 = vector.multi_reduction <add>, %47, %cst_23 [1] : vector<8x8xf32> to vector<8xf32>
    %49 = vector.shape_cast %48 : vector<8xf32> to vector<8x1xf32>
    %50 = arith.truncf %47 : vector<8x8xf32> to vector<8x8xbf16>
    %cst_24 = arith.constant dense<0.000000e+00> : vector<8x8xf32>
    %51 = tpu.matmul %50, %41, %cst_24 {dimension_numbers = #tpu.dot_dimension_numbers<[1], [0], [0], [1], [0, 0, 1, 1], [], []>} : vector<8x8xbf16>, vector<8x8xbf16>, vector<8x8xf32> -> vector<8x8xf32>
    %52 = tpu.reciprocal %49 {approx = true} : vector<8x1xf32> -> vector<8x1xf32>
    %53 = vector.broadcast %52 : vector<8x1xf32> to vector<8x8xf32>
    %54 = arith.mulf %51, %53 : vector<8x8xf32>
    %55 = arith.truncf %54 : vector<8x8xf32> to vector<8x8xbf16>
    %c0_25 = arith.constant 0 : index
    %c0_26 = arith.constant 0 : index
    %56 = vector.load %arg9[%c0_25, %c0_26] : memref<32x32xbf16, #tpu.memory_space<vmem>>, vector<8x32xbf16>
    %cst_27 = arith.constant dense<0.000000e+00> : vector<8x32xf32>
    %57 = tpu.matmul %55, %56, %cst_27 {dimension_numbers = #tpu.dot_dimension_numbers<[1], [0], [0], [1], [0, 0, 1, 1], [], []>} : vector<8x8xbf16>, vector<8x32xbf16>, vector<8x32xf32> -> vector<8x32xf32>
    %58 = arith.addf %38, %57 : vector<8x32xf32>
    %59 = vector.extract_strided_slice %35 {offsets = [0, 8], sizes = [8, 8], strides = [1, 1]} : vector<8x32xbf16> to vector<8x8xbf16>
    %c0_28 = arith.constant 0 : index
    %c8 = arith.constant 8 : index
    %60 = vector.load %arg18[%c0_28, %c8] : memref<8x64xbf16, #tpu.memory_space<vmem>>, vector<8x8xbf16>
    %c0_29 = arith.constant 0 : index
    %c40 = arith.constant 40 : index
    %61 = vector.load %arg18[%c0_29, %c40] : memref<8x64xbf16, #tpu.memory_space<vmem>>, vector<8x8xbf16>
    %cst_30 = arith.constant dense<0.000000e+00> : vector<8x8xf32>
    %62 = tpu.matmul %59, %60, %cst_30 {dimension_numbers = #tpu.dot_dimension_numbers<[1], [1], [0], [0], [0, 0, 1, 0], [], []>} : vector<8x8xbf16>, vector<8x8xbf16>, vector<8x8xf32> -> vector<8x8xf32>
    %cst_31 = arith.constant dense<0xFF800000> : vector<8xf32>
    %63 = vector.multi_reduction <maximumf>, %62, %cst_31 [1] : vector<8x8xf32> to vector<8xf32>
    %64 = vector.shape_cast %63 : vector<8xf32> to vector<8x1xf32>
    %65 = vector.broadcast %64 : vector<8x1xf32> to vector<8x8xf32>
    %66 = arith.subf %62, %65 : vector<8x8xf32>
    %67 = math.exp %66 : vector<8x8xf32>
    %cst_32 = arith.constant dense<0.000000e+00> : vector<8xf32>
    %68 = vector.multi_reduction <add>, %67, %cst_32 [1] : vector<8x8xf32> to vector<8xf32>
    %69 = vector.shape_cast %68 : vector<8xf32> to vector<8x1xf32>
    %70 = arith.truncf %67 : vector<8x8xf32> to vector<8x8xbf16>
    %cst_33 = arith.constant dense<0.000000e+00> : vector<8x8xf32>
    %71 = tpu.matmul %70, %61, %cst_33 {dimension_numbers = #tpu.dot_dimension_numbers<[1], [0], [0], [1], [0, 0, 1, 1], [], []>} : vector<8x8xbf16>, vector<8x8xbf16>, vector<8x8xf32> -> vector<8x8xf32>
    %72 = tpu.reciprocal %69 {approx = true} : vector<8x1xf32> -> vector<8x1xf32>
    %73 = vector.broadcast %72 : vector<8x1xf32> to vector<8x8xf32>
    %74 = arith.mulf %71, %73 : vector<8x8xf32>
    %75 = arith.truncf %74 : vector<8x8xf32> to vector<8x8xbf16>
    %c8_34 = arith.constant 8 : index
    %c0_35 = arith.constant 0 : index
    %76 = vector.load %arg9[%c8_34, %c0_35] : memref<32x32xbf16, #tpu.memory_space<vmem>>, vector<8x32xbf16>
    %cst_36 = arith.constant dense<0.000000e+00> : vector<8x32xf32>
    %77 = tpu.matmul %75, %76, %cst_36 {dimension_numbers = #tpu.dot_dimension_numbers<[1], [0], [0], [1], [0, 0, 1, 1], [], []>} : vector<8x8xbf16>, vector<8x32xbf16>, vector<8x32xf32> -> vector<8x32xf32>
    %78 = arith.addf %58, %77 : vector<8x32xf32>
    %79 = vector.extract_strided_slice %35 {offsets = [0, 16], sizes = [8, 8], strides = [1, 1]} : vector<8x32xbf16> to vector<8x8xbf16>
    %c0_37 = arith.constant 0 : index
    %c16 = arith.constant 16 : index
    %80 = vector.load %arg18[%c0_37, %c16] : memref<8x64xbf16, #tpu.memory_space<vmem>>, vector<8x8xbf16>
    %c0_38 = arith.constant 0 : index
    %c48 = arith.constant 48 : index
    %81 = vector.load %arg18[%c0_38, %c48] : memref<8x64xbf16, #tpu.memory_space<vmem>>, vector<8x8xbf16>
    %cst_39 = arith.constant dense<0.000000e+00> : vector<8x8xf32>
    %82 = tpu.matmul %79, %80, %cst_39 {dimension_numbers = #tpu.dot_dimension_numbers<[1], [1], [0], [0], [0, 0, 1, 0], [], []>} : vector<8x8xbf16>, vector<8x8xbf16>, vector<8x8xf32> -> vector<8x8xf32>
    %cst_40 = arith.constant dense<0xFF800000> : vector<8xf32>
    %83 = vector.multi_reduction <maximumf>, %82, %cst_40 [1] : vector<8x8xf32> to vector<8xf32>
    %84 = vector.shape_cast %83 : vector<8xf32> to vector<8x1xf32>
    %85 = vector.broadcast %84 : vector<8x1xf32> to vector<8x8xf32>
    %86 = arith.subf %82, %85 : vector<8x8xf32>
    %87 = math.exp %86 : vector<8x8xf32>
    %cst_41 = arith.constant dense<0.000000e+00> : vector<8xf32>
    %88 = vector.multi_reduction <add>, %87, %cst_41 [1] : vector<8x8xf32> to vector<8xf32>
    %89 = vector.shape_cast %88 : vector<8xf32> to vector<8x1xf32>
    %90 = arith.truncf %87 : vector<8x8xf32> to vector<8x8xbf16>
    %cst_42 = arith.constant dense<0.000000e+00> : vector<8x8xf32>
    %91 = tpu.matmul %90, %81, %cst_42 {dimension_numbers = #tpu.dot_dimension_numbers<[1], [0], [0], [1], [0, 0, 1, 1], [], []>} : vector<8x8xbf16>, vector<8x8xbf16>, vector<8x8xf32> -> vector<8x8xf32>
    %92 = tpu.reciprocal %89 {approx = true} : vector<8x1xf32> -> vector<8x1xf32>
    %93 = vector.broadcast %92 : vector<8x1xf32> to vector<8x8xf32>
    %94 = arith.mulf %91, %93 : vector<8x8xf32>
    %95 = arith.truncf %94 : vector<8x8xf32> to vector<8x8xbf16>
    %c16_43 = arith.constant 16 : index
    %c0_44 = arith.constant 0 : index
    %96 = vector.load %arg9[%c16_43, %c0_44] : memref<32x32xbf16, #tpu.memory_space<vmem>>, vector<8x32xbf16>
    %cst_45 = arith.constant dense<0.000000e+00> : vector<8x32xf32>
    %97 = tpu.matmul %95, %96, %cst_45 {dimension_numbers = #tpu.dot_dimension_numbers<[1], [0], [0], [1], [0, 0, 1, 1], [], []>} : vector<8x8xbf16>, vector<8x32xbf16>, vector<8x32xf32> -> vector<8x32xf32>
    %98 = arith.addf %78, %97 : vector<8x32xf32>
    %99 = vector.extract_strided_slice %35 {offsets = [0, 24], sizes = [8, 8], strides = [1, 1]} : vector<8x32xbf16> to vector<8x8xbf16>
    %c0_46 = arith.constant 0 : index
    %c24 = arith.constant 24 : index
    %100 = vector.load %arg18[%c0_46, %c24] : memref<8x64xbf16, #tpu.memory_space<vmem>>, vector<8x8xbf16>
    %c0_47 = arith.constant 0 : index
    %c56 = arith.constant 56 : index
    %101 = vector.load %arg18[%c0_47, %c56] : memref<8x64xbf16, #tpu.memory_space<vmem>>, vector<8x8xbf16>
    %cst_48 = arith.constant dense<0.000000e+00> : vector<8x8xf32>
    %102 = tpu.matmul %99, %100, %cst_48 {dimension_numbers = #tpu.dot_dimension_numbers<[1], [1], [0], [0], [0, 0, 1, 0], [], []>} : vector<8x8xbf16>, vector<8x8xbf16>, vector<8x8xf32> -> vector<8x8xf32>
    %cst_49 = arith.constant dense<0xFF800000> : vector<8xf32>
    %103 = vector.multi_reduction <maximumf>, %102, %cst_49 [1] : vector<8x8xf32> to vector<8xf32>
    %104 = vector.shape_cast %103 : vector<8xf32> to vector<8x1xf32>
    %105 = vector.broadcast %104 : vector<8x1xf32> to vector<8x8xf32>
    %106 = arith.subf %102, %105 : vector<8x8xf32>
    %107 = math.exp %106 : vector<8x8xf32>
    %cst_50 = arith.constant dense<0.000000e+00> : vector<8xf32>
    %108 = vector.multi_reduction <add>, %107, %cst_50 [1] : vector<8x8xf32> to vector<8xf32>
    %109 = vector.shape_cast %108 : vector<8xf32> to vector<8x1xf32>
    %110 = arith.truncf %107 : vector<8x8xf32> to vector<8x8xbf16>
    %cst_51 = arith.constant dense<0.000000e+00> : vector<8x8xf32>
    %111 = tpu.matmul %110, %101, %cst_51 {dimension_numbers = #tpu.dot_dimension_numbers<[1], [0], [0], [1], [0, 0, 1, 1], [], []>} : vector<8x8xbf16>, vector<8x8xbf16>, vector<8x8xf32> -> vector<8x8xf32>
    %112 = tpu.reciprocal %109 {approx = true} : vector<8x1xf32> -> vector<8x1xf32>
    %113 = vector.broadcast %112 : vector<8x1xf32> to vector<8x8xf32>
    %114 = arith.mulf %111, %113 : vector<8x8xf32>
    %115 = arith.truncf %114 : vector<8x8xf32> to vector<8x8xbf16>
    %c24_52 = arith.constant 24 : index
    %c0_53 = arith.constant 0 : index
    %116 = vector.load %arg9[%c24_52, %c0_53] : memref<32x32xbf16, #tpu.memory_space<vmem>>, vector<8x32xbf16>
    %cst_54 = arith.constant dense<0.000000e+00> : vector<8x32xf32>
    %117 = tpu.matmul %115, %116, %cst_54 {dimension_numbers = #tpu.dot_dimension_numbers<[1], [0], [0], [1], [0, 0, 1, 1], [], []>} : vector<8x8xbf16>, vector<8x32xbf16>, vector<8x32xf32> -> vector<8x32xf32>
    %118 = arith.addf %98, %117 : vector<8x32xf32>
    %c0_55 = arith.constant 0 : index
    %c0_56 = arith.constant 0 : index
    %119 = vector.load %arg11[%c0_55, %c0_56] : memref<1x32xf32, #tpu.memory_space<vmem>>, vector<1x32xf32>
    %c0_57 = arith.constant 0 : index
    %c0_58 = arith.constant 0 : index
    %120 = vector.load %arg12[%c0_57, %c0_58] : memref<1x32xf32, #tpu.memory_space<vmem>>, vector<1x32xf32>
    %cst_59 = arith.constant dense<0.000000e+00> : vector<8xf32>
    %121 = vector.multi_reduction <add>, %118, %cst_59 [1] : vector<8x32xf32> to vector<8xf32>
    %122 = vector.shape_cast %121 : vector<8xf32> to vector<8x1xf32>
    %cst_60 = arith.constant 3.200000e+01 : f32
    %123 = vector.broadcast %cst_60 : f32 to vector<8x1xf32>
    %124 = arith.divf %122, %123 : vector<8x1xf32>
    %125 = vector.broadcast %124 : vector<8x1xf32> to vector<8x32xf32>
    %126 = arith.subf %118, %125 : vector<8x32xf32>
    %127 = arith.mulf %126, %126 : vector<8x32xf32>
    %cst_61 = arith.constant dense<0.000000e+00> : vector<8xf32>
    %128 = vector.multi_reduction <add>, %127, %cst_61 [1] : vector<8x32xf32> to vector<8xf32>
    %129 = vector.shape_cast %128 : vector<8xf32> to vector<8x1xf32>
    %cst_62 = arith.constant 3.200000e+01 : f32
    %130 = vector.broadcast %cst_62 : f32 to vector<8x1xf32>
    %131 = arith.divf %129, %130 : vector<8x1xf32>
    %132 = vector.broadcast %124 : vector<8x1xf32> to vector<8x32xf32>
    %133 = arith.subf %118, %132 : vector<8x32xf32>
    %cst_63 = arith.constant 9.99999974E-6 : f32
    %134 = vector.broadcast %cst_63 : f32 to vector<8x1xf32>
    %135 = arith.addf %131, %134 : vector<8x1xf32>
    %136 = math.rsqrt %135 : vector<8x1xf32>
    %137 = vector.broadcast %136 : vector<8x1xf32> to vector<8x32xf32>
    %138 = arith.mulf %133, %137 : vector<8x32xf32>
    %139 = vector.broadcast %119 : vector<1x32xf32> to vector<8x32xf32>
    %140 = arith.mulf %138, %139 : vector<8x32xf32>
    %141 = vector.broadcast %120 : vector<1x32xf32> to vector<8x32xf32>
    %142 = arith.addf %140, %141 : vector<8x32xf32>
    %143 = arith.truncf %142 : vector<8x32xf32> to vector<8x32xbf16>
    %c0_64 = arith.constant 0 : index
    %c0_65 = arith.constant 0 : index
    %144 = vector.load %arg13[%c0_64, %c0_65] : memref<32x128xbf16, #tpu.memory_space<vmem>>, vector<32x128xbf16>
    %cst_66 = arith.constant dense<0.000000e+00> : vector<8x128xf32>
    %145 = tpu.matmul %143, %144, %cst_66 {dimension_numbers = #tpu.dot_dimension_numbers<[1], [0], [0], [1], [0, 0, 1, 1], [], []>} : vector<8x32xbf16>, vector<32x128xbf16>, vector<8x128xf32> -> vector<8x128xf32>
    %146 = arith.truncf %145 : vector<8x128xf32> to vector<8x128xbf16>
    %c0_67 = arith.constant 0 : index
    %c0_68 = arith.constant 0 : index
    %147 = vector.load %arg14[%c0_67, %c0_68] : memref<1x128xbf16, #tpu.memory_space<vmem>>, vector<1x128xbf16>
    %148 = vector.broadcast %147 : vector<1x128xbf16> to vector<8x128xbf16>
    %149 = arith.addf %146, %148 : vector<8x128xbf16>
    %cst_69 = arith.constant 0.000000e+00 : bf16
    %150 = vector.broadcast %cst_69 : bf16 to vector<8x128xbf16>
    %151 = arith.maximumf %149, %150 : vector<8x128xbf16>
    %c0_70 = arith.constant 0 : index
    %c0_71 = arith.constant 0 : index
    %152 = vector.load %arg15[%c0_70, %c0_71] : memref<128x32xbf16, #tpu.memory_space<vmem>>, vector<128x32xbf16>
    %cst_72 = arith.constant dense<0.000000e+00> : vector<8x32xf32>
    %153 = tpu.matmul %151, %152, %cst_72 {dimension_numbers = #tpu.dot_dimension_numbers<[1], [0], [0], [1], [0, 0, 1, 1], [], []>} : vector<8x128xbf16>, vector<128x32xbf16>, vector<8x32xf32> -> vector<8x32xf32>
    %c0_73 = arith.constant 0 : index
    %c0_74 = arith.constant 0 : index
    %154 = vector.load %arg16[%c0_73, %c0_74] : memref<1x32xf32, #tpu.memory_space<vmem>>, vector<1x32xf32>
    %155 = vector.broadcast %154 : vector<1x32xf32> to vector<8x32xf32>
    %156 = arith.addf %153, %155 : vector<8x32xf32>
    %157 = arith.addf %118, %156 : vector<8x32xf32>
    %c0_75 = arith.constant 0 : index
    %c0_76 = arith.constant 0 : index
    %c0_77 = arith.constant 0 : index
    %158 = vector.load %arg17[%c0_75, %c0_76, %c0_77] : memref<1x8x32xf32, #tpu.memory_space<vmem>>, vector<1x8x32xf32>
    %159 = vector.shape_cast %158 : vector<1x8x32xf32> to vector<8x32xf32>
    %160 = vector.shape_cast %157 : vector<8x32xf32> to vector<1x8x32xf32>
    tpu.vector_store %arg17[%c0_75, %c0_76, %c0_77], %160 {strides = array<i32>} : memref<1x8x32xf32, #tpu.memory_space<vmem>>, vector<1x8x32xf32>,
    return
  }
  func.func @transform_0(%arg0: i32, %arg1: i32) -> (i32, i32, i32) {
    %c0_i32 = arith.constant 0 : i32
    %c0_i32_0 = arith.constant 0 : i32
    %c0_i32_1 = arith.constant 0 : i32
    return %arg0, %c0_i32, %c0_i32_0 : i32, i32, i32
  }
  func.func @transform_1(%arg0: i32, %arg1: i32) -> (i32, i32) {
    %c0_i32 = arith.constant 0 : i32
    %c0_i32_0 = arith.constant 0 : i32
    %c0_i32_1 = arith.constant 0 : i32
    return %c0_i32, %c0_i32_0 : i32, i32
  }
  func.func @transform_2(%arg0: i32, %arg1: i32) -> (i32, i32) {
    %c0_i32 = arith.constant 0 : i32
    %c0_i32_0 = arith.constant 0 : i32
    %c0_i32_1 = arith.constant 0 : i32
    return %c0_i32, %c0_i32_0 : i32, i32
  }
  func.func @transform_3(%arg0: i32, %arg1: i32) -> (i32, i32) {
    %c0_i32 = arith.constant 0 : i32
    %c0_i32_0 = arith.constant 0 : i32
    %c0_i32_1 = arith.constant 0 : i32
    return %c0_i32, %c0_i32_0 : i32, i32
  }
  func.func @transform_4(%arg0: i32, %arg1: i32) -> (i32, i32) {
    %c0_i32 = arith.constant 0 : i32
    %c0_i32_0 = arith.constant 0 : i32
    %c0_i32_1 = arith.constant 0 : i32
    return %c0_i32, %c0_i32_0 : i32, i32
  }
  func.func @transform_5(%arg0: i32, %arg1: i32) -> (i32, i32) {
    %c0_i32 = arith.constant 0 : i32
    %c0_i32_0 = arith.constant 0 : i32
    %c0_i32_1 = arith.constant 0 : i32
    return %c0_i32, %c0_i32_0 : i32, i32
  }
  func.func @transform_6(%arg0: i32, %arg1: i32) -> (i32, i32) {
    %c0_i32 = arith.constant 0 : i32
    %c0_i32_0 = arith.constant 0 : i32
    %c0_i32_1 = arith.constant 0 : i32
    return %c0_i32, %c0_i32_0 : i32, i32
  }
  func.func @transform_7(%arg0: i32, %arg1: i32) -> (i32, i32) {
    %c0_i32 = arith.constant 0 : i32
    %c0_i32_0 = arith.constant 0 : i32
    %c0_i32_1 = arith.constant 0 : i32
    return %c0_i32, %c0_i32_0 : i32, i32
  }
  func.func @transform_8(%arg0: i32, %arg1: i32) -> (i32, i32) {
    %c0_i32 = arith.constant 0 : i32
    %c0_i32_0 = arith.constant 0 : i32
    %c0_i32_1 = arith.constant 0 : i32
    return %c0_i32, %c0_i32_0 : i32, i32
  }
  func.func @transform_9(%arg0: i32, %arg1: i32) -> (i32, i32) {
    %c0_i32 = arith.constant 0 : i32
    %c0_i32_0 = arith.constant 0 : i32
    %c0_i32_1 = arith.constant 0 : i32
    return %c0_i32, %c0_i32_0 : i32, i32
  }
  func.func @transform_10(%arg0: i32, %arg1: i32) -> (i32, i32) {
    %c0_i32 = arith.constant 0 : i32
    %c0_i32_0 = arith.constant 0 : i32
    %c0_i32_1 = arith.constant 0 : i32
    return %c0_i32, %c0_i32_0 : i32, i32
  }
  func.func @transform_11(%arg0: i32, %arg1: i32) -> (i32, i32) {
    %c0_i32 = arith.constant 0 : i32
    %c0_i32_0 = arith.constant 0 : i32
    %c0_i32_1 = arith.constant 0 : i32
    return %c0_i32, %c0_i32_0 : i32, i32
  }
  func.func @transform_12(%arg0: i32, %arg1: i32) -> (i32, i32) {
    %c0_i32 = arith.constant 0 : i32
    %c0_i32_0 = arith.constant 0 : i32
    %c0_i32_1 = arith.constant 0 : i32
    return %c0_i32, %c0_i32_0 : i32, i32
  }
  func.func @transform_13(%arg0: i32, %arg1: i32) -> (i32, i32) {
    %c0_i32 = arith.constant 0 : i32
    %c0_i32_0 = arith.constant 0 : i32
    %c0_i32_1 = arith.constant 0 : i32
    return %c0_i32, %c0_i32_0 : i32, i32
  }
  func.func @transform_14(%arg0: i32, %arg1: i32) -> (i32, i32) {
    %c0_i32 = arith.constant 0 : i32
    %c0_i32_0 = arith.constant 0 : i32
    %c0_i32_1 = arith.constant 0 : i32
    return %c0_i32, %c0_i32_0 : i32, i32
  }
  func.func @transform_15(%arg0: i32, %arg1: i32) -> (i32, i32, i32) {
    %c0_i32 = arith.constant 0 : i32
    %c0_i32_0 = arith.constant 0 : i32
    return %arg0, %arg1, %c0_i32 : i32, i32, i32
  }
}

module attributes {stable_mosaic.version = 11 : i64} {
  func.func @encoder_cell_kernel(%arg0: i32, %arg1: i32, %arg2: memref<1x8x32xf32, #tpu.memory_space<vmem>>, %arg3: memref<1x32xf32, #tpu.memory_space<vmem>>, %arg4: memref<1x32xf32, #tpu.memory_space<vmem>>, %arg5: memref<32x32xbf16, #tpu.memory_space<vmem>>, %arg6: memref<1x32xf32, #tpu.memory_space<vmem>>, %arg7: memref<32x64xbf16, #tpu.memory_space<vmem>>, %arg8: memref<1x64xf32, #tpu.memory_space<vmem>>, %arg9: memref<32x32xbf16, #tpu.memory_space<vmem>>, %arg10: memref<1x32xf32, #tpu.memory_space<vmem>>, %arg11: memref<1x32xf32, #tpu.memory_space<vmem>>, %arg12: memref<1x32xf32, #tpu.memory_space<vmem>>, %arg13: memref<32x128xbf16, #tpu.memory_space<vmem>>, %arg14: memref<1x128xbf16, #tpu.memory_space<vmem>>, %arg15: memref<128x32xbf16, #tpu.memory_space<vmem>>, %arg16: memref<1x32xf32, #tpu.memory_space<vmem>>, %arg17: memref<1x8x32xf32, #tpu.memory_space<vmem>>, %arg18: memref<8x64xbf16, #tpu.memory_space<vmem>>) attributes {dimension_semantics = [#tpu.dimension_semantics<parallel>, #tpu.dimension_semantics<arbitrary>], iteration_bounds = array<i64: 2, 1>, scalar_prefetch = 0 : i64, scratch_operands = 1 : i64, tpu.core_type = #tpu.core_type<tc>, window_params = [{transform_indices = @transform_0, window_bounds = array<i64: 1, 8, 32>}, {pipeline_mode = #tpu.pipeline_mode<synchronous>, transform_indices = @transform_1, window_bounds = array<i64: 1, 32>}, {pipeline_mode = #tpu.pipeline_mode<synchronous>, transform_indices = @transform_2, window_bounds = array<i64: 1, 32>}, {pipeline_mode = #tpu.pipeline_mode<synchronous>, transform_indices = @transform_3, window_bounds = array<i64: 32, 32>}, {pipeline_mode = #tpu.pipeline_mode<synchronous>, transform_indices = @transform_4, window_bounds = array<i64: 1, 32>}, {pipeline_mode = #tpu.pipeline_mode<synchronous>, transform_indices = @transform_5, window_bounds = array<i64: 32, 64>}, {pipeline_mode = #tpu.pipeline_mode<synchronous>, transform_indices = @transform_6, window_bounds = array<i64: 1, 64>}, {pipeline_mode = #tpu.pipeline_mode<synchronous>, transform_indices = @transform_7, window_bounds = array<i64: 32, 32>}, {pipeline_mode = #tpu.pipeline_mode<synchronous>, transform_indices = @transform_8, window_bounds = array<i64: 1, 32>}, {pipeline_mode = #tpu.pipeline_mode<synchronous>, transform_indices = @transform_9, window_bounds = array<i64: 1, 32>}, {pipeline_mode = #tpu.pipeline_mode<synchronous>, transform_indices = @transform_10, window_bounds = array<i64: 1, 32>}, {pipeline_mode = #tpu.pipeline_mode<synchronous>, transform_indices = @transform_11, window_bounds = array<i64: 32, 128>}, {pipeline_mode = #tpu.pipeline_mode<synchronous>, transform_indices = @transform_12, window_bounds = array<i64: 1, 128>}, {pipeline_mode = #tpu.pipeline_mode<synchronous>, transform_indices = @transform_13, window_bounds = array<i64: 128, 32>}, {pipeline_mode = #tpu.pipeline_mode<synchronous>, transform_indices = @transform_14, window_bounds = array<i64: 1, 32>}, {transform_indices = @transform_15, window_bounds = array<i64: 1, 8, 32>}]} {
    %c0_i32 = arith.constant 0 : i32
    %0 = arith.cmpi eq, %arg1, %c0_i32 : i32
    %1 = arith.extui %0 : i1 to i32
    %c0_i32_0 = arith.constant 0 : i32
    %2 = arith.cmpi ne, %1, %c0_i32_0 : i32
    scf.if %2 {
      %c0_78 = arith.constant 0 : index
      %c0_79 = arith.constant 0 : index
      %c0_80 = arith.constant 0 : index
      %161 = vector.load %arg2[%c0_78, %c0_79, %c0_80] : memref<1x8x32xf32, #tpu.memory_space<vmem>>, vector<1x8x32xf32>
      %162 = vector.shape_cast %161 : vector<1x8x32xf32> to vector<8x32xf32>
      %c0_81 = arith.constant 0 : index
      %c0_82 = arith.constant 0 : index
      %163 = vector.load %arg3[%c0_81, %c0_82] : memref<1x32xf32, #tpu.memory_space<vmem>>, vector<1x32xf32>
      %c0_83 = arith.constant 0 : index
      %c0_84 = arith.constant 0 : index
      %164 = vector.load %arg4[%c0_83, %c0_84] : memref<1x32xf32, #tpu.memory_space<vmem>>, vector<1x32xf32>
      %cst_85 = arith.constant dense<0.000000e+00> : vector<8xf32>
      %165 = vector.multi_reduction <add>, %162, %cst_85 [1] : vector<8x32xf32> to vector<8xf32>
      %166 = vector.shape_cast %165 : vector<8xf32> to vector<8x1xf32>
      %cst_86 = arith.constant 3.200000e+01 : f32
      %167 = vector.broadcast %cst_86 : f32 to vector<8x1xf32>
      %168 = arith.divf %166, %167 : vector<8x1xf32>
      %169 = vector.broadcast %168 : vector<8x1xf32> to vector<8x32xf32>
      %170 = arith.subf %162, %169 : vector<8x32xf32>
      %171 = arith.mulf %170, %170 : vector<8x32xf32>
      %cst_87 = arith.constant dense<0.000000e+00> : vector<8xf32>
      %172 = vector.multi_reduction <add>, %171, %cst_87 [1] : vector<8x32xf32> to vector<8xf32>
      %173 = vector.shape_cast %172 : vector<8xf32> to vector<8x1xf32>
      %cst_88 = arith.constant 3.200000e+01 : f32
      %174 = vector.broadcast %cst_88 : f32 to vector<8x1xf32>
      %175 = arith.divf %173, %174 : vector<8x1xf32>
      %176 = vector.broadcast %168 : vector<8x1xf32> to vector<8x32xf32>
      %177 = arith.subf %162, %176 : vector<8x32xf32>
      %cst_89 = arith.constant 9.99999974E-6 : f32
      %178 = vector.broadcast %cst_89 : f32 to vector<8x1xf32>
      %179 = arith.addf %175, %178 : vector<8x1xf32>
      %180 = math.rsqrt %179 : vector<8x1xf32>
      %181 = vector.broadcast %180 : vector<8x1xf32> to vector<8x32xf32>
      %182 = arith.mulf %177, %181 : vector<8x32xf32>
      %183 = vector.broadcast %163 : vector<1x32xf32> to vector<8x32xf32>
      %184 = arith.mulf %182, %183 : vector<8x32xf32>
      %185 = vector.broadcast %164 : vector<1x32xf32> to vector<8x32xf32>
      %186 = arith.addf %184, %185 : vector<8x32xf32>
      %187 = arith.truncf %186 : vector<8x32xf32> to vector<8x32xbf16>
      %c0_90 = arith.constant 0 : index
      %c0_91 = arith.constant 0 : index
      %188 = vector.load %arg7[%c0_90, %c0_91] : memref<32x64xbf16, #tpu.memory_space<vmem>>, vector<32x64xbf16>
      %cst_92 = arith.constant dense<0.000000e+00> : vector<8x64xf32>
      %189 = tpu.matmul %187, %188, %cst_92 {dimension_numbers = #tpu.dot_dimension_numbers<[1], [0], [0], [1], [0, 0, 1, 1], [], []>} : vector<8x32xbf16>, vector<32x64xbf16>, vector<8x64xf32> -> vector<8x64xf32>
      %c0_93 = arith.constant 0 : index
      %c0_94 = arith.constant 0 : index
      %190 = vector.load %arg8[%c0_93, %c0_94] : memref<1x64xf32, #tpu.memory_space<vmem>>, vector<1x64xf32>
      %191 = vector.broadcast %190 : vector<1x64xf32> to vector<8x64xf32>
      %192 = arith.addf %189, %191 : vector<8x64xf32>
      %193 = arith.truncf %192 : vector<8x64xf32> to vector<8x64xbf16>
      %c0_95 = arith.constant 0 : index
      %c0_96 = arith.constant 0 : index
      %194 = vector.load %arg18[%c0_95, %c0_96] : memref<8x64xbf16, #tpu.memory_space<vmem>>, vector<8x64xbf16>
      tpu.vector_store %arg18[%c0_95, %c0_96], %193 {strides = array<i32>} : memref<8x64xbf16, #tpu.memory_space<vmem>>, vector<8x64xbf16>,
    } else {
    }
    %c0 = arith.constant 0 : index
    %c0_1 = arith.constant 0 : index
    %c0_2 = arith.constant 0 : index
    %3 = vector.load %arg2[%c0, %c0_1, %c0_2] : memref<1x8x32xf32, #tpu.memory_space<vmem>>, vector<1x8x32xf32>
    %4 = vector.shape_cast %3 : vector<1x8x32xf32> to vector<8x32xf32>
    %c0_3 = arith.constant 0 : index
    %c0_4 = arith.constant 0 : index
    %5 = vector.load %arg3[%c0_3, %c0_4] : memref<1x32xf32, #tpu.memory_space<vmem>>, vector<1x32xf32>
    %c0_5 = arith.constant 0 : index
    %c0_6 = arith.constant 0 : index
    %6 = vector.load %arg4[%c0_5, %c0_6] : memref<1x32xf32, #tpu.memory_space<vmem>>, vector<1x32xf32>
    %cst = arith.constant dense<0.000000e+00> : vector<8xf32>
    %7 = vector.multi_reduction <add>, %4, %cst [1] : vector<8x32xf32> to vector<8xf32>
    %8 = vector.shape_cast %7 : vector<8xf32> to vector<8x1xf32>
    %cst_7 = arith.constant 3.200000e+01 : f32
    %9 = vector.broadcast %cst_7 : f32 to vector<8x1xf32>
    %10 = arith.divf %8, %9 : vector<8x1xf32>
    %11 = vector.broadcast %10 : vector<8x1xf32> to vector<8x32xf32>
    %12 = arith.subf %4, %11 : vector<8x32xf32>
    %13 = arith.mulf %12, %12 : vector<8x32xf32>
    %cst_8 = arith.constant dense<0.000000e+00> : vector<8xf32>
    %14 = vector.multi_reduction <add>, %13, %cst_8 [1] : vector<8x32xf32> to vector<8xf32>
    %15 = vector.shape_cast %14 : vector<8xf32> to vector<8x1xf32>
    %cst_9 = arith.constant 3.200000e+01 : f32
    %16 = vector.broadcast %cst_9 : f32 to vector<8x1xf32>
    %17 = arith.divf %15, %16 : vector<8x1xf32>
    %18 = vector.broadcast %10 : vector<8x1xf32> to vector<8x32xf32>
    %19 = arith.subf %4, %18 : vector<8x32xf32>
    %cst_10 = arith.constant 9.99999974E-6 : f32
    %20 = vector.broadcast %cst_10 : f32 to vector<8x1xf32>
    %21 = arith.addf %17, %20 : vector<8x1xf32>
    %22 = math.rsqrt %21 : vector<8x1xf32>
    %23 = vector.broadcast %22 : vector<8x1xf32> to vector<8x32xf32>
    %24 = arith.mulf %19, %23 : vector<8x32xf32>
    %25 = vector.broadcast %5 : vector<1x32xf32> to vector<8x32xf32>
    %26 = arith.mulf %24, %25 : vector<8x32xf32>
    %27 = vector.broadcast %6 : vector<1x32xf32> to vector<8x32xf32>
    %28 = arith.addf %26, %27 : vector<8x32xf32>
    %29 = arith.truncf %28 : vector<8x32xf32> to vector<8x32xbf16>
    %c0_11 = arith.constant 0 : index
    %c0_12 = arith.constant 0 : index
    %30 = vector.load %arg5[%c0_11, %c0_12] : memref<32x32xbf16, #tpu.memory_space<vmem>>, vector<32x32xbf16>
    %cst_13 = arith.constant dense<0.000000e+00> : vector<8x32xf32>
    %31 = tpu.matmul %29, %30, %cst_13 {dimension_numbers = #tpu.dot_dimension_numbers<[1], [0], [0], [1], [0, 0, 1, 1], [], []>} : vector<8x32xbf16>, vector<32x32xbf16>, vector<8x32xf32> -> vector<8x32xf32>
    %c0_14 = arith.constant 0 : index
    %c0_15 = arith.constant 0 : index
    %32 = vector.load %arg6[%c0_14, %c0_15] : memref<1x32xf32, #tpu.memory_space<vmem>>, vector<1x32xf32>
    %33 = vector.broadcast %32 : vector<1x32xf32> to vector<8x32xf32>
    %34 = arith.addf %31, %33 : vector<8x32xf32>
    %35 = arith.truncf %34 : vector<8x32xf32> to vector<8x32xbf16>
    %c0_16 = arith.constant 0 : index
    %c0_17 = arith.constant 0 : index
    %36 = vector.load %arg10[%c0_16, %c0_17] : memref<1x32xf32, #tpu.memory_space<vmem>>, vector<1x32xf32>
    %37 = vector.broadcast %36 : vector<1x32xf32> to vector<8x32xf32>
    %38 = arith.addf %4, %37 : vector<8x32xf32>
    %39 = vector.extract_strided_slice %35 {offsets = [0, 0], sizes = [8, 8], strides = [1, 1]} : vector<8x32xbf16> to vector<8x8xbf16>
    %c0_18 = arith.constant 0 : index
    %c0_19 = arith.constant 0 : index
    %40 = vector.load %arg18[%c0_18, %c0_19] : memref<8x64xbf16, #tpu.memory_space<vmem>>, vector<8x8xbf16>
    %c0_20 = arith.constant 0 : index
    %c32 = arith.constant 32 : index
    %41 = vector.load %arg18[%c0_20, %c32] : memref<8x64xbf16, #tpu.memory_space<vmem>>, vector<8x8xbf16>
    %cst_21 = arith.constant dense<0.000000e+00> : vector<8x8xf32>
    %42 = tpu.matmul %39, %40, %cst_21 {dimension_numbers = #tpu.dot_dimension_numbers<[1], [1], [0], [0], [0, 0, 1, 0], [], []>} : vector<8x8xbf16>, vector<8x8xbf16>, vector<8x8xf32> -> vector<8x8xf32>
    %cst_22 = arith.constant dense<0xFF800000> : vector<8xf32>
    %43 = vector.multi_reduction <maximumf>, %42, %cst_22 [1] : vector<8x8xf32> to vector<8xf32>
    %44 = vector.shape_cast %43 : vector<8xf32> to vector<8x1xf32>
    %45 = vector.broadcast %44 : vector<8x1xf32> to vector<8x8xf32>
    %46 = arith.subf %42, %45 : vector<8x8xf32>
    %47 = math.exp %46 : vector<8x8xf32>
    %cst_23 = arith.constant dense<0.000000e+00> : vector<8xf32>
    %48 = vector.multi_reduction <add>, %47, %cst_23 [1] : vector<8x8xf32> to vector<8xf32>
    %49 = vector.shape_cast %48 : vector<8xf32> to vector<8x1xf32>
    %50 = arith.truncf %47 : vector<8x8xf32> to vector<8x8xbf16>
    %cst_24 = arith.constant dense<0.000000e+00> : vector<8x8xf32>
    %51 = tpu.matmul %50, %41, %cst_24 {dimension_numbers = #tpu.dot_dimension_numbers<[1], [0], [0], [1], [0, 0, 1, 1], [], []>} : vector<8x8xbf16>, vector<8x8xbf16>, vector<8x8xf32> -> vector<8x8xf32>
    %52 = tpu.reciprocal %49 {approx = true} : vector<8x1xf32> -> vector<8x1xf32>
    %53 = vector.broadcast %52 : vector<8x1xf32> to vector<8x8xf32>
    %54 = arith.mulf %51, %53 : vector<8x8xf32>
    %55 = arith.truncf %54 : vector<8x8xf32> to vector<8x8xbf16>
    %c0_25 = arith.constant 0 : index
    %c0_26 = arith.constant 0 : index
    %56 = vector.load %arg9[%c0_25, %c0_26] : memref<32x32xbf16, #tpu.memory_space<vmem>>, vector<8x32xbf16>
    %cst_27 = arith.constant dense<0.000000e+00> : vector<8x32xf32>
    %57 = tpu.matmul %55, %56, %cst_27 {dimension_numbers = #tpu.dot_dimension_numbers<[1], [0], [0], [1], [0, 0, 1, 1], [], []>} : vector<8x8xbf16>, vector<8x32xbf16>, vector<8x32xf32> -> vector<8x32xf32>
    %58 = arith.addf %38, %57 : vector<8x32xf32>
    %59 = vector.extract_strided_slice %35 {offsets = [0, 8], sizes = [8, 8], strides = [1, 1]} : vector<8x32xbf16> to vector<8x8xbf16>
    %c0_28 = arith.constant 0 : index
    %c8 = arith.constant 8 : index
    %60 = vector.load %arg18[%c0_28, %c8] : memref<8x64xbf16, #tpu.memory_space<vmem>>, vector<8x8xbf16>
    %c0_29 = arith.constant 0 : index
    %c40 = arith.constant 40 : index
    %61 = vector.load %arg18[%c0_29, %c40] : memref<8x64xbf16, #tpu.memory_space<vmem>>, vector<8x8xbf16>
    %cst_30 = arith.constant dense<0.000000e+00> : vector<8x8xf32>
    %62 = tpu.matmul %59, %60, %cst_30 {dimension_numbers = #tpu.dot_dimension_numbers<[1], [1], [0], [0], [0, 0, 1, 0], [], []>} : vector<8x8xbf16>, vector<8x8xbf16>, vector<8x8xf32> -> vector<8x8xf32>
    %cst_31 = arith.constant dense<0xFF800000> : vector<8xf32>
    %63 = vector.multi_reduction <maximumf>, %62, %cst_31 [1] : vector<8x8xf32> to vector<8xf32>
    %64 = vector.shape_cast %63 : vector<8xf32> to vector<8x1xf32>
    %65 = vector.broadcast %64 : vector<8x1xf32> to vector<8x8xf32>
    %66 = arith.subf %62, %65 : vector<8x8xf32>
    %67 = math.exp %66 : vector<8x8xf32>
    %cst_32 = arith.constant dense<0.000000e+00> : vector<8xf32>
    %68 = vector.multi_reduction <add>, %67, %cst_32 [1] : vector<8x8xf32> to vector<8xf32>
    %69 = vector.shape_cast %68 : vector<8xf32> to vector<8x1xf32>
    %70 = arith.truncf %67 : vector<8x8xf32> to vector<8x8xbf16>
    %cst_33 = arith.constant dense<0.000000e+00> : vector<8x8xf32>
    %71 = tpu.matmul %70, %61, %cst_33 {dimension_numbers = #tpu.dot_dimension_numbers<[1], [0], [0], [1], [0, 0, 1, 1], [], []>} : vector<8x8xbf16>, vector<8x8xbf16>, vector<8x8xf32> -> vector<8x8xf32>
    %72 = tpu.reciprocal %69 {approx = true} : vector<8x1xf32> -> vector<8x1xf32>
    %73 = vector.broadcast %72 : vector<8x1xf32> to vector<8x8xf32>
    %74 = arith.mulf %71, %73 : vector<8x8xf32>
    %75 = arith.truncf %74 : vector<8x8xf32> to vector<8x8xbf16>
    %c8_34 = arith.constant 8 : index
    %c0_35 = arith.constant 0 : index
    %76 = vector.load %arg9[%c8_34, %c0_35] : memref<32x32xbf16, #tpu.memory_space<vmem>>, vector<8x32xbf16>
    %cst_36 = arith.constant dense<0.000000e+00> : vector<8x32xf32>
    %77 = tpu.matmul %75, %76, %cst_36 {dimension_numbers = #tpu.dot_dimension_numbers<[1], [0], [0], [1], [0, 0, 1, 1], [], []>} : vector<8x8xbf16>, vector<8x32xbf16>, vector<8x32xf32> -> vector<8x32xf32>
    %78 = arith.addf %58, %77 : vector<8x32xf32>
    %79 = vector.extract_strided_slice %35 {offsets = [0, 16], sizes = [8, 8], strides = [1, 1]} : vector<8x32xbf16> to vector<8x8xbf16>
    %c0_37 = arith.constant 0 : index
    %c16 = arith.constant 16 : index
    %80 = vector.load %arg18[%c0_37, %c16] : memref<8x64xbf16, #tpu.memory_space<vmem>>, vector<8x8xbf16>
    %c0_38 = arith.constant 0 : index
    %c48 = arith.constant 48 : index
    %81 = vector.load %arg18[%c0_38, %c48] : memref<8x64xbf16, #tpu.memory_space<vmem>>, vector<8x8xbf16>
    %cst_39 = arith.constant dense<0.000000e+00> : vector<8x8xf32>
    %82 = tpu.matmul %79, %80, %cst_39 {dimension_numbers = #tpu.dot_dimension_numbers<[1], [1], [0], [0], [0, 0, 1, 0], [], []>} : vector<8x8xbf16>, vector<8x8xbf16>, vector<8x8xf32> -> vector<8x8xf32>
    %cst_40 = arith.constant dense<0xFF800000> : vector<8xf32>
    %83 = vector.multi_reduction <maximumf>, %82, %cst_40 [1] : vector<8x8xf32> to vector<8xf32>
    %84 = vector.shape_cast %83 : vector<8xf32> to vector<8x1xf32>
    %85 = vector.broadcast %84 : vector<8x1xf32> to vector<8x8xf32>
    %86 = arith.subf %82, %85 : vector<8x8xf32>
    %87 = math.exp %86 : vector<8x8xf32>
    %cst_41 = arith.constant dense<0.000000e+00> : vector<8xf32>
    %88 = vector.multi_reduction <add>, %87, %cst_41 [1] : vector<8x8xf32> to vector<8xf32>
    %89 = vector.shape_cast %88 : vector<8xf32> to vector<8x1xf32>
    %90 = arith.truncf %87 : vector<8x8xf32> to vector<8x8xbf16>
    %cst_42 = arith.constant dense<0.000000e+00> : vector<8x8xf32>
    %91 = tpu.matmul %90, %81, %cst_42 {dimension_numbers = #tpu.dot_dimension_numbers<[1], [0], [0], [1], [0, 0, 1, 1], [], []>} : vector<8x8xbf16>, vector<8x8xbf16>, vector<8x8xf32> -> vector<8x8xf32>
    %92 = tpu.reciprocal %89 {approx = true} : vector<8x1xf32> -> vector<8x1xf32>
    %93 = vector.broadcast %92 : vector<8x1xf32> to vector<8x8xf32>
    %94 = arith.mulf %91, %93 : vector<8x8xf32>
    %95 = arith.truncf %94 : vector<8x8xf32> to vector<8x8xbf16>
    %c16_43 = arith.constant 16 : index
    %c0_44 = arith.constant 0 : index
    %96 = vector.load %arg9[%c16_43, %c0_44] : memref<32x32xbf16, #tpu.memory_space<vmem>>, vector<8x32xbf16>
    %cst_45 = arith.constant dense<0.000000e+00> : vector<8x32xf32>
    %97 = tpu.matmul %95, %96, %cst_45 {dimension_numbers = #tpu.dot_dimension_numbers<[1], [0], [0], [1], [0, 0, 1, 1], [], []>} : vector<8x8xbf16>, vector<8x32xbf16>, vector<8x32xf32> -> vector<8x32xf32>
    %98 = arith.addf %78, %97 : vector<8x32xf32>
    %99 = vector.extract_strided_slice %35 {offsets = [0, 24], sizes = [8, 8], strides = [1, 1]} : vector<8x32xbf16> to vector<8x8xbf16>
    %c0_46 = arith.constant 0 : index
    %c24 = arith.constant 24 : index
    %100 = vector.load %arg18[%c0_46, %c24] : memref<8x64xbf16, #tpu.memory_space<vmem>>, vector<8x8xbf16>
    %c0_47 = arith.constant 0 : index
    %c56 = arith.constant 56 : index
    %101 = vector.load %arg18[%c0_47, %c56] : memref<8x64xbf16, #tpu.memory_space<vmem>>, vector<8x8xbf16>
    %cst_48 = arith.constant dense<0.000000e+00> : vector<8x8xf32>
    %102 = tpu.matmul %99, %100, %cst_48 {dimension_numbers = #tpu.dot_dimension_numbers<[1], [1], [0], [0], [0, 0, 1, 0], [], []>} : vector<8x8xbf16>, vector<8x8xbf16>, vector<8x8xf32> -> vector<8x8xf32>
    %cst_49 = arith.constant dense<0xFF800000> : vector<8xf32>
    %103 = vector.multi_reduction <maximumf>, %102, %cst_49 [1] : vector<8x8xf32> to vector<8xf32>
    %104 = vector.shape_cast %103 : vector<8xf32> to vector<8x1xf32>
    %105 = vector.broadcast %104 : vector<8x1xf32> to vector<8x8xf32>
    %106 = arith.subf %102, %105 : vector<8x8xf32>
    %107 = math.exp %106 : vector<8x8xf32>
    %cst_50 = arith.constant dense<0.000000e+00> : vector<8xf32>
    %108 = vector.multi_reduction <add>, %107, %cst_50 [1] : vector<8x8xf32> to vector<8xf32>
    %109 = vector.shape_cast %108 : vector<8xf32> to vector<8x1xf32>
    %110 = arith.truncf %107 : vector<8x8xf32> to vector<8x8xbf16>
    %cst_51 = arith.constant dense<0.000000e+00> : vector<8x8xf32>
    %111 = tpu.matmul %110, %101, %cst_51 {dimension_numbers = #tpu.dot_dimension_numbers<[1], [0], [0], [1], [0, 0, 1, 1], [], []>} : vector<8x8xbf16>, vector<8x8xbf16>, vector<8x8xf32> -> vector<8x8xf32>
    %112 = tpu.reciprocal %109 {approx = true} : vector<8x1xf32> -> vector<8x1xf32>
    %113 = vector.broadcast %112 : vector<8x1xf32> to vector<8x8xf32>
    %114 = arith.mulf %111, %113 : vector<8x8xf32>
    %115 = arith.truncf %114 : vector<8x8xf32> to vector<8x8xbf16>
    %c24_52 = arith.constant 24 : index
    %c0_53 = arith.constant 0 : index
    %116 = vector.load %arg9[%c24_52, %c0_53] : memref<32x32xbf16, #tpu.memory_space<vmem>>, vector<8x32xbf16>
    %cst_54 = arith.constant dense<0.000000e+00> : vector<8x32xf32>
    %117 = tpu.matmul %115, %116, %cst_54 {dimension_numbers = #tpu.dot_dimension_numbers<[1], [0], [0], [1], [0, 0, 1, 1], [], []>} : vector<8x8xbf16>, vector<8x32xbf16>, vector<8x32xf32> -> vector<8x32xf32>
    %118 = arith.addf %98, %117 : vector<8x32xf32>
    %c0_55 = arith.constant 0 : index
    %c0_56 = arith.constant 0 : index
    %119 = vector.load %arg11[%c0_55, %c0_56] : memref<1x32xf32, #tpu.memory_space<vmem>>, vector<1x32xf32>
    %c0_57 = arith.constant 0 : index
    %c0_58 = arith.constant 0 : index
    %120 = vector.load %arg12[%c0_57, %c0_58] : memref<1x32xf32, #tpu.memory_space<vmem>>, vector<1x32xf32>
    %cst_59 = arith.constant dense<0.000000e+00> : vector<8xf32>
    %121 = vector.multi_reduction <add>, %118, %cst_59 [1] : vector<8x32xf32> to vector<8xf32>
    %122 = vector.shape_cast %121 : vector<8xf32> to vector<8x1xf32>
    %cst_60 = arith.constant 3.200000e+01 : f32
    %123 = vector.broadcast %cst_60 : f32 to vector<8x1xf32>
    %124 = arith.divf %122, %123 : vector<8x1xf32>
    %125 = vector.broadcast %124 : vector<8x1xf32> to vector<8x32xf32>
    %126 = arith.subf %118, %125 : vector<8x32xf32>
    %127 = arith.mulf %126, %126 : vector<8x32xf32>
    %cst_61 = arith.constant dense<0.000000e+00> : vector<8xf32>
    %128 = vector.multi_reduction <add>, %127, %cst_61 [1] : vector<8x32xf32> to vector<8xf32>
    %129 = vector.shape_cast %128 : vector<8xf32> to vector<8x1xf32>
    %cst_62 = arith.constant 3.200000e+01 : f32
    %130 = vector.broadcast %cst_62 : f32 to vector<8x1xf32>
    %131 = arith.divf %129, %130 : vector<8x1xf32>
    %132 = vector.broadcast %124 : vector<8x1xf32> to vector<8x32xf32>
    %133 = arith.subf %118, %132 : vector<8x32xf32>
    %cst_63 = arith.constant 9.99999974E-6 : f32
    %134 = vector.broadcast %cst_63 : f32 to vector<8x1xf32>
    %135 = arith.addf %131, %134 : vector<8x1xf32>
    %136 = math.rsqrt %135 : vector<8x1xf32>
    %137 = vector.broadcast %136 : vector<8x1xf32> to vector<8x32xf32>
    %138 = arith.mulf %133, %137 : vector<8x32xf32>
    %139 = vector.broadcast %119 : vector<1x32xf32> to vector<8x32xf32>
    %140 = arith.mulf %138, %139 : vector<8x32xf32>
    %141 = vector.broadcast %120 : vector<1x32xf32> to vector<8x32xf32>
    %142 = arith.addf %140, %141 : vector<8x32xf32>
    %143 = arith.truncf %142 : vector<8x32xf32> to vector<8x32xbf16>
    %c0_64 = arith.constant 0 : index
    %c0_65 = arith.constant 0 : index
    %144 = vector.load %arg13[%c0_64, %c0_65] : memref<32x128xbf16, #tpu.memory_space<vmem>>, vector<32x128xbf16>
    %cst_66 = arith.constant dense<0.000000e+00> : vector<8x128xf32>
    %145 = tpu.matmul %143, %144, %cst_66 {dimension_numbers = #tpu.dot_dimension_numbers<[1], [0], [0], [1], [0, 0, 1, 1], [], []>} : vector<8x32xbf16>, vector<32x128xbf16>, vector<8x128xf32> -> vector<8x128xf32>
    %146 = arith.truncf %145 : vector<8x128xf32> to vector<8x128xbf16>
    %c0_67 = arith.constant 0 : index
    %c0_68 = arith.constant 0 : index
    %147 = vector.load %arg14[%c0_67, %c0_68] : memref<1x128xbf16, #tpu.memory_space<vmem>>, vector<1x128xbf16>
    %148 = vector.broadcast %147 : vector<1x128xbf16> to vector<8x128xbf16>
    %149 = arith.addf %146, %148 : vector<8x128xbf16>
    %cst_69 = arith.constant 0.000000e+00 : bf16
    %150 = vector.broadcast %cst_69 : bf16 to vector<8x128xbf16>
    %151 = arith.maximumf %149, %150 : vector<8x128xbf16>
    %c0_70 = arith.constant 0 : index
    %c0_71 = arith.constant 0 : index
    %152 = vector.load %arg15[%c0_70, %c0_71] : memref<128x32xbf16, #tpu.memory_space<vmem>>, vector<128x32xbf16>
    %cst_72 = arith.constant dense<0.000000e+00> : vector<8x32xf32>
    %153 = tpu.matmul %151, %152, %cst_72 {dimension_numbers = #tpu.dot_dimension_numbers<[1], [0], [0], [1], [0, 0, 1, 1], [], []>} : vector<8x128xbf16>, vector<128x32xbf16>, vector<8x32xf32> -> vector<8x32xf32>
    %c0_73 = arith.constant 0 : index
    %c0_74 = arith.constant 0 : index
    %154 = vector.load %arg16[%c0_73, %c0_74] : memref<1x32xf32, #tpu.memory_space<vmem>>, vector<1x32xf32>
    %155 = vector.broadcast %154 : vector<1x32xf32> to vector<8x32xf32>
    %156 = arith.addf %153, %155 : vector<8x32xf32>
    %157 = arith.addf %118, %156 : vector<8x32xf32>
    %c0_75 = arith.constant 0 : index
    %c0_76 = arith.constant 0 : index
    %c0_77 = arith.constant 0 : index
    %158 = vector.load %arg17[%c0_75, %c0_76, %c0_77] : memref<1x8x32xf32, #tpu.memory_space<vmem>>, vector<1x8x32xf32>
    %159 = vector.shape_cast %158 : vector<1x8x32xf32> to vector<8x32xf32>
    %160 = vector.shape_cast %157 : vector<8x32xf32> to vector<1x8x32xf32>
    tpu.vector_store %arg17[%c0_75, %c0_76, %c0_77], %160 {strides = array<i32>} : memref<1x8x32xf32, #tpu.memory_space<vmem>>, vector<1x8x32xf32>,
    return
  }
  func.func @transform_0(%arg0: i32, %arg1: i32) -> (i32, i32, i32) {
    %c0_i32 = arith.constant 0 : i32
    %c0_i32_0 = arith.constant 0 : i32
    %c0_i32_1 = arith.constant 0 : i32
    return %arg0, %c0_i32, %c0_i32_0 : i32, i32, i32
  }
  func.func @transform_1(%arg0: i32, %arg1: i32) -> (i32, i32) {
    %c0_i32 = arith.constant 0 : i32
    %c0_i32_0 = arith.constant 0 : i32
    %c0_i32_1 = arith.constant 0 : i32
    return %c0_i32, %c0_i32_0 : i32, i32
  }
  func.func @transform_2(%arg0: i32, %arg1: i32) -> (i32, i32) {
    %c0_i32 = arith.constant 0 : i32
    %c0_i32_0 = arith.constant 0 : i32
    %c0_i32_1 = arith.constant 0 : i32
    return %c0_i32, %c0_i32_0 : i32, i32
  }
  func.func @transform_3(%arg0: i32, %arg1: i32) -> (i32, i32) {
    %c0_i32 = arith.constant 0 : i32
    %c0_i32_0 = arith.constant 0 : i32
    %c0_i32_1 = arith.constant 0 : i32
    return %c0_i32, %c0_i32_0 : i32, i32
  }
  func.func @transform_4(%arg0: i32, %arg1: i32) -> (i32, i32) {
    %c0_i32 = arith.constant 0 : i32
    %c0_i32_0 = arith.constant 0 : i32
    %c0_i32_1 = arith.constant 0 : i32
    return %c0_i32, %c0_i32_0 : i32, i32
  }
  func.func @transform_5(%arg0: i32, %arg1: i32) -> (i32, i32) {
    %c0_i32 = arith.constant 0 : i32
    %c0_i32_0 = arith.constant 0 : i32
    %c0_i32_1 = arith.constant 0 : i32
    return %c0_i32, %c0_i32_0 : i32, i32
  }
  func.func @transform_6(%arg0: i32, %arg1: i32) -> (i32, i32) {
    %c0_i32 = arith.constant 0 : i32
    %c0_i32_0 = arith.constant 0 : i32
    %c0_i32_1 = arith.constant 0 : i32
    return %c0_i32, %c0_i32_0 : i32, i32
  }
  func.func @transform_7(%arg0: i32, %arg1: i32) -> (i32, i32) {
    %c0_i32 = arith.constant 0 : i32
    %c0_i32_0 = arith.constant 0 : i32
    %c0_i32_1 = arith.constant 0 : i32
    return %c0_i32, %c0_i32_0 : i32, i32
  }
  func.func @transform_8(%arg0: i32, %arg1: i32) -> (i32, i32) {
    %c0_i32 = arith.constant 0 : i32
    %c0_i32_0 = arith.constant 0 : i32
    %c0_i32_1 = arith.constant 0 : i32
    return %c0_i32, %c0_i32_0 : i32, i32
  }
  func.func @transform_9(%arg0: i32, %arg1: i32) -> (i32, i32) {
    %c0_i32 = arith.constant 0 : i32
    %c0_i32_0 = arith.constant 0 : i32
    %c0_i32_1 = arith.constant 0 : i32
    return %c0_i32, %c0_i32_0 : i32, i32
  }
  func.func @transform_10(%arg0: i32, %arg1: i32) -> (i32, i32) {
    %c0_i32 = arith.constant 0 : i32
    %c0_i32_0 = arith.constant 0 : i32
    %c0_i32_1 = arith.constant 0 : i32
    return %c0_i32, %c0_i32_0 : i32, i32
  }
  func.func @transform_11(%arg0: i32, %arg1: i32) -> (i32, i32) {
    %c0_i32 = arith.constant 0 : i32
    %c0_i32_0 = arith.constant 0 : i32
    %c0_i32_1 = arith.constant 0 : i32
    return %c0_i32, %c0_i32_0 : i32, i32
  }
  func.func @transform_12(%arg0: i32, %arg1: i32) -> (i32, i32) {
    %c0_i32 = arith.constant 0 : i32
    %c0_i32_0 = arith.constant 0 : i32
    %c0_i32_1 = arith.constant 0 : i32
    return %c0_i32, %c0_i32_0 : i32, i32
  }
  func.func @transform_13(%arg0: i32, %arg1: i32) -> (i32, i32) {
    %c0_i32 = arith.constant 0 : i32
    %c0_i32_0 = arith.constant 0 : i32
    %c0_i32_1 = arith.constant 0 : i32
    return %c0_i32, %c0_i32_0 : i32, i32
  }
  func.func @transform_14(%arg0: i32, %arg1: i32) -> (i32, i32) {
    %c0_i32 = arith.constant 0 : i32
    %c0_i32_0 = arith.constant 0 : i32
    %c0_i32_1 = arith.constant 0 : i32
    return %c0_i32, %c0_i32_0 : i32, i32
  }
  func.func @transform_15(%arg0: i32, %arg1: i32) -> (i32, i32, i32) {
    %c0_i32 = arith.constant 0 : i32
    %c0_i32_0 = arith.constant 0 : i32
    return %arg0, %arg1, %c0_i32 : i32, i32, i32
  }
}

</mosaic_0001>

<bundles_post_ra>
// kernel: tpu_custom_call.1
= control target key start
LH: loop header
LB: loop body
LE: loop exit
PB: predicated region body
PF: predicated region fallthrough
CT: control target
= control target key end

     0   :  { %s3775_s0 = inlined_call_operand.hbm [shape: f32[2,8,32], index: 0, kind: input, shape index: {}]   ;;  %s3776_s1 = inlined_call_operand.hbm [shape: f32[1,32], index: 1, kind: input, shape index: {}]   ;;  %s3777_s2 = inlined_call_operand.hbm [shape: f32[1,32], index: 2, kind: input, shape index: {}]   ;;  %s3778_s3 = inlined_call_operand.hbm [shape: bf16[32,32], index: 3, kind: input, shape index: {}]   ;;  %s3779_s4 = inlined_call_operand.hbm [shape: f32[1,32], index: 4, kind: input, shape index: {}]   ;;  %s3780_s5 = inlined_call_operand.hbm [shape: bf16[32,64], index: 5, kind: input, shape index: {}]   ;;  %s3781_s6 = inlined_call_operand.hbm [shape: f32[1,64], index: 6, kind: input, shape index: {}]   ;;  %s3782_s7 = inlined_call_operand.hbm [shape: bf16[32,32], index: 7, kind: input, shape index: {}]   ;;  %s3783_s8 = inlined_call_operand.hbm [shape: f32[1,32], index: 8, kind: input, shape index: {}]   ;;  %s3784_s9 = inlined_call_operand.hbm [shape: f32[1,32], index: 9, kind: input, shape index: {}]   ;;  %s3785_s10 = inlined_call_operand.hbm [shape: f32[1,32], index: 10, kind: input, shape index: {}]   ;;  %s3786_s11 = inlined_call_operand.hbm [shape: bf16[32,128], index: 11, kind: input, shape index: {}]   ;;  %s3787_s12 = inlined_call_operand.hbm [shape: bf16[1,128], index: 12, kind: input, shape index: {}]   ;;  %s3788_s13 = inlined_call_operand.hbm [shape: bf16[128,32], index: 13, kind: input, shape index: {}]   ;;  %s3789_s14 = inlined_call_operand.hbm [shape: f32[1,32], index: 14, kind: input, shape index: {}]   ;;  %s3790_s15 = inlined_call_operand.hbm [shape: f32[2,8,32], index: 15, kind: output, shape index: {}]  }
   0x1   :  { %3803 = sst [smem:[#allocation43_spill]] %s3775_s0 }
   0x2   :  { %3804 = sst [smem:[#allocation44_spill]] %s3776_s1 }
   0x3   :  { %3805 = sst [smem:[#allocation45_spill]] %s3777_s2 }
   0x4   :  { %3806 = sst [smem:[#allocation46_spill]] %s3778_s3 }
   0x5   :  { %3807 = sst [smem:[#allocation47_spill]] %s3790_s15 }
   0x6   :  { %20 = vsyncpa [#allocation4], 0 }
   0x7   :  { %22 = vsyncpa [#allocation4 + $0x1], 0 }
   0x8   :  { %23 = vsyncpa [#allocation7], 0 }
   0x9   :  { %24 = vsyncpa [#allocation10], 0 }
   0xa   :  { %25 = vsyncpa [#allocation13], 0 }
   0xb   :  { %26 = vsyncpa [#allocation16], 0 }
   0xc   :  { %27 = vsyncpa [#allocation19], 0 }
   0xd   :  { %28 = vsyncpa [#allocation22], 0 }
   0xe   :  { %29 = vsyncpa [#allocation25], 0 }
   0xf   :  { %30 = vsyncpa [#allocation5], 0 }
  0x10   :  { %32 = vsyncpa [#allocation5 + $0x1], 0  ;;  %s3149_s18 = smov 0   ;;  %s3151_s19 = smov 0  }
  0x11   :  { %s3153_s20 = smov 0   ;;  %s3155_s21 = smov 0  }
  0x12   :  { %s3157_s22 = smov 0   ;;  %s3159_s23 = smov 0  }
  0x13 LB: > { %3808 = sst [smem:[#allocation37_spill]] %s3019_s18  ;;  %s3791_s24 = sadd.s32 4294967295, %s3039_s23   ;;  %s3039_s23 = sphi %s3159_s23, %s38_s23   ;;  %s3035_s22 = sphi %s3157_s22, %s3849_s22   ;;  %s3031_s21 = sphi %s3155_s21, %s3848_s21   ;;  %s3027_s20 = sphi %s3153_s20, %s3847_s20   ;;  %s3023_s19 = sphi %s3151_s19, %s3845_s19   ;;  %s3019_s18 = sphi %s3149_s18, %s3844_s18  }
  0x14   : > { %3809 = sst [smem:[#allocation38_spill]] %s3023_s19  ;;  %p2005_p0 = scmp.ge.s32.totalorder %s3039_s23, 1 }
  0x15   : > { %3810 = sst [smem:[#allocation39_spill]] %s3027_s20  ;;  %p3183_p1 = scmp.eq.s32.totalorder %s3791_s24, 0 }
  0x16   : > { %3811 = sst [smem:[#allocation40_spill]] %s3031_s21  ;;  %p403_p2 = scmp.lt.s32.totalorder %s3039_s23, 3 }
  0x17   : > { %s3812_s25 = scalar_select %p3183_p1, 1, 0 }
  0x18   : > { %p3188_p3 = pnand %p2005_p0, %p403_p2  ;;  %s3041_s27 = smov [#allocation6]  }
  0x19   : > { %3813 = sst [smem:[#allocation41_spill]] %s3812_s25  ;;  %s416_s28 = sshll.u32 %s3041_s27, 4  ;;  %s417_s28 = int_to_ptr.vmem [resolvable:$true] %s416_s28 }
  0x1a   : > { %s3814_s26 = scalar_select %p3188_p3, 1, 0 }
  0x1b   : > { %p2315_p5 = pneg %p3188_p3  ;;  %s3042_s29 = smov [#allocation9]  }
  0x1c   : > { %3815 = sst [smem:[#allocation42_spill]] %s3814_s26  ;;  %s437_s30 = sshll.u32 %s3042_s29, 4  ;;  %s3201_s30 = int_to_ptr.vmem [resolvable:$true] %s437_s30 }
  0x1d   : > { %p3197_p6 = pnand %p2315_p5, %p3183_p1  ;;  %s3043_s17 = smov [#allocation12]  }
  0x1e   : > { %s3203_s24 = sshll.u32 %s3043_s17, 4  ;;  %s3817_s1 = sld [smem:[#allocation44_spill]]  ;;  %s462_s24 = int_to_ptr.vmem [resolvable:$true] %s3203_s24 }
  0x1f   : > { %p3213_p8 = pneg %p3197_p6 }
  0x24   : > { %s2507_s27 = scalar_lea.hbm %s3817_s1, 16 }
  0x25   : > { %p2508_p7 = scmp.ne.s32.totalorder %s3817_s1, %s2507_s27  ;;  %p2514_p11 = scmp.lt.u32.totalorder %s2507_s27, %s3817_s1 }
  0x27   : > { %p2510_p9 = pnand %p3213_p8, %p2508_p7 }
  0x29   : > { %p2511_p10 = pneg %p2510_p9 }
  0x2b   : > { %p2516_p12 = pnand %p2514_p11, %p2511_p10 }
  0x2d   : > { %2519 = shalt.err (!%p2516_p12)
}
  0x2e   : > { %s2520_s15 = scalar_lea.vmem %s417_s28, 16  ;;  %s2527_s0 = scalar_lea.vmem %s417_s28, 32 }
  0x2f   : > { %p2521_p13 = scmp.ne.s32.totalorder %s417_s28, %s2520_s15  ;;  %p2528_p5 = scmp.lt.s32.totalorder %s417_s28, %s417_s28 }
  0x30   : > { %p2529_p4 = scmp.lt.s32.totalorder %s2527_s0, %s2520_s15 }
  0x31   : > { %p2523_p0 = pnand %p2521_p13, %p3213_p8 }
  0x32   : > { %p2530_p3 = por %p2529_p4, %p2528_p5 }
  0x33   : > { %p2524_p2 = pneg %p2523_p0 }
  0x35   : > { %p2531_p1 = pnand %p2530_p3, %p2524_p2 }
  0x37   : > { %2534 = shalt.err (!%p2531_p1)
}
  0x38   : > { %2318 = dma.hbm_to_vmem [thread:$0]  (!%p3197_p6), %s3817_s1, 16, %s417_s28, [#allocation7]  }
  0x39   : > { %s3819_s3 = sld [smem:[#allocation46_spill]] }
  0x3f   : > { %s2535_s17 = scalar_lea.hbm %s3819_s3, 256 }
  0x40   : > { %p2536_p7 = scmp.ne.s32.totalorder %s3819_s3, %s2535_s17  ;;  %p2542_p1 = scmp.lt.u32.totalorder %s2535_s17, %s3819_s3 }
  0x42   : > { %p2538_p9 = pnand %p2536_p7, %p3213_p8 }
  0x44   : > { %p2539_p4 = pneg %p2538_p9 }
  0x46   : > { %p2544_p3 = pnand %p2542_p1, %p2539_p4 }
  0x48   : > { %2547 = shalt.err (!%p2544_p3)
}
  0x49   : > { %s2548_s28 = scalar_lea.vmem %s3201_s30, 256  ;;  %p2556_p13 = scmp.lt.s32.totalorder %s3201_s30, %s3201_s30 }
  0x4a   : > { %p2549_p10 = scmp.ne.s32.totalorder %s3201_s30, %s2548_s28  ;;  %p2557_p0 = scmp.lt.s32.totalorder %s2548_s28, %s2548_s28 }
  0x4c   : > { %p2551_p11 = pnand %p2549_p10, %p3213_p8  ;;  %p2558_p2 = por %p2557_p0, %p2556_p13 }
  0x4e   : > { %p2552_p12 = pneg %p2551_p11 }
  0x50   : > { %p2559_p5 = pnand %p2558_p2, %p2552_p12 }
  0x52   : > { %2562 = shalt.err (!%p2559_p5)
}
  0x53   : > { %s3044_s18 = smov 64   ;;  %s3045_s19 = smov 4  }
  0x54   : > { %2324 = dma.hbm_to_vmem [thread:$0]  (!%p3197_p6), %s3819_s3, 256, %s3201_s30, [#allocation10], %s3044_s18, %s3044_s18, %s3045_s19  }
  0x55   : > { %s2563_s17 = scalar_lea.hbm %s3780_s5, 256 }
  0x56   : > { %p2564_p7 = scmp.ne.s32.totalorder %s3780_s5, %s2563_s17  ;;  %p2570_p1 = scmp.lt.u32.totalorder %s2563_s17, %s3780_s5 }
  0x58   : > { %p2566_p9 = pnand %p2564_p7, %p3213_p8 }
  0x5a   : > { %p2567_p4 = pneg %p2566_p9 }
  0x5c   : > { %p2572_p3 = pnand %p2570_p1, %p2567_p4 }
  0x5e   : > { %2575 = shalt.err (!%p2572_p3)
}
  0x5f   : > { %s2576_s21 = scalar_lea.vmem %s462_s24, 256  ;;  %p2584_p13 = scmp.lt.s32.totalorder %s462_s24, %s462_s24 }
  0x60   : > { %p2577_p10 = scmp.ne.s32.totalorder %s462_s24, %s2576_s21  ;;  %p2585_p0 = scmp.lt.s32.totalorder %s2576_s21, %s2576_s21 }
  0x62   : > { %p2579_p11 = pnand %p2577_p10, %p3213_p8  ;;  %p2586_p2 = por %p2585_p0, %p2584_p13 }
  0x64   : > { %p2580_p12 = pneg %p2579_p11 }
  0x66   : > { %p2587_p5 = pnand %p2586_p2, %p2580_p12 }
  0x68   : > { %2590 = shalt.err (!%p2587_p5)
}
  0x69   : > { %2330 = dma.hbm_to_vmem [thread:$0]  (!%p3197_p6), %s3780_s5, 256, %s462_s24, [#allocation13], %s3044_s18, %s3044_s18, %s3045_s19  }
  0x6a   : > { %s3046_s26 = smov [#allocation15]   ;;  %s3047_s27 = smov [#allocation18]  }
  0x6b   : > { %s485_s25 = sshll.u32 %s3046_s26, 4  ;;  %s510_s17 = sshll.u32 %s3047_s27, 4  ;;  %s486_s25 = int_to_ptr.vmem [resolvable:$true] %s485_s25  ;;  %s511_s17 = int_to_ptr.vmem [resolvable:$true] %s510_s17 }
  0x6c   : > { %s2591_s28 = scalar_lea.hbm %s3782_s7, 256 }
  0x6d   : > { %p2592_p7 = scmp.ne.s32.totalorder %s3782_s7, %s2591_s28  ;;  %p2598_p1 = scmp.lt.u32.totalorder %s2591_s28, %s3782_s7 }
  0x6f   : > { %p2594_p9 = pnand %p2592_p7, %p3213_p8 }
  0x71   : > { %p2595_p4 = pneg %p2594_p9 }
  0x73   : > { %p2600_p3 = pnand %p2598_p1, %p2595_p4 }
  0x75   : > { %2603 = shalt.err (!%p2600_p3)
}
  0x76   : > { %s2604_s24 = scalar_lea.vmem %s486_s25, 256  ;;  %p2612_p13 = scmp.lt.s32.totalorder %s486_s25, %s486_s25 }
  0x77   : > { %p2605_p10 = scmp.ne.s32.totalorder %s486_s25, %s2604_s24  ;;  %p2613_p0 = scmp.lt.s32.totalorder %s2604_s24, %s2604_s24 }
  0x79   : > { %p2607_p11 = pnand %p2605_p10, %p3213_p8  ;;  %p2614_p2 = por %p2613_p0, %p2612_p13 }
  0x7b   : > { %p2608_p12 = pneg %p2607_p11 }
  0x7d   : > { %p2615_p5 = pnand %p2614_p2, %p2608_p12 }
  0x7f   : > { %2618 = shalt.err (!%p2615_p5)
}
  0x80   : > { %2336 = dma.hbm_to_vmem [thread:$0]  (!%p3197_p6), %s3782_s7, 256, %s486_s25, [#allocation16], %s3044_s18, %s3044_s18, %s3045_s19  }
  0x81   : > { %s2619_s27 = scalar_lea.hbm %s3784_s9, 16 }
  0x82   : > { %p2620_p7 = scmp.ne.s32.totalorder %s3784_s9, %s2619_s27  ;;  %p2626_p1 = scmp.lt.u32.totalorder %s2619_s27, %s3784_s9 }
  0x84   : > { %p2622_p9 = pnand %p2620_p7, %p3213_p8 }
  0x86   : > { %p2623_p4 = pneg %p2622_p9 }
  0x88   : > { %p2628_p3 = pnand %p2626_p1, %p2623_p4 }
  0x8a   : > { %2631 = shalt.err (!%p2628_p3)
}
  0x8b   : > { %s2632_s1 = scalar_lea.vmem %s511_s17, 16  ;;  %s2639_s25 = scalar_lea.vmem %s511_s17, 32 }
  0x8c   : > { %p2633_p10 = scmp.ne.s32.totalorder %s511_s17, %s2632_s1  ;;  %p2640_p13 = scmp.lt.s32.totalorder %s511_s17, %s511_s17 }
  0x8d   : > { %p2641_p0 = scmp.lt.s32.totalorder %s2639_s25, %s2632_s1 }
  0x8e   : > { %p2635_p11 = pnand %p2633_p10, %p3213_p8 }
  0x8f   : > { %p2642_p2 = por %p2641_p0, %p2640_p13 }
  0x90   : > { %p2636_p12 = pneg %p2635_p11 }
  0x92   : > { %p2643_p5 = pnand %p2642_p2, %p2636_p12 }
  0x94   : > { %2646 = shalt.err (!%p2643_p5)
}
  0x95   : > { %2342 = dma.hbm_to_vmem [thread:$0]  (!%p3197_p6), %s3784_s9, 16, %s511_s17, [#allocation19]  }
  0x96   : > { %s3048_s20 = smov [#allocation21]   ;;  %s3049_s26 = smov [#allocation24]  }
  0x97   : > { %s531_s30 = sshll.u32 %s3048_s20, 4  ;;  %s555_s27 = sshll.u32 %s3049_s26, 4  ;;  %s532_s30 = int_to_ptr.vmem [resolvable:$true] %s531_s30  ;;  %s556_s27 = int_to_ptr.vmem [resolvable:$true] %s555_s27 }
  0x98   : > { %s2647_s28 = scalar_lea.hbm %s3786_s11, 256 }
  0x99   : > { %p2648_p7 = scmp.ne.s32.totalorder %s3786_s11, %s2647_s28  ;;  %p2654_p1 = scmp.lt.u32.totalorder %s2647_s28, %s3786_s11 }
  0x9b   : > { %p2650_p9 = pnand %p2648_p7, %p3213_p8 }
  0x9d   : > { %p2651_p4 = pneg %p2650_p9 }
  0x9f   : > { %p2656_p3 = pnand %p2654_p1, %p2651_p4 }
  0xa1   : > { %2659 = shalt.err (!%p2656_p3)
}
  0xa2   : > { %s2660_s17 = scalar_lea.vmem %s532_s30, 256  ;;  %p2668_p13 = scmp.lt.s32.totalorder %s532_s30, %s532_s30 }
  0xa3   : > { %p2661_p10 = scmp.ne.s32.totalorder %s532_s30, %s2660_s17  ;;  %p2669_p0 = scmp.lt.s32.totalorder %s2660_s17, %s2660_s17 }
  0xa5   : > { %p2663_p11 = pnand %p2661_p10, %p3213_p8  ;;  %p2670_p2 = por %p2669_p0, %p2668_p13 }
  0xa7   : > { %p2664_p12 = pneg %p2663_p11 }
  0xa9   : > { %p2671_p5 = pnand %p2670_p2, %p2664_p12 }
  0xab   : > { %2674 = shalt.err (!%p2671_p5)
}
  0xac   : > { %2348 = dma.hbm_to_vmem [thread:$0]  (!%p3197_p6), %s3786_s11, 256, %s532_s30, [#allocation22], %s3044_s18, %s3044_s18, %s3045_s19  }
  0xad   : > { %s2675_s0 = scalar_lea.hbm %s3788_s13, 1024 }
  0xae   : > { %p2676_p7 = scmp.ne.s32.totalorder %s3788_s13, %s2675_s0  ;;  %p2682_p1 = scmp.lt.u32.totalorder %s2675_s0, %s3788_s13 }
  0xb0   : > { %p2678_p9 = pnand %p2676_p7, %p3213_p8 }
  0xb2   : > { %p2679_p4 = pneg %p2678_p9 }
  0xb4   : > { %p2684_p3 = pnand %p2682_p1, %p2679_p4 }
  0xb6   : > { %2687 = shalt.err (!%p2684_p3)
}
  0xb7   : > { %s2688_s24 = scalar_lea.vmem %s556_s27, 1024  ;;  %p2696_p13 = scmp.lt.s32.totalorder %s556_s27, %s556_s27 }
  0xb8   : > { %p2689_p10 = scmp.ne.s32.totalorder %s556_s27, %s2688_s24  ;;  %p2697_p0 = scmp.lt.s32.totalorder %s2688_s24, %s2688_s24 }
  0xba   : > { %p2691_p11 = pnand %p2689_p10, %p3213_p8  ;;  %p2698_p2 = por %p2697_p0, %p2696_p13 }
  0xbc   : > { %p2692_p12 = pneg %p2691_p11 }
  0xbe   : > { %p2699_p5 = pnand %p2698_p2, %p2692_p12 }
  0xc0   : > { %2702 = shalt.err (!%p2699_p5)
}
  0xc1   : > { %2354 = dma.hbm_to_vmem [thread:$0]  (!%p3197_p6), %s3788_s13, 1024, %s556_s27, [#allocation25], %s3044_s18, %s3044_s18, %s3045_s19  }
  0xc2   : > { %s3050_s3 = smov [#allocation8]   ;;  %s3051_s26 = smov [#allocation11]  }
  0xc3   : > { %s427_s20 = sshll.u32 %s3050_s3, 4  ;;  %s451_s15 = sshll.u32 %s3051_s26, 4  ;;  %s428_s20 = int_to_ptr.vmem [resolvable:$true] %s427_s20  ;;  %s452_s15 = int_to_ptr.vmem [resolvable:$true] %s451_s15 }
  0xc4   : > { %s3820_s2 = sld [smem:[#allocation45_spill]] }
  0xca   : > { %s2703_s21 = scalar_lea.hbm %s3820_s2, 16 }
  0xcb   : > { %p2704_p7 = scmp.ne.s32.totalorder %s3820_s2, %s2703_s21  ;;  %p2710_p1 = scmp.lt.u32.totalorder %s2703_s21, %s3820_s2 }
  0xcd   : > { %p2706_p9 = pnand %p2704_p7, %p3213_p8 }
  0xcf   : > { %p2707_p4 = pneg %p2706_p9 }
  0xd1   : > { %p2712_p3 = pnand %p2710_p1, %p2707_p4 }
  0xd3   : > { %2715 = shalt.err (!%p2712_p3)
}
  0xd4   : > { %s2716_s18 = scalar_lea.vmem %s428_s20, 16  ;;  %s2723_s19 = scalar_lea.vmem %s428_s20, 32 }
  0xd5   : > { %p2717_p10 = scmp.ne.s32.totalorder %s428_s20, %s2716_s18  ;;  %p2724_p13 = scmp.lt.s32.totalorder %s428_s20, %s428_s20 }
  0xd6   : > { %p2725_p0 = scmp.lt.s32.totalorder %s2723_s19, %s2716_s18 }
  0xd7   : > { %p2719_p11 = pnand %p2717_p10, %p3213_p8 }
  0xd8   : > { %p2726_p2 = por %p2725_p0, %p2724_p13 }
  0xd9   : > { %p2720_p12 = pneg %p2719_p11 }
  0xdb   : > { %p2727_p5 = pnand %p2726_p2, %p2720_p12 }
  0xdd   : > { %2730 = shalt.err (!%p2727_p5)
}
  0xde   : > { %2321 = dma.hbm_to_vmem [thread:$0]  (!%p3197_p6), %s3820_s2, 16, %s428_s20, [#allocation7]  }
  0xdf   : > { %s2731_s0 = scalar_lea.hbm %s3779_s4, 16 }
  0xe0   : > { %p2732_p7 = scmp.ne.s32.totalorder %s3779_s4, %s2731_s0  ;;  %p2738_p1 = scmp.lt.u32.totalorder %s2731_s0, %s3779_s4 }
  0xe2   : > { %p2734_p9 = pnand %p2732_p7, %p3213_p8 }
  0xe4   : > { %p2735_p4 = pneg %p2734_p9 }
  0xe6   : > { %p2740_p3 = pnand %p2738_p1, %p2735_p4 }
  0xe8   : > { %2743 = shalt.err (!%p2740_p3)
}
  0xe9   : > { %s2744_s24 = scalar_lea.vmem %s452_s15, 16  ;;  %s2751_s20 = scalar_lea.vmem %s452_s15, 32 }
  0xea   : > { %p2745_p10 = scmp.ne.s32.totalorder %s452_s15, %s2744_s24  ;;  %p2752_p13 = scmp.lt.s32.totalorder %s452_s15, %s452_s15 }
  0xeb   : > { %p2753_p0 = scmp.lt.s32.totalorder %s2751_s20, %s2744_s24 }
  0xec   : > { %p2747_p11 = pnand %p2745_p10, %p3213_p8 }
  0xed   : > { %p2754_p2 = por %p2753_p0, %p2752_p13 }
  0xee   : > { %p2748_p12 = pneg %p2747_p11 }
  0xf0   : > { %p2755_p5 = pnand %p2754_p2, %p2748_p12 }
  0xf2   : > { %2758 = shalt.err (!%p2755_p5)
}
  0xf3   : > { %2327 = dma.hbm_to_vmem [thread:$0]  (!%p3197_p6), %s3779_s4, 16, %s452_s15, [#allocation10]  }
  0xf4   : > { %s3052_s19 = smov [#allocation14]   ;;  %s3053_s17 = smov [#allocation17]  }
  0xf5   : > { %s475_s27 = sshll.u32 %s3052_s19, 4  ;;  %s499_s3 = sshll.u32 %s3053_s17, 4  ;;  %s476_s27 = int_to_ptr.vmem [resolvable:$true] %s475_s27  ;;  %s500_s3 = int_to_ptr.vmem [resolvable:$true] %s499_s3 }
  0xf6   : > { %s2759_s28 = scalar_lea.hbm %s3781_s6, 16 }
  0xf7   : > { %p2760_p7 = scmp.ne.s32.totalorder %s3781_s6, %s2759_s28  ;;  %p2766_p1 = scmp.lt.u32.totalorder %s2759_s28, %s3781_s6 }
  0xf9   : > { %p2762_p9 = pnand %p2760_p7, %p3213_p8 }
  0xfb   : > { %p2763_p4 = pneg %p2762_p9 }
  0xfd   : > { %p2768_p3 = pnand %p2766_p1, %p2763_p4 }
  0xff   : > { %2771 = shalt.err (!%p2768_p3)
}
 0x100   : > { %s2772_s15 = scalar_lea.vmem %s476_s27, 16  ;;  %s2779_s20 = scalar_lea.vmem %s476_s27, 32 }
 0x101   : > { %p2773_p10 = scmp.ne.s32.totalorder %s476_s27, %s2772_s15  ;;  %p2780_p13 = scmp.lt.s32.totalorder %s476_s27, %s476_s27 }
 0x102   : > { %p2781_p0 = scmp.lt.s32.totalorder %s2779_s20, %s2772_s15 }
 0x103   : > { %p2775_p11 = pnand %p2773_p10, %p3213_p8 }
 0x104   : > { %p2782_p2 = por %p2781_p0, %p2780_p13 }
 0x105   : > { %p2776_p12 = pneg %p2775_p11 }
 0x107   : > { %p2783_p5 = pnand %p2782_p2, %p2776_p12 }
 0x109   : > { %2786 = shalt.err (!%p2783_p5)
}
 0x10a   : > { %2333 = dma.hbm_to_vmem [thread:$0]  (!%p3197_p6), %s3781_s6, 16, %s476_s27, [#allocation13]  }
 0x10b   : > { %s2787_s26 = scalar_lea.hbm %s3783_s8, 16 }
 0x10c   : > { %p2788_p7 = scmp.ne.s32.totalorder %s3783_s8, %s2787_s26  ;;  %p2794_p1 = scmp.lt.u32.totalorder %s2787_s26, %s3783_s8 }
 0x10e   : > { %p2790_p9 = pnand %p2788_p7, %p3213_p8 }
 0x110   : > { %p2791_p4 = pneg %p2790_p9 }
 0x112   : > { %p2796_p3 = pnand %p2794_p1, %p2791_p4 }
 0x114   : > { %2799 = shalt.err (!%p2796_p3)
}
 0x115   : > { %s2800_s25 = scalar_lea.vmem %s500_s3, 16  ;;  %s2807_s27 = scalar_lea.vmem %s500_s3, 32 }
 0x116   : > { %p2801_p10 = scmp.ne.s32.totalorder %s500_s3, %s2800_s25  ;;  %p2808_p13 = scmp.lt.s32.totalorder %s500_s3, %s500_s3 }
 0x117   : > { %p2809_p0 = scmp.lt.s32.totalorder %s2807_s27, %s2800_s25 }
 0x118   : > { %p2803_p11 = pnand %p2801_p10, %p3213_p8 }
 0x119   : > { %p2810_p2 = por %p2809_p0, %p2808_p13 }
 0x11a   : > { %p2804_p12 = pneg %p2803_p11 }
 0x11c   : > { %p2811_p5 = pnand %p2810_p2, %p2804_p12 }
 0x11e   : > { %2814 = shalt.err (!%p2811_p5)
}
 0x11f   : > { %2339 = dma.hbm_to_vmem [thread:$0]  (!%p3197_p6), %s3783_s8, 16, %s500_s3, [#allocation16]  }
 0x120   : > { %s3054_s20 = smov [#allocation20]   ;;  %s3055_s18 = smov [#allocation23]  }
 0x121   : > { %s521_s30 = sshll.u32 %s3054_s20, 4  ;;  %s545_s19 = sshll.u32 %s3055_s18, 4  ;;  %s522_s30 = int_to_ptr.vmem [resolvable:$true] %s521_s30  ;;  %s546_s19 = int_to_ptr.vmem [resolvable:$true] %s545_s19 }
 0x122   : > { %s2815_s0 = scalar_lea.hbm %s3785_s10, 16 }
 0x123   : > { %p2816_p7 = scmp.ne.s32.totalorder %s3785_s10, %s2815_s0  ;;  %p2822_p1 = scmp.lt.u32.totalorder %s2815_s0, %s3785_s10 }
 0x125   : > { %p2818_p9 = pnand %p2816_p7, %p3213_p8 }
 0x127   : > { %p2819_p4 = pneg %p2818_p9 }
 0x129   : > { %p2824_p3 = pnand %p2822_p1, %p2819_p4 }
 0x12b   : > { %2827 = shalt.err (!%p2824_p3)
}
 0x12c   : > { %s2828_s3 = scalar_lea.vmem %s522_s30, 16  ;;  %s2835_s27 = scalar_lea.vmem %s522_s30, 32 }
 0x12d   : > { %p2829_p10 = scmp.ne.s32.totalorder %s522_s30, %s2828_s3  ;;  %p2836_p13 = scmp.lt.s32.totalorder %s522_s30, %s522_s30 }
 0x12e   : > { %p2837_p0 = scmp.lt.s32.totalorder %s2835_s27, %s2828_s3 }
 0x12f   : > { %p2831_p11 = pnand %p2829_p10, %p3213_p8 }
 0x130   : > { %p2838_p2 = por %p2837_p0, %p2836_p13 }
 0x131   : > { %p2832_p12 = pneg %p2831_p11 }
 0x133   : > { %p2839_p5 = pnand %p2838_p2, %p2832_p12 }
 0x135   : > { %2842 = shalt.err (!%p2839_p5)
}
 0x136   : > { %2345 = dma.hbm_to_vmem [thread:$0]  (!%p3197_p6), %s3785_s10, 16, %s522_s30, [#allocation19]  }
 0x137   : > { %s2843_s17 = scalar_lea.hbm %s3787_s12, 16 }
 0x138   : > { %p2844_p7 = scmp.ne.s32.totalorder %s3787_s12, %s2843_s17  ;;  %p2850_p1 = scmp.lt.u32.totalorder %s2843_s17, %s3787_s12 }
 0x13a   : > { %p2846_p9 = pnand %p2844_p7, %p3213_p8 }
 0x13c   : > { %p2847_p4 = pneg %p2846_p9 }
 0x13e   : > { %p2852_p3 = pnand %p2850_p1, %p2847_p4 }
 0x140   : > { %2855 = shalt.err (!%p2852_p3)
}
 0x141   : > { %s2856_s1 = scalar_lea.vmem %s546_s19, 16  ;;  %s2863_s30 = scalar_lea.vmem %s546_s19, 32 }
 0x142   : > { %p2857_p10 = scmp.ne.s32.totalorder %s546_s19, %s2856_s1  ;;  %p2864_p13 = scmp.lt.s32.totalorder %s546_s19, %s546_s19 }
 0x143   : > { %p2865_p0 = scmp.lt.s32.totalorder %s2863_s30, %s2856_s1 }
 0x144   : > { %p2859_p11 = pnand %p2857_p10, %p3213_p8 }
 0x145   : > { %p2866_p2 = por %p2865_p0, %p2864_p13 }
 0x146   : > { %p2860_p12 = pneg %p2859_p11 }
 0x148   : > { %p2867_p5 = pnand %p2866_p2, %p2860_p12 }
 0x14a   : > { %2870 = shalt.err (!%p2867_p5)
}
 0x14b   : > { %2351 = dma.hbm_to_vmem [thread:$0]  (!%p3197_p6), %s3787_s12, 16, %s546_s19, [#allocation22]  }
 0x14c   : > { %s3056_s27 = smov [#allocation26]   ;;  %s2871_s18 = scalar_lea.hbm %s3789_s14, 16 }
 0x14d   : > { %s569_s24 = sshll.u32 %s3056_s27, 4  ;;  %p2872_p7 = scmp.ne.s32.totalorder %s3789_s14, %s2871_s18  ;;  %s570_s24 = int_to_ptr.vmem [resolvable:$true] %s569_s24 }
 0x14e   : > { %p2878_p1 = scmp.lt.u32.totalorder %s2871_s18, %s3789_s14 }
 0x14f   : > { %p2874_p9 = pnand %p2872_p7, %p3213_p8 }
 0x151   : > { %p2875_p4 = pneg %p2874_p9 }
 0x153   : > { %p2880_p3 = pnand %p2878_p1, %p2875_p4 }
 0x155   : > { %2883 = shalt.err (!%p2880_p3)
}
 0x156   : > { %s2884_s19 = scalar_lea.vmem %s570_s24, 16  ;;  %s2891_s21 = scalar_lea.vmem %s570_s24, 32 }
 0x157   : > { %p2885_p10 = scmp.ne.s32.totalorder %s570_s24, %s2884_s19  ;;  %p2892_p13 = scmp.lt.s32.totalorder %s570_s24, %s570_s24 }
 0x158   : > { %p2893_p0 = scmp.lt.s32.totalorder %s2891_s21, %s2884_s19 }
 0x159   : > { %p2887_p11 = pnand %p2885_p10, %p3213_p8 }
 0x15a   : > { %p2894_p2 = por %p2893_p0, %p2892_p13 }
 0x15b   : > { %p2888_p12 = pneg %p2887_p11 }
 0x15d   : > { %p2895_p5 = pnand %p2894_p2, %p2888_p12 }
 0x15f   : > { %2898 = shalt.err (!%p2895_p5)
}
 0x160   : > { %s3821_s25 = sld [smem:[#allocation39_spill]]  ;;  %s3822_s3 = sld [smem:[#allocation38_spill]] }
 0x161   : > { %s3823_s29 = sld [smem:[#allocation37_spill]]  ;;  %s3824_s27 = sld [smem:[#allocation41_spill]] }
 0x162   : > { %2357 = dma.hbm_to_vmem [thread:$0]  (!%p3197_p6), %s3789_s14, 16, %s570_s24, [#allocation25]  }
 0x163   : > { %s2004_s15 = sadd.s32 4294967294, %s3039_s23   ;;  %s50_s20 = sadd.s32 1, %s3035_s22 }
 0x164   : > { %p52_p8 = scmp.ge.s32.totalorder %s50_s20, 2  ;;  %p65_p9 = scmp.eq.s32.totalorder %s3039_s23, 0 }
 0x165   : > { %s3826_s17 = sadd.s32 4294967295, %s3039_s23   ;;  %p396_p13 = scmp.eq.s32.totalorder %s2004_s15, 1 }
 0x166   : > { %s57_s16 = sadd.s32 1, %s3821_s25  ;;  %p64_p7 = scmp.ne.s32.totalorder %s3821_s25, %s3822_s3 }
 0x167   : > { %s3851_s20 = smov (%p52_p8, %s50_s20), 0  ;;  %p70_p1 = scmp.ne.s32.totalorder %s3822_s3, %s3823_s29 }
 0x168   : > { %p3492_p4 = por %p65_p9, %p64_p7  ;;  %s54_s24 = ssub.s32 %s3035_s22, %s3851_s20 }
 0x169   : > { %p390_p6 = scmp.eq.s32.totalorder %s3826_s17, 1  ;;  %p55_p3 = scmp.eq.s32.totalorder %s54_s24, 0 }
 0x16a   : > { %p3827_p10 = scmp.ne.s32.totalorder %s3824_s27, 0  ;;  %p3515_p0 = por %p396_p13, %p70_p1 }
 0x16b   : > { %p3508_p12 = por %p390_p6, %p64_p7  ;;  %p2380_p2 = scmp.lt.s32.totalorder %s3039_s23, 2 }
 0x16c   : > { %p3504_p11 = por %p3827_p10, %p70_p1  ;;  %s580_s21 = sand.u32 1, %s3821_s25  }
 0x16d   : > { %s3829_s0 = scalar_select %p3508_p12, 1, 0 }
 0x16e   : > { %s3513_s28 = scalar_select %p55_p3, %s3821_s25, %s57_s16  }
 0x16f   : > { %s3830_s19 = scalar_select %p3515_p0, 1, 0 }
 0x170   : > { %s2022_s1 = sshll.u32 %s3035_s22, 7  ;;  %s2021_s30 = sshll.u32 %s580_s21, 3 }
 0x171   : > { %s3831_s27 = sld [smem:[#allocation43_spill]]  ;;  %s584_s15 = scalar_lea.vmem [#allocation3], %s2021_s30 }
 0x172   : > { %s591_s16 = sshll.u32 %s584_s15, 4  ;;  %p3529_p5 = pnand %p2380_p2, %p3492_p4  ;;  %s3533_s16 = int_to_ptr.vmem [resolvable:$true] %s591_s16 }
 0x173   : > { %s581_s25 = scalar_lea.sflag [#allocation4], %s580_s21 }
 0x174   : > { %p2901_p7 = pneg %p3529_p5 }
 0x177   : > { %s3525_s24 = scalar_lea.hbm %s3831_s27, %s2022_s1  ;;  %s2904_s18 = scalar_lea.hbm %s3831_s27, 256 }
 0x178   : > { %s2899_s2 = scalar_lea.hbm %s3525_s24, 128  ;;  %p2905_p4 = scmp.lt.u32.totalorder %s3525_s24, %s3831_s27 }
 0x179   : > { %p2900_p8 = scmp.ne.s32.totalorder %s3525_s24, %s2899_s2  ;;  %p2906_p6 = scmp.lt.u32.totalorder %s2904_s18, %s2899_s2 }
 0x17a   : > { %p2908_p10 = scmp.lt.u32.totalorder %s2899_s2, %s3525_s24 }
 0x17b   : > { %p2902_p9 = pnand %p2901_p7, %p2900_p8  ;;  %p2907_p3 = por %p2906_p6, %p2905_p4 }
 0x17d   : > { %p2903_p1 = pneg %p2902_p9  ;;  %p2909_p13 = por %p2908_p10, %p2907_p3 }
 0x17f   : > { %p2910_p2 = pnand %p2909_p13, %p2903_p1 }
 0x181   : > { %2913 = shalt.err (!%p2910_p2)
}
 0x182   : > { %s2914_s21 = scalar_lea.vmem %s3533_s16, 128  ;;  %s3057_s15 = smov [#allocation3]  }
 0x183   : > { %p2915_p8 = scmp.ne.s32.totalorder %s3533_s16, %s2914_s21  ;;  %s2919_s1 = sshll.u32 %s3057_s15, 4  ;;  %s2920_s1 = int_to_ptr.vmem [resolvable:$false] %s2919_s1 }
 0x184   : > { %s2921_s30 = scalar_lea.vmem %s2920_s1, 256  ;;  %p2922_p12 = scmp.lt.s32.totalorder %s3533_s16, %s2920_s1 }
 0x185   : > { %p2917_p9 = pnand %p2915_p8, %p2901_p7  ;;  %p2923_p4 = scmp.lt.s32.totalorder %s2921_s30, %s2914_s21 }
 0x187   : > { %p2918_p0 = pneg %p2917_p9  ;;  %p2924_p6 = por %p2923_p4, %p2922_p12 }
 0x189   : > { %p2925_p3 = pnand %p2924_p6, %p2918_p0 }
 0x18b   : > { %2928 = shalt.err (!%p2925_p3)
}
 0x18c   : > { %2361 = dma.hbm_to_vmem [thread:$0]  (!%p3529_p5), %s3525_s24, 128, %s3533_s16, %s581_s25  }
 0x18d   : > { %s3833_s2 = sld [smem:[#allocation42_spill]] }
 0x193   : > { %p3834_p1 = scmp.ne.s32.totalorder %s3833_s2, 0 }
 0x194   : > { %s3835_s18 = sld [smem:[#allocation38_spill]] (!%p3834_p1) }
 0x195   : > { %600 = sbr.rel (%p3834_p1) target bundleno = 3316 (0xcf4), region = 80 }
 0x19a   : > { %s3563_s3 = sand.u32 (!%p3834_p1), 1, %s3835_s18  }
 0x19b   : > { %s2024_s29 = sshll.u32 (!%p3834_p1), %s3563_s3, 3  ;;  %s603_s21 = scalar_lea.sflag (!%p3834_p1), [#allocation4], %s3563_s3 }
 0x19c   : > { %s606_s15 = scalar_lea.vmem [#allocation3], %s2024_s29 }
 0x19d   : > { %2982 = dma.done.wait (%p3504_p11), %s603_s21, 128  }
 0x19e   : > { %2984 = vsyncadd (%p3504_p11), %s603_s21, 4294967168  ;;  %s3836_s24 = sld [smem:[#allocation41_spill]] }
 0x1a4   : > { %p3837_p12 = scmp.ne.s32.totalorder %s3836_s24, 0 }
 0x1a6   : > { %2986 = dma.done.wait (%p3837_p12), [#allocation7], 32  }
 0x1a7   : > { %2988 = vsyncadd (%p3837_p12), [#allocation7], 4294967264 }
 0x1a8   : > { %2990 = dma.done.wait (%p3837_p12), [#allocation10], 272  }
 0x1a9   : > { %2992 = vsyncadd (%p3837_p12), [#allocation10], 4294967024 }
 0x1aa   : > { %2994 = dma.done.wait (%p3837_p12), [#allocation13], 272  }
 0x1ab   : > { %2996 = vsyncadd (%p3837_p12), [#allocation13], 4294967024 }
 0x1ac   : > { %2998 = dma.done.wait (%p3837_p12), [#allocation16], 272  }
 0x1ad   : > { %3000 = vsyncadd (%p3837_p12), [#allocation16], 4294967024 }
 0x1ae   : > { %3002 = dma.done.wait (%p3837_p12), [#allocation19], 32  }
 0x1af   : > { %3004 = vsyncadd (%p3837_p12), [#allocation19], 4294967264 }
 0x1b0   : > { %3006 = dma.done.wait (%p3837_p12), [#allocation22], 272  }
 0x1b1   : > { %3008 = vsyncadd (%p3837_p12), [#allocation22], 4294967024 }
 0x1b2   : > { %3010 = dma.done.wait (%p3837_p12), [#allocation25], 1040  }
 0x1b3   : > { %3012 = vsyncadd (%p3837_p12), [#allocation25], 4294966256  ;;  %vm717_vm0 = vcmask 261120   ;;  %v3601_v0 = vld [vmem:[%s606_s15] sm:$0xff]  ;;  %v3058_v13 = vmov 0.0   ;;  %vm3059_vm1 = vmmov 0  }
 0x1b4   : > { %v718_v1 = vsel %vm717_vm0, %v3601_v0, 0.0  ;;  %v2470_v12 = vld [vmem:[#allocation12] sm:$0xff]   ;;  %2126 = vmatprep.subr.bf16.mxu0 %v3058_v13  ;;  %2148 = vmatprep.subr.bf16.mxu1 %v3058_v13  ;;  %v2471_v14 = vld [vmem:[#allocation12 + $0x8] sm:$0xff]   ;;  %v2473_v32 = vld [vmem:[#allocation9 + $0x8] sm:$0xff]   ;;  %vm814_vm2 = vcmask 519168   ;;  %vm925_vm3 = vcmask 64512  }
 0x1b5   : > { %719 = vadd.xlane.f32.xlu0 %v718_v1  ;;  %2127 = vmatpush3.bf16.msra.mxu0 %v2470_v12  ;;  %v2040_v22 = vld [vmem:[#allocation6] ss:$0 sm:$0xff]  ;;  %v2041_v24 = vld [vmem:[#allocation8] ss:$0 sm:$0xff]  ;;  %v2472_v29 = vld [vmem:[#allocation9] sm:$0xff]   ;;  %s3060_s26 = smov 96  }
 0x1b6   : > { %2128 = vmatprep.subr.bf16.mxu0 %v3058_v13  ;;  %2130 = vmatprep.mubr.msk.bf16.mxu0 %vm3059_vm1, %v3058_v13  ;;  %v2042_v35 = vld [vmem:[#allocation14] ss:$0 sm:$0xff]  ;;  %v2048_v44 = vld [vmem:[#allocation11] ss:$0 sm:$0xff]  ;;  %s3061_s16 = smov 120   ;;  %s3062_s17 = smov 112  }
 0x1b7   : > { %2150 = vmatprep.mubr.msk.bf16.mxu1 %vm3059_vm1, %v3058_v13  ;;  %s3063_s25 = smov 80   ;;  %s3064_s1 = smov 104   ;;  %vm990_vm4 = vcmask 1043456  }
 0x1b8   : > { %s3065_s30 = smov 88   ;;  %s3066_s2 = smov 72  }
 0x1b9   : > { %821 = vadd.xlane.f32.xlu0 %v718_v1  ;;  %2129 = vmatpush3.bf16.msra.mxu0 %v2471_v14  ;;  %s3838_s18 = sld [smem:[#allocation40_spill]]  ;;  %s708_s15 = scalar_lea.vmem [#allocation27], %s2024_s29 }
 0x1ba   : > { %2134 = vmatprep.subr.bf16.mxu0 %v3058_v13  ;;  %s1791_s24 = sshll.u32 %s708_s15, 4  ;;  %s1777_s29 = scalar_lea.sflag [#allocation5], %s3563_s3  ;;  %s3727_s24 = int_to_ptr.vmem [resolvable:$true] %s1791_s24 }
 0x1bb   : > { %p3840_p0 = scmp.ne.s32.totalorder %s3829_s0, 0 }
 0x1bf   : > { %s2081_s21 = sshll.u32 %s3838_s18, 7 }
 0x242   : > { %v720_v2 = vpop.xlane.xlu0 %719 }
 0x243   : > { %v722_v3 = vmul.f32 0.03125, %v720_v2 }
 0x245   : > { %v723_v4 = vsub.f32 %v3601_v0, %v722_v3 }
 0x246   : > { %v822_v5 = vpop.xlane.xlu0 %821 }
 0x247   : > { %v824_v6 = vmul.f32 0.03125, %v822_v5  ;;  %v724_v7 = vmul.f32 %v723_v4, %v723_v4 }
 0x249   : > { %v825_v8 = vsub.f32 %v3601_v0, %v824_v6  ;;  %v725_v9 = vsel %vm717_vm0, %v724_v7, 0.0 }
 0x24a   : > { %726 = vadd.xlane.f32.xlu1 %v725_v9 }
 0x24b   : > { %v826_v10 = vmul.f32 %v825_v8, %v825_v8 }
 0x24d   : > { %v827_v11 = vsel %vm717_vm0, %v826_v10, 0.0  ;;  %v1037_v10 = vld [vmem:[#allocation15] sm:$0xf] }
 0x24e   : > { %828 = vadd.xlane.f32.xlu1 %v827_v11  ;;  %v1042_v11 = vsel %vm990_vm4, %v1037_v10, 0 }
 0x2d7   : > { %v727_v15 = vpop.xlane.xlu1 %726 }
 0x2d8   : > { %v728_v16 = vmul.f32 0.03125, %v727_v15 }
 0x2da   : > { %v729_v17 = vadd.f32 1e-05, %v728_v16 }
 0x2db   : > { %v829_v18 = vpop.xlane.xlu1 %828 }
 0x2dc   : > { %2485 = vrsqrt.f32 %v729_v17  ;;  %v830_v19 = vmul.f32 0.03125, %v829_v18 }
 0x2de   : > { %v831_v20 = vadd.f32 1e-05, %v830_v19 }
 0x2e0   : > { %2487 = vrsqrt.f32 %v831_v20 }
 0x2e6   : > { %v2486_v21 = vpop.eup %2485 }
 0x2e7   : > { %v731_v23 = vmul.f32 %v2486_v21, %v723_v4 }
 0x2e9   : > { %v738_v25 = vmul.f32 %v2040_v22, %v731_v23 }
 0x2ea   : > { %v2488_v26 = vpop.eup %2487 }
 0x2eb   : > { %v833_v27 = vmul.f32 %v2488_v26, %v825_v8  ;;  %v745_v28 = vadd.f32 %v2041_v24, %v738_v25 }
 0x2ed   : > { %v746_v30 = vpack.c.bf16 %v745_v28, %v745_v28  ;;  %v840_v31 = vmul.f32 %v2040_v22, %v833_v27 }
 0x2ef   : > { %2131 = vmatmul.mubr.msk.bf16.vlgmr.msra.gmra.mrb[0].mxu0 %vm717_vm0, %v746_v30  ;;  %v847_v33 = vadd.f32 %v2041_v24, %v840_v31 }
 0x2f0   : > { %2135 = vmatpush3.bf16.msra.mxu0 %v2472_v29  ;;  %2138 = vmatprep.mubr.msk.bf16.mxu0 %vm3059_vm1, %v3058_v13 }
 0x2f1   : > { %2136 = vmatprep.subr.bf16.mxu0 %v3058_v13  ;;  %v848_v34 = vpack.c.bf16 %v847_v33, %v847_v33 }
 0x2f4   : > { %2137 = vmatpush3.bf16.msra.mxu0 %v2473_v32 }
 0x2f5   : > { %2142 = vmatprep.subr.bf16.mxu0 %v3058_v13 }
 0x2f7   : > { %2139 = vmatmul.mubr.msk.bf16.vlgmr.msra.gmra.mrb[4].mxu0 %vm717_vm0, %v848_v34 }
 0x2f8   : > { %2144 = vmatprep.mubr.msk.bf16.mxu0 %vm3059_vm1, %v3058_v13 }
 0x3c2   : > { %v807_v36 = vpop.f32.mrb[0].mxu0 }
 0x3c3   : > { %v808_v37 = vadd.f32 %v2042_v35, %v807_v36  ;;  %v2132_v38 = vpop.f32.mrb[1].mxu0 }
 0x3c4   : > { %v810_v39 = vpop.f32.mrb[2].mxu0 }
 0x3c5   : > { %v813_v40 = vpack.c.bf16 %v808_v37, %v808_v37  ;;  %v2133_v41 = vpop.f32.mrb[3].mxu0 }
 0x3c7   : > { %815 = vst.msk [vmem:[#allocation2] sm:$0xf] %vm814_vm2, %v813_v40 }
 0x3ca   : > { %v909_v42 = vpop.f32.mrb[4].mxu0 }
 0x3cb   : > { %v2140_v43 = vpop.f32.mrb[5].mxu0  ;;  %v910_v48 = vadd.f32 %v2048_v44, %v909_v42 }
 0x3cc   : > { %v912_v45 = vpop.f32.mrb[6].mxu0 }
 0x3cd   : > { %v2141_v46 = vpop.f32.mrb[7].mxu0  ;;  %v915_v51 = vpack.c.bf16 %v910_v48, %v910_v48  ;;  %v1197_v48 = vld [vmem:[#allocation15 + $0x4] sm:$0xf] }
 0x3ce   : > { %v924_v47 = vld [vmem:[#allocation2] sm:$0xf] }
 0x3cf   : > { %v930_v49 = vsel %vm925_vm3, %v924_v47, 0  ;;  %v3626_v50 = vcombine.low %v924_v47, %v924_v47 }
 0x3d0   : > { %2143 = vmatpush3.bf16.xpose.msra.mxu0 %v930_v49  ;;  %v1202_v49 = vsel %vm990_vm4, %v1197_v48, 0 }
 0x3d1   : > { %985 = vrot.lane.b32.xlu1 %v3626_v50, %s3060_s26  ;;  %2154 = vmatprep.subr.bf16.mxu0 %v3058_v13 }
 0x3d5   : > { %1086 = vrot.lane.b32.xlu1 %v915_v51, %s3061_s16 }
 0x3d7   : > { %2145 = vmatmul.mubr.msk.bf16.vlgmr.msra.gmra.mrb[8].mxu0 %vm925_vm3, %v915_v51 }
 0x3d8   : > { %2156 = vmatprep.mubr.msk.bf16.mxu0 %vm3059_vm1, %v3058_v13  ;;  %2155 = vmatpush3.bf16.msra.mxu0 %v1042_v11 }
 0x3d9   : > { %1247 = vrot.lane.b32.xlu1 %v3626_v50, %s3062_s17  ;;  %2166 = vmatprep.subr.bf16.mxu0 %v3058_v13 }
 0x3dd   : > { %1245 = vrot.lane.b32.xlu1 %v915_v51, %s3062_s17  ;;  %s3839_s17 = sld [smem:[#allocation47_spill]] }
 0x3e1   : > { %1305 = vrot.lane.b32.xlu1 %v3626_v50, %s3063_s25 }
 0x3e3   : > { %s3725_s25 = scalar_lea.hbm %s3839_s17, %s2081_s21 }
 0x3e5   : > { %1406 = vrot.lane.b32.xlu1 %v3626_v50, %s3064_s1 }
 0x3e9   : > { %1404 = vrot.lane.b32.xlu1 %v915_v51, %s3064_s1  ;;  %s2929_s1 = scalar_lea.vmem %s3727_s24, 128 }
 0x3ea   : > { %p2930_p11 = scmp.ne.s32.totalorder %s3727_s24, %s2929_s1 }
 0x3ec   : > { %p2931_p5 = pnand %p2930_p11, %p3840_p0 }
 0x3ee   : > { %p2932_p7 = pneg %p2931_p5 }
 0x443   : > { %v986_v52 = vpop.permute.xlu1 %985 }
 0x444   : > { %v992_v53 = vsel %vm990_vm4, %v986_v52, 0 }
 0x445   : > { %2149 = vmatpush3.bf16.msra.mxu1 %v992_v53 }
 0x446   : > { %2160 = vmatprep.subr.bf16.mxu1 %v3058_v13 }
 0x447   : > { %v1087_v62 = vpop.permute.xlu1 %1086 }
 0x44b   : > { %v1248_v5 = vpop.permute.xlu1 %1247 }
 0x44c   : > { %v1253_v7 = vsel %vm925_vm3, %v1248_v5, 0 }
 0x44f   : > { %v1246_v6 = vpop.permute.xlu1 %1245 }
 0x453   : > { %v1306_v8 = vpop.permute.xlu1 %1305 }
 0x454   : > { %v1311_v9 = vsel %vm990_vm4, %v1306_v8, 0 }
 0x457   : > { %v1407_v12 = vpop.permute.xlu1 %1406 }
 0x458   : > { %v1412_v43 = vsel %vm925_vm3, %v1407_v12, 0 }
 0x45b   : > { %v1405_v14 = vpop.permute.xlu1 %1404 }
 0x4aa   : > { %v966_v54 = vpop.f32.mrb[8].mxu0 }
 0x4ab   : > { %v2146_v55 = vpop.f32.mrb[9].mxu0  ;;  %v972_v56 = vsel %vm925_vm3, %v966_v54, -inf }
 0x4ac   : > { %973 = vmax.xlane.f32.xlu0 %v972_v56  ;;  %v969_v57 = vpop.f32.mrb[10].mxu0 }
 0x4ad   : > { %v2147_v58 = vpop.f32.mrb[11].mxu0 }
 0x4c2   : > { %1088 = vrot.lane.b32.xlu0 %v3626_v50, %s3061_s16 }
 0x539   : > { %v974_v59 = vpop.xlane.xlu0 %973 }
 0x53a   : > { %v975_v60 = vsub.f32 %v966_v54, %v974_v59  ;;  %v1356_v59 = vld [vmem:[#allocation15 + $0x8] sm:$0xf] }
 0x53c   : > { %v976_v61 = vmul.f32 1.442695, %v975_v60 }
 0x53d   : > { %v1089_v1 = vpop.permute.xlu0 %1088 }
 0x53e   : > { %2489 = vpow2.f32 %v976_v61  ;;  %v1094_v4 = vsel %vm925_vm3, %v1089_v1, 0  ;;  %v1361_v1 = vsel %vm990_vm4, %v1356_v59, 0  ;;  %v2482_v59 = vld [vmem:[#allocation24 + $0x28] sm:$0xff]  }
 0x548   : > { %v2490_v63 = vpop.eup %2489 }
 0x549   : > { %v978_v2 = vsel %vm925_vm3, %v2490_v63, 0.0  ;;  %v981_v3 = vpack.c.bf16 %v2490_v63, %v2490_v63 }
 0x54a   : > { %979 = vadd.xlane.f32.xlu1 %v978_v2 }
 0x54b   : > { %2151 = vmatmul.mubr.msk.bf16.vlgmr.msra.gmra.mrb[0].mxu1 %vm925_vm3, %v981_v3 }
 0x54c   : > { %2161 = vmatpush3.bf16.xpose.msra.mxu1 %v1094_v4  ;;  %2162 = vmatprep.mubr.msk.bf16.mxu1 %vm3059_vm1, %v3058_v13 }
 0x54d   : > { %2178 = vmatprep.subr.bf16.mxu1 %v3058_v13 }
 0x553   : > { %2163 = vmatmul.mubr.msk.bf16.vlgmr.msra.gmra.mrb[4].mxu1 %vm925_vm3, %v1087_v62 }
 0x554   : > { %2179 = vmatpush3.bf16.xpose.msra.mxu1 %v1253_v7  ;;  %2180 = vmatprep.mubr.msk.bf16.mxu1 %vm3059_vm1, %v3058_v13 }
 0x555   : > { %2184 = vmatprep.subr.bf16.mxu1 %v3058_v13 }
 0x55b   : > { %2181 = vmatmul.mubr.msk.bf16.vlgmr.msra.gmra.mrb[8].mxu1 %vm925_vm3, %v1246_v6 }
 0x55c   : > { %2185 = vmatpush3.bf16.msra.mxu1 %v1311_v9  ;;  %2186 = vmatprep.mubr.msk.bf16.mxu1 %vm3059_vm1, %v3058_v13 }
 0x55d   : > { %2196 = vmatprep.subr.bf16.mxu1 %v3058_v13 }
 0x5d7   : > { %v980_v15 = vpop.xlane.xlu1 %979 }
 0x5d8   : > { %2491 = vrcp.f32 %v980_v15 }
 0x5e2   : > { %v2492_v16 = vpop.eup %2491 }
 0x61e   : > { %v1028_v17 = vpop.f32.mrb[0].mxu1 }
 0x61f   : > { %v1035_v18 = vmul.f32 %v2492_v16, %v1028_v17  ;;  %v2152_v19 = vpop.f32.mrb[1].mxu1 }
 0x620   : > { %v1031_v20 = vpop.f32.mrb[2].mxu1  ;;  %v1515_v19 = vld [vmem:[#allocation15 + $0xc] sm:$0xf] }
 0x621   : > { %v1036_v21 = vpack.c.bf16 %v1035_v18, %v1035_v18  ;;  %v2153_v22 = vpop.f32.mrb[3].mxu1  ;;  %v1520_v20 = vsel %vm990_vm4, %v1515_v19, 0 }
 0x623   : > { %2157 = vmatmul.mubr.msk.bf16.vlgmr.msra.gmra.mrb[12].mxu0 %vm925_vm3, %v1036_v21 }
 0x624   : > { %2168 = vmatprep.mubr.msk.bf16.mxu0 %vm3059_vm1, %v3058_v13 }
 0x626   : > { %v1130_v23 = vpop.f32.mrb[4].mxu1 }
 0x627   : > { %v2164_v24 = vpop.f32.mrb[5].mxu1  ;;  %v1136_v32 = vsel %vm925_vm3, %v1130_v23, -inf }
 0x628   : > { %v1133_v25 = vpop.f32.mrb[6].mxu1 }
 0x629   : > { %v2165_v26 = vpop.f32.mrb[7].mxu1 }
 0x62e   : > { %v1289_v27 = vpop.f32.mrb[8].mxu1 }
 0x62f   : > { %v2182_v28 = vpop.f32.mrb[9].mxu1  ;;  %v1295_v29 = vsel %vm925_vm3, %v1289_v27, -inf }
 0x630   : > { %1296 = vmax.xlane.f32.xlu0 %v1295_v29  ;;  %v1292_v30 = vpop.f32.mrb[10].mxu1  ;;  %v2052_v29 = vld [vmem:[#allocation17] ss:$0 sm:$0xff] }
 0x631   : > { %v2183_v31 = vpop.f32.mrb[11].mxu1  ;;  %v923_v30 = vadd.f32 %v2052_v29, %v3601_v0  ;;  %v2476_v0 = vld [vmem:[#allocation21 + $0x8] sm:$0xff]  }
 0x634   : > { %1137 = vmax.xlane.f32.xlu0 %v1136_v32 }
 0x64a   : > { %1146 = vrot.lane.b32.xlu0 %v3626_v50, %s3065_s30  ;;  %s3068_s30 = smov [#allocation27]  }
 0x6bd   : > { %v1297_v33 = vpop.xlane.xlu0 %1296 }
 0x6be   : > { %v1298_v34 = vsub.f32 %v1289_v27, %v1297_v33 }
 0x6c0   : > { %v1299_v35 = vmul.f32 1.442695, %v1298_v34 }
 0x6c1   : > { %v1138_v36 = vpop.xlane.xlu0 %1137 }
 0x6c2   : > { %2493 = vpow2.f32 %v1299_v35  ;;  %v1139_v37 = vsub.f32 %v1130_v23, %v1138_v36 }
 0x6c4   : > { %v1140_v38 = vmul.f32 1.442695, %v1139_v37 }
 0x6c5   : > { %v1147_v39 = vpop.permute.xlu0 %1146 }
 0x6c6   : > { %2495 = vpow2.f32 %v1140_v38  ;;  %v1152_v40 = vsel %vm990_vm4, %v1147_v39, 0 }
 0x6c7   : > { %2167 = vmatpush3.bf16.msra.mxu0 %v1152_v40 }
 0x6c8   : > { %2172 = vmatprep.subr.bf16.mxu0 %v3058_v13 }
 0x6cc   : > { %v2494_v41 = vpop.eup %2493 }
 0x6cd   : > { %v1304_v42 = vpack.c.bf16 %v2494_v41, %v2494_v41  ;;  %v1301_v47 = vsel %vm925_vm3, %v2494_v41, 0.0 }
 0x6cf   : > { %2187 = vmatmul.mubr.msk.bf16.vlgmr.msra.gmra.mrb[12].mxu1 %vm925_vm3, %v1304_v42  ;;  %v2475_v42 = vld [vmem:[#allocation21] sm:$0xff]  }
 0x6d0   : > { %v2496_v44 = vpop.eup %2495  ;;  %2197 = vmatpush3.bf16.xpose.msra.mxu1 %v1412_v43  ;;  %2198 = vmatprep.mubr.msk.bf16.mxu1 %vm3059_vm1, %v3058_v13 }
 0x6d1   : > { %v1142_v45 = vsel %vm925_vm3, %v2496_v44, 0.0  ;;  %v1145_v46 = vpack.c.bf16 %v2496_v44, %v2496_v44  ;;  %2214 = vmatprep.subr.bf16.mxu1 %v3058_v13 }
 0x6d2   : > { %1143 = vadd.xlane.f32.xlu1 %v1142_v45 }
 0x6d3   : > { %2169 = vmatmul.mubr.msk.bf16.vlgmr.msra.gmra.mrb[16].mxu0 %vm925_vm3, %v1145_v46 }
 0x6d4   : > { %2174 = vmatprep.mubr.msk.bf16.mxu0 %vm3059_vm1, %v3058_v13  ;;  %2173 = vmatpush3.bf16.msra.mxu0 %v1202_v49  ;;  %v2067_v49 = vld [vmem:[#allocation20] ss:$0 sm:$0xff] }
 0x6d5   : > { %2190 = vmatprep.subr.bf16.mxu0 %v3058_v13 }
 0x6d6   : > { %1302 = vadd.xlane.f32.xlu1 %v1301_v47  ;;  %v2066_v47 = vld [vmem:[#allocation18] ss:$0 sm:$0xff] }
 0x6d7   : > { %2199 = vmatmul.mubr.msk.bf16.vlgmr.msra.gmra.mrb[16].mxu1 %vm925_vm3, %v1405_v14 }
 0x6d8   : > { %2218 = vmatprep.mubr.msk.bf16.mxu1 %vm3059_vm1, %v3058_v13  ;;  %2215 = vmatpush3.bf16.msra.mxu1 %v2475_v42 }
 0x6d9   : > { %2216 = vmatprep.subr.bf16.mxu1 %v3058_v13 }
 0x6dc   : > { %2217 = vmatpush3.bf16.msra.mxu1 %v2476_v0 }
 0x6dd   : > { %2222 = vmatprep.subr.bf16.mxu1 %v3058_v13 }
 0x6e7   : > { %1464 = vrot.lane.b32.xlu1 %v3626_v50, %s3066_s2  ;;  %s2933_s2 = sshll.u32 %s3068_s30, 4  ;;  %s2934_s2 = int_to_ptr.vmem [resolvable:$false] %s2933_s2 }
 0x6e8   : > { %s2935_s18 = scalar_lea.vmem %s2934_s2, 256  ;;  %p2936_p10 = scmp.lt.s32.totalorder %s3727_s24, %s2934_s2 }
 0x6e9   : > { %p2937_p13 = scmp.lt.s32.totalorder %s2935_s18, %s2929_s1 }
 0x6eb   : > { %p2938_p2 = por %p2937_p13, %p2936_p10 }
 0x6ed   : > { %p2939_p8 = pnand %p2938_p2, %p2932_p7 }
 0x75f   : > { %v1144_v51 = vpop.xlane.xlu1 %1143 }
 0x760   : > { %2497 = vrcp.f32 %v1144_v51 }
 0x763   : > { %v1303_v53 = vpop.xlane.xlu1 %1302 }
 0x764   : > { %2499 = vrcp.f32 %v1303_v53  ;;  %v2477_v53 = vld [vmem:[#allocation24] sm:$0xff]  }
 0x767   : > { %v1465_v9 = vpop.permute.xlu1 %1464 }
 0x768   : > { %v1470_v11 = vsel %vm990_vm4, %v1465_v9, 0 }
 0x76a   : > { %v2498_v57 = vpop.eup %2497 }
 0x76e   : > { %v2500_v7 = vpop.eup %2499 }
 0x7a2   : > { %v1347_v52 = vpop.f32.mrb[12].mxu1 }
 0x7a3   : > { %v2188_v54 = vpop.f32.mrb[13].mxu1  ;;  %v1354_v8 = vmul.f32 %v2500_v7, %v1347_v52 }
 0x7a4   : > { %v1350_v55 = vpop.f32.mrb[14].mxu1 }
 0x7a5   : > { %v2189_v56 = vpop.f32.mrb[15].mxu1  ;;  %v1355_v10 = vpack.c.bf16 %v1354_v8, %v1354_v8  ;;  %v2478_v55 = vld [vmem:[#allocation24 + $0x8] sm:$0xff]  }
 0x7a6   : > { %v1188_v58 = vpop.f32.mrb[16].mxu0  ;;  %v2479_v56 = vld [vmem:[#allocation24 + $0x10] sm:$0xff]  }
 0x7a7   : > { %v1195_v60 = vmul.f32 %v2498_v57, %v1188_v58  ;;  %v2170_v61 = vpop.f32.mrb[17].mxu0  ;;  %v2480_v57 = vld [vmem:[#allocation24 + $0x18] sm:$0xff]   ;;  %v2481_v58 = vld [vmem:[#allocation24 + $0x20] sm:$0xff]  }
 0x7a8   : > { %v1191_v50 = vpop.f32.mrb[18].mxu0  ;;  %v2484_v61 = vld [vmem:[#allocation24 + $0x38] sm:$0xff]  }
 0x7a9   : > { %v1196_v62 = vpack.c.bf16 %v1195_v60, %v1195_v60  ;;  %v2171_v63 = vpop.f32.mrb[19].mxu0  ;;  %v2483_v60 = vld [vmem:[#allocation24 + $0x30] sm:$0xff]   ;;  %v1657_v50 = vlaneseq }
 0x7aa   : > { %v1448_v2 = vpop.f32.mrb[16].mxu1  ;;  %v1653_v63 = vld [vmem:[#allocation23] sm:$0x1] }
 0x7ab   : > { %2175 = vmatmul.mubr.msk.bf16.vlgmr.msra.gmra.mrb[12].mxu0 %vm925_vm3, %v1196_v62  ;;  %v2200_v3 = vpop.f32.mrb[17].mxu1  ;;  %v1454_v4 = vsel %vm925_vm3, %v1448_v2, -inf  ;;  %v1658_v62 = vshrl.u32 %v1657_v50, 7 }
 0x7ac   : > { %1455 = vmax.xlane.f32.xlu0 %v1454_v4  ;;  %v1451_v5 = vpop.f32.mrb[18].mxu1  ;;  %2191 = vmatpush3.bf16.msra.mxu0 %v1361_v1  ;;  %v1655_v1 = vpack.i.b16 %v1653_v63, %v1653_v63 }
 0x7ad   : > { %v2201_v6 = vpop.f32.mrb[19].mxu1  ;;  %2192 = vmatprep.mubr.msk.bf16.mxu0 %vm3059_vm1, %v3058_v13  ;;  %2202 = vmatprep.subr.bf16.mxu0 %v3058_v13 }
 0x7b7   : > { %2193 = vmatmul.mubr.msk.bf16.vlgmr.msra.gmra.mrb[12].mxu0 %vm925_vm3, %v1355_v10  ;;  %v3067_v10 = vmov 0  }
 0x7b8   : > { %2203 = vmatpush3.bf16.msra.mxu0 %v1470_v11  ;;  %2204 = vmatprep.mubr.msk.bf16.mxu0 %vm3059_vm1, %v3058_v13 }
 0x7b9   : > { %2208 = vmatprep.subr.bf16.mxu0 %v3058_v13 }
 0x839   : > { %v1456_v12 = vpop.xlane.xlu0 %1455 }
 0x83a   : > { %v1457_v14 = vsub.f32 %v1448_v2, %v1456_v12  ;;  %v1659_v2 = vsub.s32 0, %v1658_v62 }
 0x83c   : > { %v1458_v15 = vmul.f32 1.442695, %v1457_v14  ;;  %v1660_v3 = vrot.slane %v1655_v1, %v1659_v2 }
 0x83e   : > { %2501 = vpow2.f32 %v1458_v15 }
 0x848   : > { %v2502_v16 = vpop.eup %2501 }
 0x849   : > { %v1460_v17 = vsel %vm925_vm3, %v2502_v16, 0.0  ;;  %v1463_v18 = vpack.c.bf16 %v2502_v16, %v2502_v16 }
 0x84a   : > { %1461 = vadd.xlane.f32.xlu1 %v1460_v17 }
 0x84b   : > { %2205 = vmatmul.mubr.msk.bf16.vlgmr.msra.gmra.mrb[20].mxu0 %vm925_vm3, %v1463_v18 }
 0x84c   : > { %2210 = vmatprep.mubr.msk.bf16.mxu0 %vm3059_vm1, %v3058_v13  ;;  %2209 = vmatpush3.bf16.msra.mxu0 %v1520_v20 }
 0x8d7   : > { %v1462_v21 = vpop.xlane.xlu1 %1461 }
 0x8d8   : > { %2503 = vrcp.f32 %v1462_v21 }
 0x8e2   : > { %v2504_v22 = vpop.eup %2503 }
 0x91e   : > { %v1506_v23 = vpop.f32.mrb[20].mxu0 }
 0x91f   : > { %v1513_v24 = vmul.f32 %v2504_v22, %v1506_v23  ;;  %v2206_v25 = vpop.f32.mrb[21].mxu0 }
 0x920   : > { %v1509_v26 = vpop.f32.mrb[22].mxu0 }
 0x921   : > { %v1514_v27 = vpack.c.bf16 %v1513_v24, %v1513_v24  ;;  %v2207_v28 = vpop.f32.mrb[23].mxu0 }
 0x923   : > { %2211 = vmatmul.mubr.msk.bf16.vlgmr.msra.gmra.mrb[12].mxu0 %vm925_vm3, %v1514_v27 }
 0x9f6   : > { %v1556_v31 = vpop.f32.mrb[12].mxu0 }
 0x9f7   : > { %v3700_v32 = vadd.f32 %v1556_v31, %v923_v30  ;;  %v2212_v33 = vpop.f32.mrb[13].mxu0 }
 0x9f8   : > { %v1559_v34 = vpop.f32.mrb[14].mxu0 }
 0x9f9   : > { %v2213_v35 = vpop.f32.mrb[15].mxu0  ;;  %v1565_v36 = vsel %vm717_vm0, %v3700_v32, 0.0 }
 0x9fa   : > { %1566 = vadd.xlane.f32.xlu0 %v1565_v36 }
 0xa87   : > { %v1567_v37 = vpop.xlane.xlu0 %1566 }
 0xa88   : > { %v1568_v38 = vmul.f32 0.03125, %v1567_v37 }
 0xa8a   : > { %v1569_v39 = vsub.f32 %v3700_v32, %v1568_v38 }
 0xa8c   : > { %v1570_v40 = vmul.f32 %v1569_v39, %v1569_v39 }
 0xa8e   : > { %v1571_v41 = vsel %vm717_vm0, %v1570_v40, 0.0 }
 0xa8f   : > { %1572 = vadd.xlane.f32.xlu0 %v1571_v41 }
 0xb1c   : > { %v1573_v43 = vpop.xlane.xlu0 %1572 }
 0xb1d   : > { %v1574_v44 = vmul.f32 0.03125, %v1573_v43 }
 0xb1f   : > { %v1575_v45 = vadd.f32 1e-05, %v1574_v44 }
 0xb21   : > { %2505 = vrsqrt.f32 %v1575_v45 }
 0xb2b   : > { %v2506_v46 = vpop.eup %2505 }
 0xb2c   : > { %v1577_v48 = vmul.f32 %v2506_v46, %v1569_v39 }
 0xb2e   : > { %v1584_v51 = vmul.f32 %v2066_v47, %v1577_v48 }
 0xb30   : > { %v1591_v52 = vadd.f32 %v2067_v49, %v1584_v51 }
 0xb32   : > { %v1592_v54 = vpack.c.bf16 %v1591_v52, %v1591_v52 }
 0xb34   : > { %2219 = vmatmul.mubr.msk.bf16.vlgmr.msra.gmra.mrb[20].mxu1 %vm717_vm0, %v1592_v54 }
 0xb35   : > { %2223 = vmatpush3.bf16.msra.mxu1 %v2477_v53  ;;  %2238 = vmatprep.mubr.msk.bf16.mxu1 %vm3059_vm1, %v3058_v13 }
 0xb36   : > { %2224 = vmatprep.subr.bf16.mxu1 %v3058_v13 }
 0xb39   : > { %2225 = vmatpush3.bf16.msra.mxu1 %v2478_v55 }
 0xb3a   : > { %2226 = vmatprep.subr.bf16.mxu1 %v3058_v13 }
 0xb3d   : > { %2227 = vmatpush3.bf16.msra.mxu1 %v2479_v56 }
 0xb3e   : > { %2228 = vmatprep.subr.bf16.mxu1 %v3058_v13 }
 0xb41   : > { %2229 = vmatpush3.bf16.msra.mxu1 %v2480_v57 }
 0xb42   : > { %2230 = vmatprep.subr.bf16.mxu1 %v3058_v13 }
 0xb45   : > { %2231 = vmatpush3.bf16.msra.mxu1 %v2481_v58 }
 0xb46   : > { %2232 = vmatprep.subr.bf16.mxu1 %v3058_v13 }
 0xb49   : > { %2233 = vmatpush3.bf16.msra.mxu1 %v2482_v59 }
 0xb4a   : > { %2234 = vmatprep.subr.bf16.mxu1 %v3058_v13 }
 0xb4d   : > { %2235 = vmatpush3.bf16.msra.mxu1 %v2483_v60 }
 0xb4e   : > { %2236 = vmatprep.subr.bf16.mxu1 %v3058_v13  ;;  %v2071_v13 = vld [vmem:[#allocation26] ss:$0 sm:$0xff] }
 0xb51   : > { %2237 = vmatpush3.bf16.msra.mxu1 %v2484_v61 }
 0xc07   : > { %v1646_v4 = vpop.f32.mrb[20].mxu1 }
 0xc08   : > { %v1652_v5 = vpack.c.bf16 %v1646_v4, %v1646_v4  ;;  %v2220_v6 = vpop.f32.mrb[21].mxu1 }
 0xc09   : > { %v1649_v7 = vpop.f32.mrb[22].mxu1 }
 0xc0a   : > { %v1661_v8 = vadd.bf16 %v1660_v3, %v1652_v5  ;;  %v2221_v9 = vpop.f32.mrb[23].mxu1 }
 0xc0c   : > { %v1662_v11 = vmax.bf16 %v3067_v10, %v1661_v8 }
 0xc0e   : > { %2239 = vmatmul.mubr.bf16.vlgmr.msra.gmra.mrb[24].mxu1 %v1662_v11 }
 0xce1   : > { %v1768_v12 = vpop.f32.mrb[24].mxu1 }
 0xce2   : > { %v1769_v14 = vadd.f32 %v2071_v13, %v1768_v12  ;;  %v2240_v15 = vpop.f32.mrb[25].mxu1 }
 0xce3   : > { %v1771_v16 = vpop.f32.mrb[26].mxu1 }
 0xce4   : > { %v1774_v17 = vadd.f32 %v3700_v32, %v1769_v14  ;;  %v2241_v18 = vpop.f32.mrb[27].mxu1 }
 0xce6   : > { %1775 = vst.msk [vmem:[%s708_s15] sm:$0xff] %vm717_vm0, %v1774_v17 }
 0xce7   : > { %2942 = shalt.err (!%p2939_p8)
}
 0xce8   : > { %s2943_s3 = scalar_lea.hbm %s3725_s25, 128  ;;  %s2947_s26 = scalar_lea.hbm %s3839_s17, 256 }
 0xce9   : > { %p2944_p9 = scmp.ne.s32.totalorder %s3725_s25, %s2943_s3  ;;  %p2948_p3 = scmp.lt.u32.totalorder %s3725_s25, %s3839_s17 }
 0xcea   : > { %p2949_p1 = scmp.lt.u32.totalorder %s2947_s26, %s2943_s3  ;;  %p2951_p11 = scmp.lt.u32.totalorder %s2943_s3, %s3725_s25 }
 0xceb   : > { %p2945_p4 = pnand %p2944_p9, %p3840_p0 }
 0xcec   : > { %p2950_p12 = por %p2949_p1, %p2948_p3 }
 0xced   : > { %p2946_p6 = pneg %p2945_p4 }
 0xcee   : > { %p2952_p5 = por %p2951_p11, %p2950_p12 }
 0xcf0   : > { %p2953_p7 = pnand %p2952_p5, %p2946_p6 }
 0xcf2   : > { %2956 = shalt.err (!%p2953_p7)
}
 0xcf3   : > { %2313 = dma.vmem_to_hbm [thread:$0]  (%p3840_p0), %s3727_s24, 128, %s3725_s25, %s1777_s29  }
 0xcf4 PF: > { %s3841_s1 = sld [smem:[#allocation37_spill]]  ;;  %p3842_p10 = scmp.ne.s32.totalorder %s3830_s19, 0 }
 0xcf5   : > { %p3843_p13 = scmp.ge.s32.totalorder %s3039_s23, 2 }
 0xcf7   : > { %p2363_p2 = pnand %p3843_p13, %p3842_p10 }
 0xcfa   : > { %s1803_s2 = sand.u32 1, %s3841_s1  }
 0xcfb   : > { %s1804_s18 = scalar_lea.sflag [#allocation5], %s1803_s2 }
 0xcfc   : > { %3014 = dma.done.wait (!%p2363_p2), %s1804_s18, 128  }
 0xcfd   : > { %3016 = vsyncadd (!%p2363_p2), %s1804_s18, 4294967168  ;;  %s38_s23 = sadd.s32 1, %s3039_s23   ;;  %s3844_s18 = sld [smem:[#allocation38_spill]] }
 0xcfe   : > { %p35_p8 = scmp.ge.s32.totalorder %s38_s23, 4   ;;  %s3845_s19 = sld [smem:[#allocation39_spill]] }
 0xcff   : > { %s3846_s0 = smov %s3851_s20  ;;  %s3847_s20 = smov %s3513_s28 }
 0xd00   : > { %s3848_s21 = smov %s3035_s22  ;;  %s3849_s22 = smov %s3846_s0 }
 0xd01   :  { %37 = sbr.rel (!%p35_p8) target bundleno = 19 (0x13), region = 185 }
 0xd08   :  { %1809 = vsyncpa [#allocation4], 1 }
 0xd09   :  { %1811 = vsyncpa [#allocation4 + $0x1], 1 }
 0xd0a   :  { %1812 = vsyncpa [#allocation7], 1 }
 0xd0b   :  { %1813 = vsyncpa [#allocation10], 1 }
 0xd0c   :  { %1814 = vsyncpa [#allocation13], 1 }
 0xd0d   :  { %1815 = vsyncpa [#allocation16], 1 }
 0xd0e   :  { %1816 = vsyncpa [#allocation19], 1 }
 0xd0f   :  { %1817 = vsyncpa [#allocation22], 1 }
 0xd10   :  { %1818 = vsyncpa [#allocation25], 1 }
 0xd11   :  { %1819 = vsyncpa [#allocation5], 1 }
 0xd12   :  { %1821 = vsyncpa [#allocation5 + $0x1], 1 }

// kernel: tpu_custom_call.1
= control target key start
LH: loop header
LB: loop body
LE: loop exit
PB: predicated region body
PF: predicated region fallthrough
CT: control target
= control target key end

     0   :  { %s3775_s0 = inlined_call_operand.hbm [shape: f32[2,8,32], index: 0, kind: input, shape index: {}]   ;;  %s3776_s1 = inlined_call_operand.hbm [shape: f32[1,32], index: 1, kind: input, shape index: {}]   ;;  %s3777_s2 = inlined_call_operand.hbm [shape: f32[1,32], index: 2, kind: input, shape index: {}]   ;;  %s3778_s3 = inlined_call_operand.hbm [shape: bf16[32,32], index: 3, kind: input, shape index: {}]   ;;  %s3779_s4 = inlined_call_operand.hbm [shape: f32[1,32], index: 4, kind: input, shape index: {}]   ;;  %s3780_s5 = inlined_call_operand.hbm [shape: bf16[32,64], index: 5, kind: input, shape index: {}]   ;;  %s3781_s6 = inlined_call_operand.hbm [shape: f32[1,64], index: 6, kind: input, shape index: {}]   ;;  %s3782_s7 = inlined_call_operand.hbm [shape: bf16[32,32], index: 7, kind: input, shape index: {}]   ;;  %s3783_s8 = inlined_call_operand.hbm [shape: f32[1,32], index: 8, kind: input, shape index: {}]   ;;  %s3784_s9 = inlined_call_operand.hbm [shape: f32[1,32], index: 9, kind: input, shape index: {}]   ;;  %s3785_s10 = inlined_call_operand.hbm [shape: f32[1,32], index: 10, kind: input, shape index: {}]   ;;  %s3786_s11 = inlined_call_operand.hbm [shape: bf16[32,128], index: 11, kind: input, shape index: {}]   ;;  %s3787_s12 = inlined_call_operand.hbm [shape: bf16[1,128], index: 12, kind: input, shape index: {}]   ;;  %s3788_s13 = inlined_call_operand.hbm [shape: bf16[128,32], index: 13, kind: input, shape index: {}]   ;;  %s3789_s14 = inlined_call_operand.hbm [shape: f32[1,32], index: 14, kind: input, shape index: {}]   ;;  %s3790_s15 = inlined_call_operand.hbm [shape: f32[2,8,32], index: 15, kind: output, shape index: {}]  }
   0x1   :  { %3803 = sst [smem:[#allocation43_spill]] %s3775_s0 }
   0x2   :  { %3804 = sst [smem:[#allocation44_spill]] %s3776_s1 }
   0x3   :  { %3805 = sst [smem:[#allocation45_spill]] %s3777_s2 }
   0x4   :  { %3806 = sst [smem:[#allocation46_spill]] %s3778_s3 }
   0x5   :  { %3807 = sst [smem:[#allocation47_spill]] %s3790_s15 }
   0x6   :  { %20 = vsyncpa [#allocation4], 0 }
   0x7   :  { %22 = vsyncpa [#allocation4 + $0x1], 0 }
   0x8   :  { %23 = vsyncpa [#allocation7], 0 }
   0x9   :  { %24 = vsyncpa [#allocation10], 0 }
   0xa   :  { %25 = vsyncpa [#allocation13], 0 }
   0xb   :  { %26 = vsyncpa [#allocation16], 0 }
   0xc   :  { %27 = vsyncpa [#allocation19], 0 }
   0xd   :  { %28 = vsyncpa [#allocation22], 0 }
   0xe   :  { %29 = vsyncpa [#allocation25], 0 }
   0xf   :  { %30 = vsyncpa [#allocation5], 0 }
  0x10   :  { %32 = vsyncpa [#allocation5 + $0x1], 0  ;;  %s3149_s18 = smov 0   ;;  %s3151_s19 = smov 0  }
  0x11   :  { %s3153_s20 = smov 0   ;;  %s3155_s21 = smov 0  }
  0x12   :  { %s3157_s22 = smov 0   ;;  %s3159_s23 = smov 0  }
  0x13 LB: > { %3808 = sst [smem:[#allocation37_spill]] %s3019_s18  ;;  %s3791_s24 = sadd.s32 4294967295, %s3039_s23   ;;  %s3039_s23 = sphi %s3159_s23, %s38_s23   ;;  %s3035_s22 = sphi %s3157_s22, %s3849_s22   ;;  %s3031_s21 = sphi %s3155_s21, %s3848_s21   ;;  %s3027_s20 = sphi %s3153_s20, %s3847_s20   ;;  %s3023_s19 = sphi %s3151_s19, %s3845_s19   ;;  %s3019_s18 = sphi %s3149_s18, %s3844_s18  }
  0x14   : > { %3809 = sst [smem:[#allocation38_spill]] %s3023_s19  ;;  %p2005_p0 = scmp.ge.s32.totalorder %s3039_s23, 1 }
  0x15   : > { %3810 = sst [smem:[#allocation39_spill]] %s3027_s20  ;;  %p3183_p1 = scmp.eq.s32.totalorder %s3791_s24, 0 }
  0x16   : > { %3811 = sst [smem:[#allocation40_spill]] %s3031_s21  ;;  %p403_p2 = scmp.lt.s32.totalorder %s3039_s23, 3 }
  0x17   : > { %s3812_s25 = scalar_select %p3183_p1, 1, 0 }
  0x18   : > { %p3188_p3 = pnand %p2005_p0, %p403_p2  ;;  %s3041_s27 = smov [#allocation6]  }
  0x19   : > { %3813 = sst [smem:[#allocation41_spill]] %s3812_s25  ;;  %s416_s28 = sshll.u32 %s3041_s27, 4  ;;  %s417_s28 = int_to_ptr.vmem [resolvable:$true] %s416_s28 }
  0x1a   : > { %s3814_s26 = scalar_select %p3188_p3, 1, 0 }
  0x1b   : > { %p2315_p5 = pneg %p3188_p3  ;;  %s3042_s29 = smov [#allocation9]  }
  0x1c   : > { %3815 = sst [smem:[#allocation42_spill]] %s3814_s26  ;;  %s437_s30 = sshll.u32 %s3042_s29, 4  ;;  %s3201_s30 = int_to_ptr.vmem [resolvable:$true] %s437_s30 }
  0x1d   : > { %p3197_p6 = pnand %p2315_p5, %p3183_p1  ;;  %s3043_s17 = smov [#allocation12]  }
  0x1e   : > { %s3203_s24 = sshll.u32 %s3043_s17, 4  ;;  %s3817_s1 = sld [smem:[#allocation44_spill]]  ;;  %s462_s24 = int_to_ptr.vmem [resolvable:$true] %s3203_s24 }
  0x1f   : > { %p3213_p8 = pneg %p3197_p6 }
  0x24   : > { %s2507_s27 = scalar_lea.hbm %s3817_s1, 16 }
  0x25   : > { %p2508_p7 = scmp.ne.s32.totalorder %s3817_s1, %s2507_s27  ;;  %p2514_p11 = scmp.lt.u32.totalorder %s2507_s27, %s3817_s1 }
  0x27   : > { %p2510_p9 = pnand %p3213_p8, %p2508_p7 }
  0x29   : > { %p2511_p10 = pneg %p2510_p9 }
  0x2b   : > { %p2516_p12 = pnand %p2514_p11, %p2511_p10 }
  0x2d   : > { %2519 = shalt.err (!%p2516_p12)
}
  0x2e   : > { %s2520_s15 = scalar_lea.vmem %s417_s28, 16  ;;  %s2527_s0 = scalar_lea.vmem %s417_s28, 32 }
  0x2f   : > { %p2521_p13 = scmp.ne.s32.totalorder %s417_s28, %s2520_s15  ;;  %p2528_p5 = scmp.lt.s32.totalorder %s417_s28, %s417_s28 }
  0x30   : > { %p2529_p4 = scmp.lt.s32.totalorder %s2527_s0, %s2520_s15 }
  0x31   : > { %p2523_p0 = pnand %p2521_p13, %p3213_p8 }
  0x32   : > { %p2530_p3 = por %p2529_p4, %p2528_p5 }
  0x33   : > { %p2524_p2 = pneg %p2523_p0 }
  0x35   : > { %p2531_p1 = pnand %p2530_p3, %p2524_p2 }
  0x37   : > { %2534 = shalt.err (!%p2531_p1)
}
  0x38   : > { %2318 = dma.hbm_to_vmem [thread:$0]  (!%p3197_p6), %s3817_s1, 16, %s417_s28, [#allocation7]  }
  0x39   : > { %s3819_s3 = sld [smem:[#allocation46_spill]] }
  0x3f   : > { %s2535_s17 = scalar_lea.hbm %s3819_s3, 256 }
  0x40   : > { %p2536_p7 = scmp.ne.s32.totalorder %s3819_s3, %s2535_s17  ;;  %p2542_p1 = scmp.lt.u32.totalorder %s2535_s17, %s3819_s3 }
  0x42   : > { %p2538_p9 = pnand %p2536_p7, %p3213_p8 }
  0x44   : > { %p2539_p4 = pneg %p2538_p9 }
  0x46   : > { %p2544_p3 = pnand %p2542_p1, %p2539_p4 }
  0x48   : > { %2547 = shalt.err (!%p2544_p3)
}
  0x49   : > { %s2548_s28 = scalar_lea.vmem %s3201_s30, 256  ;;  %p2556_p13 = scmp.lt.s32.totalorder %s3201_s30, %s3201_s30 }
  0x4a   : > { %p2549_p10 = scmp.ne.s32.totalorder %s3201_s30, %s2548_s28  ;;  %p2557_p0 = scmp.lt.s32.totalorder %s2548_s28, %s2548_s28 }
  0x4c   : > { %p2551_p11 = pnand %p2549_p10, %p3213_p8  ;;  %p2558_p2 = por %p2557_p0, %p2556_p13 }
  0x4e   : > { %p2552_p12 = pneg %p2551_p11 }
  0x50   : > { %p2559_p5 = pnand %p2558_p2, %p2552_p12 }
  0x52   : > { %2562 = shalt.err (!%p2559_p5)
}
  0x53   : > { %s3044_s18 = smov 64   ;;  %s3045_s19 = smov 4  }
  0x54   : > { %2324 = dma.hbm_to_vmem [thread:$0]  (!%p3197_p6), %s3819_s3, 256, %s3201_s30, [#allocation10], %s3044_s18, %s3044_s18, %s3045_s19  }
  0x55   : > { %s2563_s17 = scalar_lea.hbm %s3780_s5, 256 }
  0x56   : > { %p2564_p7 = scmp.ne.s32.totalorder %s3780_s5, %s2563_s17  ;;  %p2570_p1 = scmp.lt.u32.totalorder %s2563_s17, %s3780_s5 }
  0x58   : > { %p2566_p9 = pnand %p2564_p7, %p3213_p8 }
  0x5a   : > { %p2567_p4 = pneg %p2566_p9 }
  0x5c   : > { %p2572_p3 = pnand %p2570_p1, %p2567_p4 }
  0x5e   : > { %2575 = shalt.err (!%p2572_p3)
}
  0x5f   : > { %s2576_s21 = scalar_lea.vmem %s462_s24, 256  ;;  %p2584_p13 = scmp.lt.s32.totalorder %s462_s24, %s462_s24 }
  0x60   : > { %p2577_p10 = scmp.ne.s32.totalorder %s462_s24, %s2576_s21  ;;  %p2585_p0 = scmp.lt.s32.totalorder %s2576_s21, %s2576_s21 }
  0x62   : > { %p2579_p11 = pnand %p2577_p10, %p3213_p8  ;;  %p2586_p2 = por %p2585_p0, %p2584_p13 }
  0x64   : > { %p2580_p12 = pneg %p2579_p11 }
  0x66   : > { %p2587_p5 = pnand %p2586_p2, %p2580_p12 }
  0x68   : > { %2590 = shalt.err (!%p2587_p5)
}
  0x69   : > { %2330 = dma.hbm_to_vmem [thread:$0]  (!%p3197_p6), %s3780_s5, 256, %s462_s24, [#allocation13], %s3044_s18, %s3044_s18, %s3045_s19  }
  0x6a   : > { %s3046_s26 = smov [#allocation15]   ;;  %s3047_s27 = smov [#allocation18]  }
  0x6b   : > { %s485_s25 = sshll.u32 %s3046_s26, 4  ;;  %s510_s17 = sshll.u32 %s3047_s27, 4  ;;  %s486_s25 = int_to_ptr.vmem [resolvable:$true] %s485_s25  ;;  %s511_s17 = int_to_ptr.vmem [resolvable:$true] %s510_s17 }
  0x6c   : > { %s2591_s28 = scalar_lea.hbm %s3782_s7, 256 }
  0x6d   : > { %p2592_p7 = scmp.ne.s32.totalorder %s3782_s7, %s2591_s28  ;;  %p2598_p1 = scmp.lt.u32.totalorder %s2591_s28, %s3782_s7 }
  0x6f   : > { %p2594_p9 = pnand %p2592_p7, %p3213_p8 }
  0x71   : > { %p2595_p4 = pneg %p2594_p9 }
  0x73   : > { %p2600_p3 = pnand %p2598_p1, %p2595_p4 }
  0x75   : > { %2603 = shalt.err (!%p2600_p3)
}
  0x76   : > { %s2604_s24 = scalar_lea.vmem %s486_s25, 256  ;;  %p2612_p13 = scmp.lt.s32.totalorder %s486_s25, %s486_s25 }
  0x77   : > { %p2605_p10 = scmp.ne.s32.totalorder %s486_s25, %s2604_s24  ;;  %p2613_p0 = scmp.lt.s32.totalorder %s2604_s24, %s2604_s24 }
  0x79   : > { %p2607_p11 = pnand %p2605_p10, %p3213_p8  ;;  %p2614_p2 = por %p2613_p0, %p2612_p13 }
  0x7b   : > { %p2608_p12 = pneg %p2607_p11 }
  0x7d   : > { %p2615_p5 = pnand %p2614_p2, %p2608_p12 }
  0x7f   : > { %2618 = shalt.err (!%p2615_p5)
}
  0x80   : > { %2336 = dma.hbm_to_vmem [thread:$0]  (!%p3197_p6), %s3782_s7, 256, %s486_s25, [#allocation16], %s3044_s18, %s3044_s18, %s3045_s19  }
  0x81   : > { %s2619_s27 = scalar_lea.hbm %s3784_s9, 16 }
  0x82   : > { %p2620_p7 = scmp.ne.s32.totalorder %s3784_s9, %s2619_s27  ;;  %p2626_p1 = scmp.lt.u32.totalorder %s2619_s27, %s3784_s9 }
  0x84   : > { %p2622_p9 = pnand %p2620_p7, %p3213_p8 }
  0x86   : > { %p2623_p4 = pneg %p2622_p9 }
  0x88   : > { %p2628_p3 = pnand %p2626_p1, %p2623_p4 }
  0x8a   : > { %2631 = shalt.err (!%p2628_p3)
}
  0x8b   : > { %s2632_s1 = scalar_lea.vmem %s511_s17, 16  ;;  %s2639_s25 = scalar_lea.vmem %s511_s17, 32 }
  0x8c   : > { %p2633_p10 = scmp.ne.s32.totalorder %s511_s17, %s2632_s1  ;;  %p2640_p13 = scmp.lt.s32.totalorder %s511_s17, %s511_s17 }
  0x8d   : > { %p2641_p0 = scmp.lt.s32.totalorder %s2639_s25, %s2632_s1 }
  0x8e   : > { %p2635_p11 = pnand %p2633_p10, %p3213_p8 }
  0x8f   : > { %p2642_p2 = por %p2641_p0, %p2640_p13 }
  0x90   : > { %p2636_p12 = pneg %p2635_p11 }
  0x92   : > { %p2643_p5 = pnand %p2642_p2, %p2636_p12 }
  0x94   : > { %2646 = shalt.err (!%p2643_p5)
}
  0x95   : > { %2342 = dma.hbm_to_vmem [thread:$0]  (!%p3197_p6), %s3784_s9, 16, %s511_s17, [#allocation19]  }
  0x96   : > { %s3048_s20 = smov [#allocation21]   ;;  %s3049_s26 = smov [#allocation24]  }
  0x97   : > { %s531_s30 = sshll.u32 %s3048_s20, 4  ;;  %s555_s27 = sshll.u32 %s3049_s26, 4  ;;  %s532_s30 = int_to_ptr.vmem [resolvable:$true] %s531_s30  ;;  %s556_s27 = int_to_ptr.vmem [resolvable:$true] %s555_s27 }
  0x98   : > { %s2647_s28 = scalar_lea.hbm %s3786_s11, 256 }
  0x99   : > { %p2648_p7 = scmp.ne.s32.totalorder %s3786_s11, %s2647_s28  ;;  %p2654_p1 = scmp.lt.u32.totalorder %s2647_s28, %s3786_s11 }
  0x9b   : > { %p2650_p9 = pnand %p2648_p7, %p3213_p8 }
  0x9d   : > { %p2651_p4 = pneg %p2650_p9 }
  0x9f   : > { %p2656_p3 = pnand %p2654_p1, %p2651_p4 }
  0xa1   : > { %2659 = shalt.err (!%p2656_p3)
}
  0xa2   : > { %s2660_s17 = scalar_lea.vmem %s532_s30, 256  ;;  %p2668_p13 = scmp.lt.s32.totalorder %s532_s30, %s532_s30 }
  0xa3   : > { %p2661_p10 = scmp.ne.s32.totalorder %s532_s30, %s2660_s17  ;;  %p2669_p0 = scmp.lt.s32.totalorder %s2660_s17, %s2660_s17 }
  0xa5   : > { %p2663_p11 = pnand %p2661_p10, %p3213_p8  ;;  %p2670_p2 = por %p2669_p0, %p2668_p13 }
  0xa7   : > { %p2664_p12 = pneg %p2663_p11 }
  0xa9   : > { %p2671_p5 = pnand %p2670_p2, %p2664_p12 }
  0xab   : > { %2674 = shalt.err (!%p2671_p5)
}
  0xac   : > { %2348 = dma.hbm_to_vmem [thread:$0]  (!%p3197_p6), %s3786_s11, 256, %s532_s30, [#allocation22], %s3044_s18, %s3044_s18, %s3045_s19  }
  0xad   : > { %s2675_s0 = scalar_lea.hbm %s3788_s13, 1024 }
  0xae   : > { %p2676_p7 = scmp.ne.s32.totalorder %s3788_s13, %s2675_s0  ;;  %p2682_p1 = scmp.lt.u32.totalorder %s2675_s0, %s3788_s13 }
  0xb0   : > { %p2678_p9 = pnand %p2676_p7, %p3213_p8 }
  0xb2   : > { %p2679_p4 = pneg %p2678_p9 }
  0xb4   : > { %p2684_p3 = pnand %p2682_p1, %p2679_p4 }
  0xb6   : > { %2687 = shalt.err (!%p2684_p3)
}
  0xb7   : > { %s2688_s24 = scalar_lea.vmem %s556_s27, 1024  ;;  %p2696_p13 = scmp.lt.s32.totalorder %s556_s27, %s556_s27 }
  0xb8   : > { %p2689_p10 = scmp.ne.s32.totalorder %s556_s27, %s2688_s24  ;;  %p2697_p0 = scmp.lt.s32.totalorder %s2688_s24, %s2688_s24 }
  0xba   : > { %p2691_p11 = pnand %p2689_p10, %p3213_p8  ;;  %p2698_p2 = por %p2697_p0, %p2696_p13 }
  0xbc   : > { %p2692_p12 = pneg %p2691_p11 }
  0xbe   : > { %p2699_p5 = pnand %p2698_p2, %p2692_p12 }
  0xc0   : > { %2702 = shalt.err (!%p2699_p5)
}
  0xc1   : > { %2354 = dma.hbm_to_vmem [thread:$0]  (!%p3197_p6), %s3788_s13, 1024, %s556_s27, [#allocation25], %s3044_s18, %s3044_s18, %s3045_s19  }
  0xc2   : > { %s3050_s3 = smov [#allocation8]   ;;  %s3051_s26 = smov [#allocation11]  }
  0xc3   : > { %s427_s20 = sshll.u32 %s3050_s3, 4  ;;  %s451_s15 = sshll.u32 %s3051_s26, 4  ;;  %s428_s20 = int_to_ptr.vmem [resolvable:$true] %s427_s20  ;;  %s452_s15 = int_to_ptr.vmem [resolvable:$true] %s451_s15 }
  0xc4   : > { %s3820_s2 = sld [smem:[#allocation45_spill]] }
  0xca   : > { %s2703_s21 = scalar_lea.hbm %s3820_s2, 16 }
  0xcb   : > { %p2704_p7 = scmp.ne.s32.totalorder %s3820_s2, %s2703_s21  ;;  %p2710_p1 = scmp.lt.u32.totalorder %s2703_s21, %s3820_s2 }
  0xcd   : > { %p2706_p9 = pnand %p2704_p7, %p3213_p8 }
  0xcf   : > { %p2707_p4 = pneg %p2706_p9 }
  0xd1   : > { %p2712_p3 = pnand %p2710_p1, %p2707_p4 }
  0xd3   : > { %2715 = shalt.err (!%p2712_p3)
}
  0xd4   : > { %s2716_s18 = scalar_lea.vmem %s428_s20, 16  ;;  %s2723_s19 = scalar_lea.vmem %s428_s20, 32 }
  0xd5   : > { %p2717_p10 = scmp.ne.s32.totalorder %s428_s20, %s2716_s18  ;;  %p2724_p13 = scmp.lt.s32.totalorder %s428_s20, %s428_s20 }
  0xd6   : > { %p2725_p0 = scmp.lt.s32.totalorder %s2723_s19, %s2716_s18 }
  0xd7   : > { %p2719_p11 = pnand %p2717_p10, %p3213_p8 }
  0xd8   : > { %p2726_p2 = por %p2725_p0, %p2724_p13 }
  0xd9   : > { %p2720_p12 = pneg %p2719_p11 }
  0xdb   : > { %p2727_p5 = pnand %p2726_p2, %p2720_p12 }
  0xdd   : > { %2730 = shalt.err (!%p2727_p5)
}
  0xde   : > { %2321 = dma.hbm_to_vmem [thread:$0]  (!%p3197_p6), %s3820_s2, 16, %s428_s20, [#allocation7]  }
  0xdf   : > { %s2731_s0 = scalar_lea.hbm %s3779_s4, 16 }
  0xe0   : > { %p2732_p7 = scmp.ne.s32.totalorder %s3779_s4, %s2731_s0  ;;  %p2738_p1 = scmp.lt.u32.totalorder %s2731_s0, %s3779_s4 }
  0xe2   : > { %p2734_p9 = pnand %p2732_p7, %p3213_p8 }
  0xe4   : > { %p2735_p4 = pneg %p2734_p9 }
  0xe6   : > { %p2740_p3 = pnand %p2738_p1, %p2735_p4 }
  0xe8   : > { %2743 = shalt.err (!%p2740_p3)
}
  0xe9   : > { %s2744_s24 = scalar_lea.vmem %s452_s15, 16  ;;  %s2751_s20 = scalar_lea.vmem %s452_s15, 32 }
  0xea   : > { %p2745_p10 = scmp.ne.s32.totalorder %s452_s15, %s2744_s24  ;;  %p2752_p13 = scmp.lt.s32.totalorder %s452_s15, %s452_s15 }
  0xeb   : > { %p2753_p0 = scmp.lt.s32.totalorder %s2751_s20, %s2744_s24 }
  0xec   : > { %p2747_p11 = pnand %p2745_p10, %p3213_p8 }
  0xed   : > { %p2754_p2 = por %p2753_p0, %p2752_p13 }
  0xee   : > { %p2748_p12 = pneg %p2747_p11 }
  0xf0   : > { %p2755_p5 = pnand %p2754_p2, %p2748_p12 }
  0xf2   : > { %2758 = shalt.err (!%p2755_p5)
}
  0xf3   : > { %2327 = dma.hbm_to_vmem [thread:$0]  (!%p3197_p6), %s3779_s4, 16, %s452_s15, [#allocation10]  }
  0xf4   : > { %s3052_s19 = smov [#allocation14]   ;;  %s3053_s17 = smov [#allocation17]  }
  0xf5   : > { %s475_s27 = sshll.u32 %s3052_s19, 4  ;;  %s499_s3 = sshll.u32 %s3053_s17, 4  ;;  %s476_s27 = int_to_ptr.vmem [resolvable:$true] %s475_s27  ;;  %s500_s3 = int_to_ptr.vmem [resolvable:$true] %s499_s3 }
  0xf6   : > { %s2759_s28 = scalar_lea.hbm %s3781_s6, 16 }
  0xf7   : > { %p2760_p7 = scmp.ne.s32.totalorder %s3781_s6, %s2759_s28  ;;  %p2766_p1 = scmp.lt.u32.totalorder %s2759_s28, %s3781_s6 }
  0xf9   : > { %p2762_p9 = pnand %p2760_p7, %p3213_p8 }
  0xfb   : > { %p2763_p4 = pneg %p2762_p9 }
  0xfd   : > { %p2768_p3 = pnand %p2766_p1, %p2763_p4 }
  0xff   : > { %2771 = shalt.err (!%p2768_p3)
}
 0x100   : > { %s2772_s15 = scalar_lea.vmem %s476_s27, 16  ;;  %s2779_s20 = scalar_lea.vmem %s476_s27, 32 }
 0x101   : > { %p2773_p10 = scmp.ne.s32.totalorder %s476_s27, %s2772_s15  ;;  %p2780_p13 = scmp.lt.s32.totalorder %s476_s27, %s476_s27 }
 0x102   : > { %p2781_p0 = scmp.lt.s32.totalorder %s2779_s20, %s2772_s15 }
 0x103   : > { %p2775_p11 = pnand %p2773_p10, %p3213_p8 }
 0x104   : > { %p2782_p2 = por %p2781_p0, %p2780_p13 }
 0x105   : > { %p2776_p12 = pneg %p2775_p11 }
 0x107   : > { %p2783_p5 = pnand %p2782_p2, %p2776_p12 }
 0x109   : > { %2786 = shalt.err (!%p2783_p5)
}
 0x10a   : > { %2333 = dma.hbm_to_vmem [thread:$0]  (!%p3197_p6), %s3781_s6, 16, %s476_s27, [#allocation13]  }
 0x10b   : > { %s2787_s26 = scalar_lea.hbm %s3783_s8, 16 }
 0x10c   : > { %p2788_p7 = scmp.ne.s32.totalorder %s3783_s8, %s2787_s26  ;;  %p2794_p1 = scmp.lt.u32.totalorder %s2787_s26, %s3783_s8 }
 0x10e   : > { %p2790_p9 = pnand %p2788_p7, %p3213_p8 }
 0x110   : > { %p2791_p4 = pneg %p2790_p9 }
 0x112   : > { %p2796_p3 = pnand %p2794_p1, %p2791_p4 }
 0x114   : > { %2799 = shalt.err (!%p2796_p3)
}
 0x115   : > { %s2800_s25 = scalar_lea.vmem %s500_s3, 16  ;;  %s2807_s27 = scalar_lea.vmem %s500_s3, 32 }
 0x116   : > { %p2801_p10 = scmp.ne.s32.totalorder %s500_s3, %s2800_s25  ;;  %p2808_p13 = scmp.lt.s32.totalorder %s500_s3, %s500_s3 }
 0x117   : > { %p2809_p0 = scmp.lt.s32.totalorder %s2807_s27, %s2800_s25 }
 0x118   : > { %p2803_p11 = pnand %p2801_p10, %p3213_p8 }
 0x119   : > { %p2810_p2 = por %p2809_p0, %p2808_p13 }
 0x11a   : > { %p2804_p12 = pneg %p2803_p11 }
 0x11c   : > { %p2811_p5 = pnand %p2810_p2, %p2804_p12 }
 0x11e   : > { %2814 = shalt.err (!%p2811_p5)
}
 0x11f   : > { %2339 = dma.hbm_to_vmem [thread:$0]  (!%p3197_p6), %s3783_s8, 16, %s500_s3, [#allocation16]  }
 0x120   : > { %s3054_s20 = smov [#allocation20]   ;;  %s3055_s18 = smov [#allocation23]  }
 0x121   : > { %s521_s30 = sshll.u32 %s3054_s20, 4  ;;  %s545_s19 = sshll.u32 %s3055_s18, 4  ;;  %s522_s30 = int_to_ptr.vmem [resolvable:$true] %s521_s30  ;;  %s546_s19 = int_to_ptr.vmem [resolvable:$true] %s545_s19 }
 0x122   : > { %s2815_s0 = scalar_lea.hbm %s3785_s10, 16 }
 0x123   : > { %p2816_p7 = scmp.ne.s32.totalorder %s3785_s10, %s2815_s0  ;;  %p2822_p1 = scmp.lt.u32.totalorder %s2815_s0, %s3785_s10 }
 0x125   : > { %p2818_p9 = pnand %p2816_p7, %p3213_p8 }
 0x127   : > { %p2819_p4 = pneg %p2818_p9 }
 0x129   : > { %p2824_p3 = pnand %p2822_p1, %p2819_p4 }
 0x12b   : > { %2827 = shalt.err (!%p2824_p3)
}
 0x12c   : > { %s2828_s3 = scalar_lea.vmem %s522_s30, 16  ;;  %s2835_s27 = scalar_lea.vmem %s522_s30, 32 }
 0x12d   : > { %p2829_p10 = scmp.ne.s32.totalorder %s522_s30, %s2828_s3  ;;  %p2836_p13 = scmp.lt.s32.totalorder %s522_s30, %s522_s30 }
 0x12e   : > { %p2837_p0 = scmp.lt.s32.totalorder %s2835_s27, %s2828_s3 }
 0x12f   : > { %p2831_p11 = pnand %p2829_p10, %p3213_p8 }
 0x130   : > { %p2838_p2 = por %p2837_p0, %p2836_p13 }
 0x131   : > { %p2832_p12 = pneg %p2831_p11 }
 0x133   : > { %p2839_p5 = pnand %p2838_p2, %p2832_p12 }
 0x135   : > { %2842 = shalt.err (!%p2839_p5)
}
 0x136   : > { %2345 = dma.hbm_to_vmem [thread:$0]  (!%p3197_p6), %s3785_s10, 16, %s522_s30, [#allocation19]  }
 0x137   : > { %s2843_s17 = scalar_lea.hbm %s3787_s12, 16 }
 0x138   : > { %p2844_p7 = scmp.ne.s32.totalorder %s3787_s12, %s2843_s17  ;;  %p2850_p1 = scmp.lt.u32.totalorder %s2843_s17, %s3787_s12 }
 0x13a   : > { %p2846_p9 = pnand %p2844_p7, %p3213_p8 }
 0x13c   : > { %p2847_p4 = pneg %p2846_p9 }
 0x13e   : > { %p2852_p3 = pnand %p2850_p1, %p2847_p4 }
 0x140   : > { %2855 = shalt.err (!%p2852_p3)
}
 0x141   : > { %s2856_s1 = scalar_lea.vmem %s546_s19, 16  ;;  %s2863_s30 = scalar_lea.vmem %s546_s19, 32 }
 0x142   : > { %p2857_p10 = scmp.ne.s32.totalorder %s546_s19, %s2856_s1  ;;  %p2864_p13 = scmp.lt.s32.totalorder %s546_s19, %s546_s19 }
 0x143   : > { %p2865_p0 = scmp.lt.s32.totalorder %s2863_s30, %s2856_s1 }
 0x144   : > { %p2859_p11 = pnand %p2857_p10, %p3213_p8 }
 0x145   : > { %p2866_p2 = por %p2865_p0, %p2864_p13 }
 0x146   : > { %p2860_p12 = pneg %p2859_p11 }
 0x148   : > { %p2867_p5 = pnand %p2866_p2, %p2860_p12 }
 0x14a   : > { %2870 = shalt.err (!%p2867_p5)
}
 0x14b   : > { %2351 = dma.hbm_to_vmem [thread:$0]  (!%p3197_p6), %s3787_s12, 16, %s546_s19, [#allocation22]  }
 0x14c   : > { %s3056_s27 = smov [#allocation26]   ;;  %s2871_s18 = scalar_lea.hbm %s3789_s14, 16 }
 0x14d   : > { %s569_s24 = sshll.u32 %s3056_s27, 4  ;;  %p2872_p7 = scmp.ne.s32.totalorder %s3789_s14, %s2871_s18  ;;  %s570_s24 = int_to_ptr.vmem [resolvable:$true] %s569_s24 }
 0x14e   : > { %p2878_p1 = scmp.lt.u32.totalorder %s2871_s18, %s3789_s14 }
 0x14f   : > { %p2874_p9 = pnand %p2872_p7, %p3213_p8 }
 0x151   : > { %p2875_p4 = pneg %p2874_p9 }
 0x153   : > { %p2880_p3 = pnand %p2878_p1, %p2875_p4 }
 0x155   : > { %2883 = shalt.err (!%p2880_p3)
}
 0x156   : > { %s2884_s19 = scalar_lea.vmem %s570_s24, 16  ;;  %s2891_s21 = scalar_lea.vmem %s570_s24, 32 }
 0x157   : > { %p2885_p10 = scmp.ne.s32.totalorder %s570_s24, %s2884_s19  ;;  %p2892_p13 = scmp.lt.s32.totalorder %s570_s24, %s570_s24 }
 0x158   : > { %p2893_p0 = scmp.lt.s32.totalorder %s2891_s21, %s2884_s19 }
 0x159   : > { %p2887_p11 = pnand %p2885_p10, %p3213_p8 }
 0x15a   : > { %p2894_p2 = por %p2893_p0, %p2892_p13 }
 0x15b   : > { %p2888_p12 = pneg %p2887_p11 }
 0x15d   : > { %p2895_p5 = pnand %p2894_p2, %p2888_p12 }
 0x15f   : > { %2898 = shalt.err (!%p2895_p5)
}
 0x160   : > { %s3821_s25 = sld [smem:[#allocation39_spill]]  ;;  %s3822_s3 = sld [smem:[#allocation38_spill]] }
 0x161   : > { %s3823_s29 = sld [smem:[#allocation37_spill]]  ;;  %s3824_s27 = sld [smem:[#allocation41_spill]] }
 0x162   : > { %2357 = dma.hbm_to_vmem [thread:$0]  (!%p3197_p6), %s3789_s14, 16, %s570_s24, [#allocation25]  }
 0x163   : > { %s2004_s15 = sadd.s32 4294967294, %s3039_s23   ;;  %s50_s20 = sadd.s32 1, %s3035_s22 }
 0x164   : > { %p52_p8 = scmp.ge.s32.totalorder %s50_s20, 2  ;;  %p65_p9 = scmp.eq.s32.totalorder %s3039_s23, 0 }
 0x165   : > { %s3826_s17 = sadd.s32 4294967295, %s3039_s23   ;;  %p396_p13 = scmp.eq.s32.totalorder %s2004_s15, 1 }
 0x166   : > { %s57_s16 = sadd.s32 1, %s3821_s25  ;;  %p64_p7 = scmp.ne.s32.totalorder %s3821_s25, %s3822_s3 }
 0x167   : > { %s3851_s20 = smov (%p52_p8, %s50_s20), 0  ;;  %p70_p1 = scmp.ne.s32.totalorder %s3822_s3, %s3823_s29 }
 0x168   : > { %p3492_p4 = por %p65_p9, %p64_p7  ;;  %s54_s24 = ssub.s32 %s3035_s22, %s3851_s20 }
 0x169   : > { %p390_p6 = scmp.eq.s32.totalorder %s3826_s17, 1  ;;  %p55_p3 = scmp.eq.s32.totalorder %s54_s24, 0 }
 0x16a   : > { %p3827_p10 = scmp.ne.s32.totalorder %s3824_s27, 0  ;;  %p3515_p0 = por %p396_p13, %p70_p1 }
 0x16b   : > { %p3508_p12 = por %p390_p6, %p64_p7  ;;  %p2380_p2 = scmp.lt.s32.totalorder %s3039_s23, 2 }
 0x16c   : > { %p3504_p11 = por %p3827_p10, %p70_p1  ;;  %s580_s21 = sand.u32 1, %s3821_s25  }
 0x16d   : > { %s3829_s0 = scalar_select %p3508_p12, 1, 0 }
 0x16e   : > { %s3513_s28 = scalar_select %p55_p3, %s3821_s25, %s57_s16  }
 0x16f   : > { %s3830_s19 = scalar_select %p3515_p0, 1, 0 }
 0x170   : > { %s2022_s1 = sshll.u32 %s3035_s22, 7  ;;  %s2021_s30 = sshll.u32 %s580_s21, 3 }
 0x171   : > { %s3831_s27 = sld [smem:[#allocation43_spill]]  ;;  %s584_s15 = scalar_lea.vmem [#allocation3], %s2021_s30 }
 0x172   : > { %s591_s16 = sshll.u32 %s584_s15, 4  ;;  %p3529_p5 = pnand %p2380_p2, %p3492_p4  ;;  %s3533_s16 = int_to_ptr.vmem [resolvable:$true] %s591_s16 }
 0x173   : > { %s581_s25 = scalar_lea.sflag [#allocation4], %s580_s21 }
 0x174   : > { %p2901_p7 = pneg %p3529_p5 }
 0x177   : > { %s3525_s24 = scalar_lea.hbm %s3831_s27, %s2022_s1  ;;  %s2904_s18 = scalar_lea.hbm %s3831_s27, 256 }
 0x178   : > { %s2899_s2 = scalar_lea.hbm %s3525_s24, 128  ;;  %p2905_p4 = scmp.lt.u32.totalorder %s3525_s24, %s3831_s27 }
 0x179   : > { %p2900_p8 = scmp.ne.s32.totalorder %s3525_s24, %s2899_s2  ;;  %p2906_p6 = scmp.lt.u32.totalorder %s2904_s18, %s2899_s2 }
 0x17a   : > { %p2908_p10 = scmp.lt.u32.totalorder %s2899_s2, %s3525_s24 }
 0x17b   : > { %p2902_p9 = pnand %p2901_p7, %p2900_p8  ;;  %p2907_p3 = por %p2906_p6, %p2905_p4 }
 0x17d   : > { %p2903_p1 = pneg %p2902_p9  ;;  %p2909_p13 = por %p2908_p10, %p2907_p3 }
 0x17f   : > { %p2910_p2 = pnand %p2909_p13, %p2903_p1 }
 0x181   : > { %2913 = shalt.err (!%p2910_p2)
}
 0x182   : > { %s2914_s21 = scalar_lea.vmem %s3533_s16, 128  ;;  %s3057_s15 = smov [#allocation3]  }
 0x183   : > { %p2915_p8 = scmp.ne.s32.totalorder %s3533_s16, %s2914_s21  ;;  %s2919_s1 = sshll.u32 %s3057_s15, 4  ;;  %s2920_s1 = int_to_ptr.vmem [resolvable:$false] %s2919_s1 }
 0x184   : > { %s2921_s30 = scalar_lea.vmem %s2920_s1, 256  ;;  %p2922_p12 = scmp.lt.s32.totalorder %s3533_s16, %s2920_s1 }
 0x185   : > { %p2917_p9 = pnand %p2915_p8, %p2901_p7  ;;  %p2923_p4 = scmp.lt.s32.totalorder %s2921_s30, %s2914_s21 }
 0x187   : > { %p2918_p0 = pneg %p2917_p9  ;;  %p2924_p6 = por %p2923_p4, %p2922_p12 }
 0x189   : > { %p2925_p3 = pnand %p2924_p6, %p2918_p0 }
 0x18b   : > { %2928 = shalt.err (!%p2925_p3)
}
 0x18c   : > { %2361 = dma.hbm_to_vmem [thread:$0]  (!%p3529_p5), %s3525_s24, 128, %s3533_s16, %s581_s25  }
 0x18d   : > { %s3833_s2 = sld [smem:[#allocation42_spill]] }
 0x193   : > { %p3834_p1 = scmp.ne.s32.totalorder %s3833_s2, 0 }
 0x194   : > { %s3835_s18 = sld [smem:[#allocation38_spill]] (!%p3834_p1) }
 0x195   : > { %600 = sbr.rel (%p3834_p1) target bundleno = 3316 (0xcf4), region = 80 }
 0x19a   : > { %s3563_s3 = sand.u32 (!%p3834_p1), 1, %s3835_s18  }
 0x19b   : > { %s2024_s29 = sshll.u32 (!%p3834_p1), %s3563_s3, 3  ;;  %s603_s21 = scalar_lea.sflag (!%p3834_p1), [#allocation4], %s3563_s3 }
 0x19c   : > { %s606_s15 = scalar_lea.vmem [#allocation3], %s2024_s29 }
 0x19d   : > { %2982 = dma.done.wait (%p3504_p11), %s603_s21, 128  }
 0x19e   : > { %2984 = vsyncadd (%p3504_p11), %s603_s21, 4294967168  ;;  %s3836_s24 = sld [smem:[#allocation41_spill]] }
 0x1a4   : > { %p3837_p12 = scmp.ne.s32.totalorder %s3836_s24, 0 }
 0x1a6   : > { %2986 = dma.done.wait (%p3837_p12), [#allocation7], 32  }
 0x1a7   : > { %2988 = vsyncadd (%p3837_p12), [#allocation7], 4294967264 }
 0x1a8   : > { %2990 = dma.done.wait (%p3837_p12), [#allocation10], 272  }
 0x1a9   : > { %2992 = vsyncadd (%p3837_p12), [#allocation10], 4294967024 }
 0x1aa   : > { %2994 = dma.done.wait (%p3837_p12), [#allocation13], 272  }
 0x1ab   : > { %2996 = vsyncadd (%p3837_p12), [#allocation13], 4294967024 }
 0x1ac   : > { %2998 = dma.done.wait (%p3837_p12), [#allocation16], 272  }
 0x1ad   : > { %3000 = vsyncadd (%p3837_p12), [#allocation16], 4294967024 }
 0x1ae   : > { %3002 = dma.done.wait (%p3837_p12), [#allocation19], 32  }
 0x1af   : > { %3004 = vsyncadd (%p3837_p12), [#allocation19], 4294967264 }
 0x1b0   : > { %3006 = dma.done.wait (%p3837_p12), [#allocation22], 272  }
 0x1b1   : > { %3008 = vsyncadd (%p3837_p12), [#allocation22], 4294967024 }
 0x1b2   : > { %3010 = dma.done.wait (%p3837_p12), [#allocation25], 1040  }
 0x1b3   : > { %3012 = vsyncadd (%p3837_p12), [#allocation25], 4294966256  ;;  %vm717_vm0 = vcmask 261120   ;;  %v3601_v0 = vld [vmem:[%s606_s15] sm:$0xff]  ;;  %v3058_v13 = vmov 0.0   ;;  %vm3059_vm1 = vmmov 0  }
 0x1b4   : > { %v718_v1 = vsel %vm717_vm0, %v3601_v0, 0.0  ;;  %v2470_v12 = vld [vmem:[#allocation12] sm:$0xff]   ;;  %2126 = vmatprep.subr.bf16.mxu0 %v3058_v13  ;;  %2148 = vmatprep.subr.bf16.mxu1 %v3058_v13  ;;  %v2471_v14 = vld [vmem:[#allocation12 + $0x8] sm:$0xff]   ;;  %v2473_v32 = vld [vmem:[#allocation9 + $0x8] sm:$0xff]   ;;  %vm814_vm2 = vcmask 519168   ;;  %vm925_vm3 = vcmask 64512  }
 0x1b5   : > { %719 = vadd.xlane.f32.xlu0 %v718_v1  ;;  %2127 = vmatpush3.bf16.msra.mxu0 %v2470_v12  ;;  %v2040_v22 = vld [vmem:[#allocation6] ss:$0 sm:$0xff]  ;;  %v2041_v24 = vld [vmem:[#allocation8] ss:$0 sm:$0xff]  ;;  %v2472_v29 = vld [vmem:[#allocation9] sm:$0xff]   ;;  %s3060_s26 = smov 96  }
 0x1b6   : > { %2128 = vmatprep.subr.bf16.mxu0 %v3058_v13  ;;  %2130 = vmatprep.mubr.msk.bf16.mxu0 %vm3059_vm1, %v3058_v13  ;;  %v2042_v35 = vld [vmem:[#allocation14] ss:$0 sm:$0xff]  ;;  %v2048_v44 = vld [vmem:[#allocation11] ss:$0 sm:$0xff]  ;;  %s3061_s16 = smov 120   ;;  %s3062_s17 = smov 112  }
 0x1b7   : > { %2150 = vmatprep.mubr.msk.bf16.mxu1 %vm3059_vm1, %v3058_v13  ;;  %s3063_s25 = smov 80   ;;  %s3064_s1 = smov 104   ;;  %vm990_vm4 = vcmask 1043456  }
 0x1b8   : > { %s3065_s30 = smov 88   ;;  %s3066_s2 = smov 72  }
 0x1b9   : > { %821 = vadd.xlane.f32.xlu0 %v718_v1  ;;  %2129 = vmatpush3.bf16.msra.mxu0 %v2471_v14  ;;  %s3838_s18 = sld [smem:[#allocation40_spill]]  ;;  %s708_s15 = scalar_lea.vmem [#allocation27], %s2024_s29 }
 0x1ba   : > { %2134 = vmatprep.subr.bf16.mxu0 %v3058_v13  ;;  %s1791_s24 = sshll.u32 %s708_s15, 4  ;;  %s1777_s29 = scalar_lea.sflag [#allocation5], %s3563_s3  ;;  %s3727_s24 = int_to_ptr.vmem [resolvable:$true] %s1791_s24 }
 0x1bb   : > { %p3840_p0 = scmp.ne.s32.totalorder %s3829_s0, 0 }
 0x1bf   : > { %s2081_s21 = sshll.u32 %s3838_s18, 7 }
 0x242   : > { %v720_v2 = vpop.xlane.xlu0 %719 }
 0x243   : > { %v722_v3 = vmul.f32 0.03125, %v720_v2 }
 0x245   : > { %v723_v4 = vsub.f32 %v3601_v0, %v722_v3 }
 0x246   : > { %v822_v5 = vpop.xlane.xlu0 %821 }
 0x247   : > { %v824_v6 = vmul.f32 0.03125, %v822_v5  ;;  %v724_v7 = vmul.f32 %v723_v4, %v723_v4 }
 0x249   : > { %v825_v8 = vsub.f32 %v3601_v0, %v824_v6  ;;  %v725_v9 = vsel %vm717_vm0, %v724_v7, 0.0 }
 0x24a   : > { %726 = vadd.xlane.f32.xlu1 %v725_v9 }
 0x24b   : > { %v826_v10 = vmul.f32 %v825_v8, %v825_v8 }
 0x24d   : > { %v827_v11 = vsel %vm717_vm0, %v826_v10, 0.0  ;;  %v1037_v10 = vld [vmem:[#allocation15] sm:$0xf] }
 0x24e   : > { %828 = vadd.xlane.f32.xlu1 %v827_v11  ;;  %v1042_v11 = vsel %vm990_vm4, %v1037_v10, 0 }
 0x2d7   : > { %v727_v15 = vpop.xlane.xlu1 %726 }
 0x2d8   : > { %v728_v16 = vmul.f32 0.03125, %v727_v15 }
 0x2da   : > { %v729_v17 = vadd.f32 1e-05, %v728_v16 }
 0x2db   : > { %v829_v18 = vpop.xlane.xlu1 %828 }
 0x2dc   : > { %2485 = vrsqrt.f32 %v729_v17  ;;  %v830_v19 = vmul.f32 0.03125, %v829_v18 }
 0x2de   : > { %v831_v20 = vadd.f32 1e-05, %v830_v19 }
 0x2e0   : > { %2487 = vrsqrt.f32 %v831_v20 }
 0x2e6   : > { %v2486_v21 = vpop.eup %2485 }
 0x2e7   : > { %v731_v23 = vmul.f32 %v2486_v21, %v723_v4 }
 0x2e9   : > { %v738_v25 = vmul.f32 %v2040_v22, %v731_v23 }
 0x2ea   : > { %v2488_v26 = vpop.eup %2487 }
 0x2eb   : > { %v833_v27 = vmul.f32 %v2488_v26, %v825_v8  ;;  %v745_v28 = vadd.f32 %v2041_v24, %v738_v25 }
 0x2ed   : > { %v746_v30 = vpack.c.bf16 %v745_v28, %v745_v28  ;;  %v840_v31 = vmul.f32 %v2040_v22, %v833_v27 }
 0x2ef   : > { %2131 = vmatmul.mubr.msk.bf16.vlgmr.msra.gmra.mrb[0].mxu0 %vm717_vm0, %v746_v30  ;;  %v847_v33 = vadd.f32 %v2041_v24, %v840_v31 }
 0x2f0   : > { %2135 = vmatpush3.bf16.msra.mxu0 %v2472_v29  ;;  %2138 = vmatprep.mubr.msk.bf16.mxu0 %vm3059_vm1, %v3058_v13 }
 0x2f1   : > { %2136 = vmatprep.subr.bf16.mxu0 %v3058_v13  ;;  %v848_v34 = vpack.c.bf16 %v847_v33, %v847_v33 }
 0x2f4   : > { %2137 = vmatpush3.bf16.msra.mxu0 %v2473_v32 }
 0x2f5   : > { %2142 = vmatprep.subr.bf16.mxu0 %v3058_v13 }
 0x2f7   : > { %2139 = vmatmul.mubr.msk.bf16.vlgmr.msra.gmra.mrb[4].mxu0 %vm717_vm0, %v848_v34 }
 0x2f8   : > { %2144 = vmatprep.mubr.msk.bf16.mxu0 %vm3059_vm1, %v3058_v13 }
 0x3c2   : > { %v807_v36 = vpop.f32.mrb[0].mxu0 }
 0x3c3   : > { %v808_v37 = vadd.f32 %v2042_v35, %v807_v36  ;;  %v2132_v38 = vpop.f32.mrb[1].mxu0 }
 0x3c4   : > { %v810_v39 = vpop.f32.mrb[2].mxu0 }
 0x3c5   : > { %v813_v40 = vpack.c.bf16 %v808_v37, %v808_v37  ;;  %v2133_v41 = vpop.f32.mrb[3].mxu0 }
 0x3c7   : > { %815 = vst.msk [vmem:[#allocation2] sm:$0xf] %vm814_vm2, %v813_v40 }
 0x3ca   : > { %v909_v42 = vpop.f32.mrb[4].mxu0 }
 0x3cb   : > { %v2140_v43 = vpop.f32.mrb[5].mxu0  ;;  %v910_v48 = vadd.f32 %v2048_v44, %v909_v42 }
 0x3cc   : > { %v912_v45 = vpop.f32.mrb[6].mxu0 }
 0x3cd   : > { %v2141_v46 = vpop.f32.mrb[7].mxu0  ;;  %v915_v51 = vpack.c.bf16 %v910_v48, %v910_v48  ;;  %v1197_v48 = vld [vmem:[#allocation15 + $0x4] sm:$0xf] }
 0x3ce   : > { %v924_v47 = vld [vmem:[#allocation2] sm:$0xf] }
 0x3cf   : > { %v930_v49 = vsel %vm925_vm3, %v924_v47, 0  ;;  %v3626_v50 = vcombine.low %v924_v47, %v924_v47 }
 0x3d0   : > { %2143 = vmatpush3.bf16.xpose.msra.mxu0 %v930_v49  ;;  %v1202_v49 = vsel %vm990_vm4, %v1197_v48, 0 }
 0x3d1   : > { %985 = vrot.lane.b32.xlu1 %v3626_v50, %s3060_s26  ;;  %2154 = vmatprep.subr.bf16.mxu0 %v3058_v13 }
 0x3d5   : > { %1086 = vrot.lane.b32.xlu1 %v915_v51, %s3061_s16 }
 0x3d7   : > { %2145 = vmatmul.mubr.msk.bf16.vlgmr.msra.gmra.mrb[8].mxu0 %vm925_vm3, %v915_v51 }
 0x3d8   : > { %2156 = vmatprep.mubr.msk.bf16.mxu0 %vm3059_vm1, %v3058_v13  ;;  %2155 = vmatpush3.bf16.msra.mxu0 %v1042_v11 }
 0x3d9   : > { %1247 = vrot.lane.b32.xlu1 %v3626_v50, %s3062_s17  ;;  %2166 = vmatprep.subr.bf16.mxu0 %v3058_v13 }
 0x3dd   : > { %1245 = vrot.lane.b32.xlu1 %v915_v51, %s3062_s17  ;;  %s3839_s17 = sld [smem:[#allocation47_spill]] }
 0x3e1   : > { %1305 = vrot.lane.b32.xlu1 %v3626_v50, %s3063_s25 }
 0x3e3   : > { %s3725_s25 = scalar_lea.hbm %s3839_s17, %s2081_s21 }
 0x3e5   : > { %1406 = vrot.lane.b32.xlu1 %v3626_v50, %s3064_s1 }
 0x3e9   : > { %1404 = vrot.lane.b32.xlu1 %v915_v51, %s3064_s1  ;;  %s2929_s1 = scalar_lea.vmem %s3727_s24, 128 }
 0x3ea   : > { %p2930_p11 = scmp.ne.s32.totalorder %s3727_s24, %s2929_s1 }
 0x3ec   : > { %p2931_p5 = pnand %p2930_p11, %p3840_p0 }
 0x3ee   : > { %p2932_p7 = pneg %p2931_p5 }
 0x443   : > { %v986_v52 = vpop.permute.xlu1 %985 }
 0x444   : > { %v992_v53 = vsel %vm990_vm4, %v986_v52, 0 }
 0x445   : > { %2149 = vmatpush3.bf16.msra.mxu1 %v992_v53 }
 0x446   : > { %2160 = vmatprep.subr.bf16.mxu1 %v3058_v13 }
 0x447   : > { %v1087_v62 = vpop.permute.xlu1 %1086 }
 0x44b   : > { %v1248_v5 = vpop.permute.xlu1 %1247 }
 0x44c   : > { %v1253_v7 = vsel %vm925_vm3, %v1248_v5, 0 }
 0x44f   : > { %v1246_v6 = vpop.permute.xlu1 %1245 }
 0x453   : > { %v1306_v8 = vpop.permute.xlu1 %1305 }
 0x454   : > { %v1311_v9 = vsel %vm990_vm4, %v1306_v8, 0 }
 0x457   : > { %v1407_v12 = vpop.permute.xlu1 %1406 }
 0x458   : > { %v1412_v43 = vsel %vm925_vm3, %v1407_v12, 0 }
 0x45b   : > { %v1405_v14 = vpop.permute.xlu1 %1404 }
 0x4aa   : > { %v966_v54 = vpop.f32.mrb[8].mxu0 }
 0x4ab   : > { %v2146_v55 = vpop.f32.mrb[9].mxu0  ;;  %v972_v56 = vsel %vm925_vm3, %v966_v54, -inf }
 0x4ac   : > { %973 = vmax.xlane.f32.xlu0 %v972_v56  ;;  %v969_v57 = vpop.f32.mrb[10].mxu0 }
 0x4ad   : > { %v2147_v58 = vpop.f32.mrb[11].mxu0 }
 0x4c2   : > { %1088 = vrot.lane.b32.xlu0 %v3626_v50, %s3061_s16 }
 0x539   : > { %v974_v59 = vpop.xlane.xlu0 %973 }
 0x53a   : > { %v975_v60 = vsub.f32 %v966_v54, %v974_v59  ;;  %v1356_v59 = vld [vmem:[#allocation15 + $0x8] sm:$0xf] }
 0x53c   : > { %v976_v61 = vmul.f32 1.442695, %v975_v60 }
 0x53d   : > { %v1089_v1 = vpop.permute.xlu0 %1088 }
 0x53e   : > { %2489 = vpow2.f32 %v976_v61  ;;  %v1094_v4 = vsel %vm925_vm3, %v1089_v1, 0  ;;  %v1361_v1 = vsel %vm990_vm4, %v1356_v59, 0  ;;  %v2482_v59 = vld [vmem:[#allocation24 + $0x28] sm:$0xff]  }
 0x548   : > { %v2490_v63 = vpop.eup %2489 }
 0x549   : > { %v978_v2 = vsel %vm925_vm3, %v2490_v63, 0.0  ;;  %v981_v3 = vpack.c.bf16 %v2490_v63, %v2490_v63 }
 0x54a   : > { %979 = vadd.xlane.f32.xlu1 %v978_v2 }
 0x54b   : > { %2151 = vmatmul.mubr.msk.bf16.vlgmr.msra.gmra.mrb[0].mxu1 %vm925_vm3, %v981_v3 }
 0x54c   : > { %2161 = vmatpush3.bf16.xpose.msra.mxu1 %v1094_v4  ;;  %2162 = vmatprep.mubr.msk.bf16.mxu1 %vm3059_vm1, %v3058_v13 }
 0x54d   : > { %2178 = vmatprep.subr.bf16.mxu1 %v3058_v13 }
 0x553   : > { %2163 = vmatmul.mubr.msk.bf16.vlgmr.msra.gmra.mrb[4].mxu1 %vm925_vm3, %v1087_v62 }
 0x554   : > { %2179 = vmatpush3.bf16.xpose.msra.mxu1 %v1253_v7  ;;  %2180 = vmatprep.mubr.msk.bf16.mxu1 %vm3059_vm1, %v3058_v13 }
 0x555   : > { %2184 = vmatprep.subr.bf16.mxu1 %v3058_v13 }
 0x55b   : > { %2181 = vmatmul.mubr.msk.bf16.vlgmr.msra.gmra.mrb[8].mxu1 %vm925_vm3, %v1246_v6 }
 0x55c   : > { %2185 = vmatpush3.bf16.msra.mxu1 %v1311_v9  ;;  %2186 = vmatprep.mubr.msk.bf16.mxu1 %vm3059_vm1, %v3058_v13 }
 0x55d   : > { %2196 = vmatprep.subr.bf16.mxu1 %v3058_v13 }
 0x5d7   : > { %v980_v15 = vpop.xlane.xlu1 %979 }
 0x5d8   : > { %2491 = vrcp.f32 %v980_v15 }
 0x5e2   : > { %v2492_v16 = vpop.eup %2491 }
 0x61e   : > { %v1028_v17 = vpop.f32.mrb[0].mxu1 }
 0x61f   : > { %v1035_v18 = vmul.f32 %v2492_v16, %v1028_v17  ;;  %v2152_v19 = vpop.f32.mrb[1].mxu1 }
 0x620   : > { %v1031_v20 = vpop.f32.mrb[2].mxu1  ;;  %v1515_v19 = vld [vmem:[#allocation15 + $0xc] sm:$0xf] }
 0x621   : > { %v1036_v21 = vpack.c.bf16 %v1035_v18, %v1035_v18  ;;  %v2153_v22 = vpop.f32.mrb[3].mxu1  ;;  %v1520_v20 = vsel %vm990_vm4, %v1515_v19, 0 }
 0x623   : > { %2157 = vmatmul.mubr.msk.bf16.vlgmr.msra.gmra.mrb[12].mxu0 %vm925_vm3, %v1036_v21 }
 0x624   : > { %2168 = vmatprep.mubr.msk.bf16.mxu0 %vm3059_vm1, %v3058_v13 }
 0x626   : > { %v1130_v23 = vpop.f32.mrb[4].mxu1 }
 0x627   : > { %v2164_v24 = vpop.f32.mrb[5].mxu1  ;;  %v1136_v32 = vsel %vm925_vm3, %v1130_v23, -inf }
 0x628   : > { %v1133_v25 = vpop.f32.mrb[6].mxu1 }
 0x629   : > { %v2165_v26 = vpop.f32.mrb[7].mxu1 }
 0x62e   : > { %v1289_v27 = vpop.f32.mrb[8].mxu1 }
 0x62f   : > { %v2182_v28 = vpop.f32.mrb[9].mxu1  ;;  %v1295_v29 = vsel %vm925_vm3, %v1289_v27, -inf }
 0x630   : > { %1296 = vmax.xlane.f32.xlu0 %v1295_v29  ;;  %v1292_v30 = vpop.f32.mrb[10].mxu1  ;;  %v2052_v29 = vld [vmem:[#allocation17] ss:$0 sm:$0xff] }
 0x631   : > { %v2183_v31 = vpop.f32.mrb[11].mxu1  ;;  %v923_v30 = vadd.f32 %v2052_v29, %v3601_v0  ;;  %v2476_v0 = vld [vmem:[#allocation21 + $0x8] sm:$0xff]  }
 0x634   : > { %1137 = vmax.xlane.f32.xlu0 %v1136_v32 }
 0x64a   : > { %1146 = vrot.lane.b32.xlu0 %v3626_v50, %s3065_s30  ;;  %s3068_s30 = smov [#allocation27]  }
 0x6bd   : > { %v1297_v33 = vpop.xlane.xlu0 %1296 }
 0x6be   : > { %v1298_v34 = vsub.f32 %v1289_v27, %v1297_v33 }
 0x6c0   : > { %v1299_v35 = vmul.f32 1.442695, %v1298_v34 }
 0x6c1   : > { %v1138_v36 = vpop.xlane.xlu0 %1137 }
 0x6c2   : > { %2493 = vpow2.f32 %v1299_v35  ;;  %v1139_v37 = vsub.f32 %v1130_v23, %v1138_v36 }
 0x6c4   : > { %v1140_v38 = vmul.f32 1.442695, %v1139_v37 }
 0x6c5   : > { %v1147_v39 = vpop.permute.xlu0 %1146 }
 0x6c6   : > { %2495 = vpow2.f32 %v1140_v38  ;;  %v1152_v40 = vsel %vm990_vm4, %v1147_v39, 0 }
 0x6c7   : > { %2167 = vmatpush3.bf16.msra.mxu0 %v1152_v40 }
 0x6c8   : > { %2172 = vmatprep.subr.bf16.mxu0 %v3058_v13 }
 0x6cc   : > { %v2494_v41 = vpop.eup %2493 }
 0x6cd   : > { %v1304_v42 = vpack.c.bf16 %v2494_v41, %v2494_v41  ;;  %v1301_v47 = vsel %vm925_vm3, %v2494_v41, 0.0 }
 0x6cf   : > { %2187 = vmatmul.mubr.msk.bf16.vlgmr.msra.gmra.mrb[12].mxu1 %vm925_vm3, %v1304_v42  ;;  %v2475_v42 = vld [vmem:[#allocation21] sm:$0xff]  }
 0x6d0   : > { %v2496_v44 = vpop.eup %2495  ;;  %2197 = vmatpush3.bf16.xpose.msra.mxu1 %v1412_v43  ;;  %2198 = vmatprep.mubr.msk.bf16.mxu1 %vm3059_vm1, %v3058_v13 }
 0x6d1   : > { %v1142_v45 = vsel %vm925_vm3, %v2496_v44, 0.0  ;;  %v1145_v46 = vpack.c.bf16 %v2496_v44, %v2496_v44  ;;  %2214 = vmatprep.subr.bf16.mxu1 %v3058_v13 }
 0x6d2   : > { %1143 = vadd.xlane.f32.xlu1 %v1142_v45 }
 0x6d3   : > { %2169 = vmatmul.mubr.msk.bf16.vlgmr.msra.gmra.mrb[16].mxu0 %vm925_vm3, %v1145_v46 }
 0x6d4   : > { %2174 = vmatprep.mubr.msk.bf16.mxu0 %vm3059_vm1, %v3058_v13  ;;  %2173 = vmatpush3.bf16.msra.mxu0 %v1202_v49  ;;  %v2067_v49 = vld [vmem:[#allocation20] ss:$0 sm:$0xff] }
 0x6d5   : > { %2190 = vmatprep.subr.bf16.mxu0 %v3058_v13 }
 0x6d6   : > { %1302 = vadd.xlane.f32.xlu1 %v1301_v47  ;;  %v2066_v47 = vld [vmem:[#allocation18] ss:$0 sm:$0xff] }
 0x6d7   : > { %2199 = vmatmul.mubr.msk.bf16.vlgmr.msra.gmra.mrb[16].mxu1 %vm925_vm3, %v1405_v14 }
 0x6d8   : > { %2218 = vmatprep.mubr.msk.bf16.mxu1 %vm3059_vm1, %v3058_v13  ;;  %2215 = vmatpush3.bf16.msra.mxu1 %v2475_v42 }
 0x6d9   : > { %2216 = vmatprep.subr.bf16.mxu1 %v3058_v13 }
 0x6dc   : > { %2217 = vmatpush3.bf16.msra.mxu1 %v2476_v0 }
 0x6dd   : > { %2222 = vmatprep.subr.bf16.mxu1 %v3058_v13 }
 0x6e7   : > { %1464 = vrot.lane.b32.xlu1 %v3626_v50, %s3066_s2  ;;  %s2933_s2 = sshll.u32 %s3068_s30, 4  ;;  %s2934_s2 = int_to_ptr.vmem [resolvable:$false] %s2933_s2 }
 0x6e8   : > { %s2935_s18 = scalar_lea.vmem %s2934_s2, 256  ;;  %p2936_p10 = scmp.lt.s32.totalorder %s3727_s24, %s2934_s2 }
 0x6e9   : > { %p2937_p13 = scmp.lt.s32.totalorder %s2935_s18, %s2929_s1 }
 0x6eb   : > { %p2938_p2 = por %p2937_p13, %p2936_p10 }
 0x6ed   : > { %p2939_p8 = pnand %p2938_p2, %p2932_p7 }
 0x75f   : > { %v1144_v51 = vpop.xlane.xlu1 %1143 }
 0x760   : > { %2497 = vrcp.f32 %v1144_v51 }
 0x763   : > { %v1303_v53 = vpop.xlane.xlu1 %1302 }
 0x764   : > { %2499 = vrcp.f32 %v1303_v53  ;;  %v2477_v53 = vld [vmem:[#allocation24] sm:$0xff]  }
 0x767   : > { %v1465_v9 = vpop.permute.xlu1 %1464 }
 0x768   : > { %v1470_v11 = vsel %vm990_vm4, %v1465_v9, 0 }
 0x76a   : > { %v2498_v57 = vpop.eup %2497 }
 0x76e   : > { %v2500_v7 = vpop.eup %2499 }
 0x7a2   : > { %v1347_v52 = vpop.f32.mrb[12].mxu1 }
 0x7a3   : > { %v2188_v54 = vpop.f32.mrb[13].mxu1  ;;  %v1354_v8 = vmul.f32 %v2500_v7, %v1347_v52 }
 0x7a4   : > { %v1350_v55 = vpop.f32.mrb[14].mxu1 }
 0x7a5   : > { %v2189_v56 = vpop.f32.mrb[15].mxu1  ;;  %v1355_v10 = vpack.c.bf16 %v1354_v8, %v1354_v8  ;;  %v2478_v55 = vld [vmem:[#allocation24 + $0x8] sm:$0xff]  }
 0x7a6   : > { %v1188_v58 = vpop.f32.mrb[16].mxu0  ;;  %v2479_v56 = vld [vmem:[#allocation24 + $0x10] sm:$0xff]  }
 0x7a7   : > { %v1195_v60 = vmul.f32 %v2498_v57, %v1188_v58  ;;  %v2170_v61 = vpop.f32.mrb[17].mxu0  ;;  %v2480_v57 = vld [vmem:[#allocation24 + $0x18] sm:$0xff]   ;;  %v2481_v58 = vld [vmem:[#allocation24 + $0x20] sm:$0xff]  }
 0x7a8   : > { %v1191_v50 = vpop.f32.mrb[18].mxu0  ;;  %v2484_v61 = vld [vmem:[#allocation24 + $0x38] sm:$0xff]  }
 0x7a9   : > { %v1196_v62 = vpack.c.bf16 %v1195_v60, %v1195_v60  ;;  %v2171_v63 = vpop.f32.mrb[19].mxu0  ;;  %v2483_v60 = vld [vmem:[#allocation24 + $0x30] sm:$0xff]   ;;  %v1657_v50 = vlaneseq }
 0x7aa   : > { %v1448_v2 = vpop.f32.mrb[16].mxu1  ;;  %v1653_v63 = vld [vmem:[#allocation23] sm:$0x1] }
 0x7ab   : > { %2175 = vmatmul.mubr.msk.bf16.vlgmr.msra.gmra.mrb[12].mxu0 %vm925_vm3, %v1196_v62  ;;  %v2200_v3 = vpop.f32.mrb[17].mxu1  ;;  %v1454_v4 = vsel %vm925_vm3, %v1448_v2, -inf  ;;  %v1658_v62 = vshrl.u32 %v1657_v50, 7 }
 0x7ac   : > { %1455 = vmax.xlane.f32.xlu0 %v1454_v4  ;;  %v1451_v5 = vpop.f32.mrb[18].mxu1  ;;  %2191 = vmatpush3.bf16.msra.mxu0 %v1361_v1  ;;  %v1655_v1 = vpack.i.b16 %v1653_v63, %v1653_v63 }
 0x7ad   : > { %v2201_v6 = vpop.f32.mrb[19].mxu1  ;;  %2192 = vmatprep.mubr.msk.bf16.mxu0 %vm3059_vm1, %v3058_v13  ;;  %2202 = vmatprep.subr.bf16.mxu0 %v3058_v13 }
 0x7b7   : > { %2193 = vmatmul.mubr.msk.bf16.vlgmr.msra.gmra.mrb[12].mxu0 %vm925_vm3, %v1355_v10  ;;  %v3067_v10 = vmov 0  }
 0x7b8   : > { %2203 = vmatpush3.bf16.msra.mxu0 %v1470_v11  ;;  %2204 = vmatprep.mubr.msk.bf16.mxu0 %vm3059_vm1, %v3058_v13 }
 0x7b9   : > { %2208 = vmatprep.subr.bf16.mxu0 %v3058_v13 }
 0x839   : > { %v1456_v12 = vpop.xlane.xlu0 %1455 }
 0x83a   : > { %v1457_v14 = vsub.f32 %v1448_v2, %v1456_v12  ;;  %v1659_v2 = vsub.s32 0, %v1658_v62 }
 0x83c   : > { %v1458_v15 = vmul.f32 1.442695, %v1457_v14  ;;  %v1660_v3 = vrot.slane %v1655_v1, %v1659_v2 }
 0x83e   : > { %2501 = vpow2.f32 %v1458_v15 }
 0x848   : > { %v2502_v16 = vpop.eup %2501 }
 0x849   : > { %v1460_v17 = vsel %vm925_vm3, %v2502_v16, 0.0  ;;  %v1463_v18 = vpack.c.bf16 %v2502_v16, %v2502_v16 }
 0x84a   : > { %1461 = vadd.xlane.f32.xlu1 %v1460_v17 }
 0x84b   : > { %2205 = vmatmul.mubr.msk.bf16.vlgmr.msra.gmra.mrb[20].mxu0 %vm925_vm3, %v1463_v18 }
 0x84c   : > { %2210 = vmatprep.mubr.msk.bf16.mxu0 %vm3059_vm1, %v3058_v13  ;;  %2209 = vmatpush3.bf16.msra.mxu0 %v1520_v20 }
 0x8d7   : > { %v1462_v21 = vpop.xlane.xlu1 %1461 }
 0x8d8   : > { %2503 = vrcp.f32 %v1462_v21 }
 0x8e2   : > { %v2504_v22 = vpop.eup %2503 }
 0x91e   : > { %v1506_v23 = vpop.f32.mrb[20].mxu0 }
 0x91f   : > { %v1513_v24 = vmul.f32 %v2504_v22, %v1506_v23  ;;  %v2206_v25 = vpop.f32.mrb[21].mxu0 }
 0x920   : > { %v1509_v26 = vpop.f32.mrb[22].mxu0 }
 0x921   : > { %v1514_v27 = vpack.c.bf16 %v1513_v24, %v1513_v24  ;;  %v2207_v28 = vpop.f32.mrb[23].mxu0 }
 0x923   : > { %2211 = vmatmul.mubr.msk.bf16.vlgmr.msra.gmra.mrb[12].mxu0 %vm925_vm3, %v1514_v27 }
 0x9f6   : > { %v1556_v31 = vpop.f32.mrb[12].mxu0 }
 0x9f7   : > { %v3700_v32 = vadd.f32 %v1556_v31, %v923_v30  ;;  %v2212_v33 = vpop.f32.mrb[13].mxu0 }
 0x9f8   : > { %v1559_v34 = vpop.f32.mrb[14].mxu0 }
 0x9f9   : > { %v2213_v35 = vpop.f32.mrb[15].mxu0  ;;  %v1565_v36 = vsel %vm717_vm0, %v3700_v32, 0.0 }
 0x9fa   : > { %1566 = vadd.xlane.f32.xlu0 %v1565_v36 }
 0xa87   : > { %v1567_v37 = vpop.xlane.xlu0 %1566 }
 0xa88   : > { %v1568_v38 = vmul.f32 0.03125, %v1567_v37 }
 0xa8a   : > { %v1569_v39 = vsub.f32 %v3700_v32, %v1568_v38 }
 0xa8c   : > { %v1570_v40 = vmul.f32 %v1569_v39, %v1569_v39 }
 0xa8e   : > { %v1571_v41 = vsel %vm717_vm0, %v1570_v40, 0.0 }
 0xa8f   : > { %1572 = vadd.xlane.f32.xlu0 %v1571_v41 }
 0xb1c   : > { %v1573_v43 = vpop.xlane.xlu0 %1572 }
 0xb1d   : > { %v1574_v44 = vmul.f32 0.03125, %v1573_v43 }
 0xb1f   : > { %v1575_v45 = vadd.f32 1e-05, %v1574_v44 }
 0xb21   : > { %2505 = vrsqrt.f32 %v1575_v45 }
 0xb2b   : > { %v2506_v46 = vpop.eup %2505 }
 0xb2c   : > { %v1577_v48 = vmul.f32 %v2506_v46, %v1569_v39 }
 0xb2e   : > { %v1584_v51 = vmul.f32 %v2066_v47, %v1577_v48 }
 0xb30   : > { %v1591_v52 = vadd.f32 %v2067_v49, %v1584_v51 }
 0xb32   : > { %v1592_v54 = vpack.c.bf16 %v1591_v52, %v1591_v52 }
 0xb34   : > { %2219 = vmatmul.mubr.msk.bf16.vlgmr.msra.gmra.mrb[20].mxu1 %vm717_vm0, %v1592_v54 }
 0xb35   : > { %2223 = vmatpush3.bf16.msra.mxu1 %v2477_v53  ;;  %2238 = vmatprep.mubr.msk.bf16.mxu1 %vm3059_vm1, %v3058_v13 }
 0xb36   : > { %2224 = vmatprep.subr.bf16.mxu1 %v3058_v13 }
 0xb39   : > { %2225 = vmatpush3.bf16.msra.mxu1 %v2478_v55 }
 0xb3a   : > { %2226 = vmatprep.subr.bf16.mxu1 %v3058_v13 }
 0xb3d   : > { %2227 = vmatpush3.bf16.msra.mxu1 %v2479_v56 }
 0xb3e   : > { %2228 = vmatprep.subr.bf16.mxu1 %v3058_v13 }
 0xb41   : > { %2229 = vmatpush3.bf16.msra.mxu1 %v2480_v57 }
 0xb42   : > { %2230 = vmatprep.subr.bf16.mxu1 %v3058_v13 }
 0xb45   : > { %2231 = vmatpush3.bf16.msra.mxu1 %v2481_v58 }
 0xb46   : > { %2232 = vmatprep.subr.bf16.mxu1 %v3058_v13 }
 0xb49   : > { %2233 = vmatpush3.bf16.msra.mxu1 %v2482_v59 }
 0xb4a   : > { %2234 = vmatprep.subr.bf16.mxu1 %v3058_v13 }
 0xb4d   : > { %2235 = vmatpush3.bf16.msra.mxu1 %v2483_v60 }
 0xb4e   : > { %2236 = vmatprep.subr.bf16.mxu1 %v3058_v13  ;;  %v2071_v13 = vld [vmem:[#allocation26] ss:$0 sm:$0xff] }
 0xb51   : > { %2237 = vmatpush3.bf16.msra.mxu1 %v2484_v61 }
 0xc07   : > { %v1646_v4 = vpop.f32.mrb[20].mxu1 }
 0xc08   : > { %v1652_v5 = vpack.c.bf16 %v1646_v4, %v1646_v4  ;;  %v2220_v6 = vpop.f32.mrb[21].mxu1 }
 0xc09   : > { %v1649_v7 = vpop.f32.mrb[22].mxu1 }
 0xc0a   : > { %v1661_v8 = vadd.bf16 %v1660_v3, %v1652_v5  ;;  %v2221_v9 = vpop.f32.mrb[23].mxu1 }
 0xc0c   : > { %v1662_v11 = vmax.bf16 %v3067_v10, %v1661_v8 }
 0xc0e   : > { %2239 = vmatmul.mubr.bf16.vlgmr.msra.gmra.mrb[24].mxu1 %v1662_v11 }
 0xce1   : > { %v1768_v12 = vpop.f32.mrb[24].mxu1 }
 0xce2   : > { %v1769_v14 = vadd.f32 %v2071_v13, %v1768_v12  ;;  %v2240_v15 = vpop.f32.mrb[25].mxu1 }
 0xce3   : > { %v1771_v16 = vpop.f32.mrb[26].mxu1 }
 0xce4   : > { %v1774_v17 = vadd.f32 %v3700_v32, %v1769_v14  ;;  %v2241_v18 = vpop.f32.mrb[27].mxu1 }
 0xce6   : > { %1775 = vst.msk [vmem:[%s708_s15] sm:$0xff] %vm717_vm0, %v1774_v17 }
 0xce7   : > { %2942 = shalt.err (!%p2939_p8)
}
 0xce8   : > { %s2943_s3 = scalar_lea.hbm %s3725_s25, 128  ;;  %s2947_s26 = scalar_lea.hbm %s3839_s17, 256 }
 0xce9   : > { %p2944_p9 = scmp.ne.s32.totalorder %s3725_s25, %s2943_s3  ;;  %p2948_p3 = scmp.lt.u32.totalorder %s3725_s25, %s3839_s17 }
 0xcea   : > { %p2949_p1 = scmp.lt.u32.totalorder %s2947_s26, %s2943_s3  ;;  %p2951_p11 = scmp.lt.u32.totalorder %s2943_s3, %s3725_s25 }
 0xceb   : > { %p2945_p4 = pnand %p2944_p9, %p3840_p0 }
 0xcec   : > { %p2950_p12 = por %p2949_p1, %p2948_p3 }
 0xced   : > { %p2946_p6 = pneg %p2945_p4 }
 0xcee   : > { %p2952_p5 = por %p2951_p11, %p2950_p12 }
 0xcf0   : > { %p2953_p7 = pnand %p2952_p5, %p2946_p6 }
 0xcf2   : > { %2956 = shalt.err (!%p2953_p7)
}
 0xcf3   : > { %2313 = dma.vmem_to_hbm [thread:$0]  (%p3840_p0), %s3727_s24, 128, %s3725_s25, %s1777_s29  }
 0xcf4 PF: > { %s3841_s1 = sld [smem:[#allocation37_spill]]  ;;  %p3842_p10 = scmp.ne.s32.totalorder %s3830_s19, 0 }
 0xcf5   : > { %p3843_p13 = scmp.ge.s32.totalorder %s3039_s23, 2 }
 0xcf7   : > { %p2363_p2 = pnand %p3843_p13, %p3842_p10 }
 0xcfa   : > { %s1803_s2 = sand.u32 1, %s3841_s1  }
 0xcfb   : > { %s1804_s18 = scalar_lea.sflag [#allocation5], %s1803_s2 }
 0xcfc   : > { %3014 = dma.done.wait (!%p2363_p2), %s1804_s18, 128  }
 0xcfd   : > { %3016 = vsyncadd (!%p2363_p2), %s1804_s18, 4294967168  ;;  %s38_s23 = sadd.s32 1, %s3039_s23   ;;  %s3844_s18 = sld [smem:[#allocation38_spill]] }
 0xcfe   : > { %p35_p8 = scmp.ge.s32.totalorder %s38_s23, 4   ;;  %s3845_s19 = sld [smem:[#allocation39_spill]] }
 0xcff   : > { %s3846_s0 = smov %s3851_s20  ;;  %s3847_s20 = smov %s3513_s28 }
 0xd00   : > { %s3848_s21 = smov %s3035_s22  ;;  %s3849_s22 = smov %s3846_s0 }
 0xd01   :  { %37 = sbr.rel (!%p35_p8) target bundleno = 19 (0x13), region = 185 }
 0xd08   :  { %1809 = vsyncpa [#allocation4], 1 }
 0xd09   :  { %1811 = vsyncpa [#allocation4 + $0x1], 1 }
 0xd0a   :  { %1812 = vsyncpa [#allocation7], 1 }
 0xd0b   :  { %1813 = vsyncpa [#allocation10], 1 }
 0xd0c   :  { %1814 = vsyncpa [#allocation13], 1 }
 0xd0d   :  { %1815 = vsyncpa [#allocation16], 1 }
 0xd0e   :  { %1816 = vsyncpa [#allocation19], 1 }
 0xd0f   :  { %1817 = vsyncpa [#allocation22], 1 }
 0xd10   :  { %1818 = vsyncpa [#allocation25], 1 }
 0xd11   :  { %1819 = vsyncpa [#allocation5], 1 }
 0xd12   :  { %1821 = vsyncpa [#allocation5 + $0x1], 1 }

</bundles_post_ra>
